<compile_context>
chip_gen: v6e
topology: v6e:2x2x1
jax: 0.10.0
libtpu: 0.0.40
codegen_flags: <defaults>
</compile_context>

<pallas_src>
import functools

import jax
import jax.numpy as jnp
from jax.experimental import pallas as pl
from jax.experimental.pallas import tpu as pltpu


def _round_up(n, m):
    return ((n + m - 1) // m) * m


def _pad2(a, rows, cols):
    pr, pc = rows - a.shape[0], cols - a.shape[1]
    if pr or pc:
        a = jnp.pad(a, ((0, pr), (0, pc)))
    return a


def _leaky_relu(v, alpha=0.2):
    # nn.LeakyReLU(0.2) from the spec; single VPU max instead of compare+select.
    return jnp.maximum(v, alpha * v)


def _default_num_batch_blocks():
    """2 batch blocks on dual-TensorCore chips (v7x), 1 elsewhere (v5e/v6e)."""
    try:
        kind = jax.devices()[0].device_kind.lower()
    except Exception:
        return 1
    return 2 if ("v7" in kind or "7x" in kind or "v4" in kind or "v5p" in kind) else 1


def _resident_spec(shape, single_buffered):
    """BlockSpec for a weight that is identical on every grid step."""
    index_map = lambda i: (0,) * len(shape)
    if single_buffered:
        # Constant-index block -> no double buffering needed; halves its VMEM.
        return pl.BlockSpec(shape, index_map, pipeline_mode=pl.Buffered(1))
    return pl.BlockSpec(shape, index_map)


# ---------------------------------------------------------------------------
# One-time parameter preparation (hoisted out of the forward pass).
# ---------------------------------------------------------------------------
def prepare_params(params):
    """Pad to lane-dense widths, cast MXU operands to bf16, fuse [mean|log_var].

    Call ONCE at model-load time; `vae_forward` consumes the result directly so
    no per-call pad/cast/concat XLA kernels are emitted.
    """
    f32, bf16 = jnp.float32, jnp.bfloat16
    input_dim, hidden_dim = params["w_in"].shape
    latent_dim = params["w_mean"].shape[1]
    Ip = _round_up(input_dim, 128)
    Hp = _round_up(hidden_dim, 128)
    Lp = _round_up(latent_dim, 128)

    weights = {
        # Encoder.  w_in keeps its TRUE input_dim rows so the wrapper never
        # pads x's feature axis (only its batch axis).
        "w_in":  params["w_in"].astype(bf16) if hidden_dim == Hp
                 else _pad2(params["w_in"], input_dim, Hp).astype(bf16),
        "b_in":  _pad2(params["b_in"], 1, Hp).astype(f32),
        "w_in2": _pad2(params["w_in2"], Hp, Hp).astype(bf16),
        "b_in2": _pad2(params["b_in2"], 1, Hp).astype(f32),
        # Fused [mean | log_var] projection -> one lane-dense (Hp, 2*Lp) matmul.
        "w_mv": jnp.concatenate([_pad2(params["w_mean"], Hp, Lp),
                                 _pad2(params["w_var"], Hp, Lp)], axis=1).astype(bf16),
        "b_mv": jnp.concatenate([_pad2(params["b_mean"], 1, Lp),
                                 _pad2(params["b_var"], 1, Lp)], axis=1).astype(f32),
        # Decoder.
        "w_h1":  _pad2(params["w_h1"], Lp, Hp).astype(bf16),
        "b_h1":  _pad2(params["b_h1"], 1, Hp).astype(f32),
        "w_h2":  _pad2(params["w_h2"], Hp, Hp).astype(bf16),
        "b_h2":  _pad2(params["b_h2"], 1, Hp).astype(f32),
        "w_out": _pad2(params["w_out"], Hp, Ip).astype(bf16),
        "b_out": _pad2(params["b_out"], 1, Ip).astype(f32),
    }
    dims = {"input_dim": input_dim, "hidden_dim": hidden_dim,
            "latent_dim": latent_dim, "Ip": Ip, "Hp": Hp, "Lp": Lp}
    return weights, dims


# ---------------------------------------------------------------------------
# Kernel
# ---------------------------------------------------------------------------
def vae_kernel(
    # inputs (activations tiled on batch, weights VMEM-resident)
    x_ref, eps_ref,
    w_in_ref, b_in_ref, w_in2_ref, b_in2_ref,
    w_mv_ref, b_mv_ref,
    w_h1_ref, b_h1_ref, w_h2_ref, b_h2_ref, w_out_ref, b_out_ref,
    # outputs
    xhat_ref, mv_ref,
    *, lat_pad,
):
    f32 = jnp.float32
    bf16 = jnp.bfloat16

    def dense(a, w_ref, b_ref):
        # bf16 into the MXU, f32 accumulation, f32 bias add on the VPU.
        return jnp.dot(a.astype(bf16), w_ref[...],
                       preferred_element_type=f32) + b_ref[...]

    # ----- Encoder -----
    h = _leaky_relu(dense(x_ref[...], w_in_ref, b_in_ref))
    h = _leaky_relu(dense(h, w_in2_ref, b_in2_ref))

    # Fused mean / log_var projection: one lane-dense [B, 2*Lp] matmul + store.
    mv = dense(h, w_mv_ref, b_mv_ref)
    mv_ref[...] = mv.astype(mv_ref.dtype)

    mean = mv[:, :lat_pad]
    log_var = mv[:, lat_pad:]

    # ----- Reparameterization: z = mean + exp(0.5*log_var) * eps (f32) -----
    z = mean + jnp.exp(0.5 * log_var) * eps_ref[...]

    # ----- Decoder -----
    d = _leaky_relu(dense(z, w_h1_ref, b_h1_ref))
    d = _leaky_relu(dense(d, w_h2_ref, b_h2_ref))
    logits = dense(d, w_out_ref, b_out_ref)

    # sigmoid(x) = 0.5*tanh(0.5*x) + 0.5 : one EUP tanh + one VPU FMA,
    # no live exp temp, exact (no approx reciprocal).
    xhat_ref[...] = (0.5 * jnp.tanh(0.5 * logits) + 0.5).astype(xhat_ref.dtype)


# ---------------------------------------------------------------------------
# Forward wrapper
# ---------------------------------------------------------------------------
def vae_forward(x, eps, weights, dims, *, num_batch_blocks=None,
                out_dtype=jnp.float32, unpad=True):
    """x: [B, input_dim] f32; eps: [B, latent_dim] f32 (the randn_like sample).

    `weights`, `dims` come from `prepare_params` (one-time)."""
    B, input_dim = x.shape
    latent_dim = dims["latent_dim"]
    Ip, Hp, Lp = dims["Ip"], dims["Hp"], dims["Lp"]
    assert input_dim == dims["input_dim"]
    assert eps.shape == (B, latent_dim)

    f32, bf16 = jnp.float32, jnp.bfloat16

    # --- batch tiling: one block per available TensorCore ---
    if num_batch_blocks is None:
        num_batch_blocks = _default_num_batch_blocks()
    block_b = _round_up(pl.cdiv(max(B, 8), num_batch_blocks), 8)
    block_b = min(block_b, 1024)           # keep per-block activations small
    Bp = _round_up(B, block_b)
    grid = (Bp // block_b,)

    # --- activations: cast to bf16 BEFORE padding, pad batch axis only ---
    x_p = x.astype(bf16)
    if Bp != B:
        x_p = jnp.pad(x_p, ((0, Bp - B), (0, 0)))
    # eps is lane-padded so z's padded latent lanes stay exactly zero
    # (mean pad = 0, exp(0.5*0) * 0 = 0) and cannot leak into the decoder
    # (padded w_h1 rows are zero too).
    eps_p = eps.astype(f32)
    if eps_p.shape != (Bp, Lp):
        eps_p = jnp.pad(eps_p, ((0, Bp - B), (0, Lp - latent_dim)))

    weight_args = (weights["w_in"], weights["b_in"],
                   weights["w_in2"], weights["b_in2"],
                   weights["w_mv"], weights["b_mv"],
                   weights["w_h1"], weights["b_h1"],
                   weights["w_h2"], weights["b_h2"],
                   weights["w_out"], weights["b_out"])

    out_shape = (
        jax.ShapeDtypeStruct((Bp, Ip), out_dtype),       # x_hat (padded)
        jax.ShapeDtypeStruct((Bp, 2 * Lp), out_dtype),   # [mean | log_var] slab
    )

    # Advisory cost estimate for XLA's scheduler.
    flops = 2 * Bp * (input_dim * Hp + Hp * Hp + Hp * 2 * Lp
                      + Lp * Hp + Hp * Hp + Hp * Ip)
    transcendentals = Bp * (Lp + Ip)  # reparam exp + sigmoid tanh
    out_itemsize = jnp.dtype(out_dtype).itemsize
    bytes_accessed = (
        int(x_p.size) * x_p.dtype.itemsize + int(eps_p.size) * 4
        + sum(int(a.size) * a.dtype.itemsize for a in weight_args)
        + out_itemsize * (Bp * Ip + Bp * 2 * Lp)
    )

    # VMEM budget: resident weights + double-buffered activation blocks.
    # TODO(synk): all-resident weights assume they fit VMEM (fine up to
    # hidden_dim ~1-2k).  On v7x (64 MiB VMEM) a bf16 4096x4096 weight is
    # 32 MiB -- switch to a K-tiled ("arbitrary") grid axis over the Hp x Hp
    # matmuls in that regime instead of keeping everything resident.
    weight_bytes = sum(int(a.size) * a.dtype.itemsize for a in weight_args)
    act_bytes = 4 * block_b * (input_dim + 2 * Hp + 2 * Lp + Ip)
    vmem_limit = int(min(64 << 20, max(32 << 20, 6 * (weight_bytes + act_bytes))))

    def make_call(single_buffered_weights):
        def batch_spec(cols):
            return pl.BlockSpec((block_b, cols), lambda i: (i, 0))
        in_specs = ([batch_spec(input_dim), batch_spec(Lp)]
                    + [_resident_spec(a.shape, single_buffered_weights)
                       for a in weight_args])
        out_specs = (batch_spec(Ip), batch_spec(2 * Lp))
        return pl.pallas_call(
            functools.partial(vae_kernel, lat_pad=Lp),
            grid=grid,
            out_shape=out_shape,
            in_specs=in_specs,
            out_specs=out_specs,
            compiler_params=pltpu.CompilerParams(
                dimension_semantics=("parallel",),
                vmem_limit_bytes=vmem_limit,
            ),
            cost_estimate=pl.CostEstimate(
                flops=flops,
                transcendentals=transcendentals,
                bytes_accessed=bytes_accessed,
            ),
        )

    try:
        # Preferred: single-buffered resident weights (fetched once per call).
        xhat_p, mv_p = make_call(True)(x_p, eps_p, *weight_args)
        jax.block_until_ready((xhat_p, mv_p))
    except Exception:
        # pl.Buffered(1) / pipeline_mode unsupported on this jax -> default spec.
        xhat_p, mv_p = make_call(False)(x_p, eps_p, *weight_args)

    if not unpad:
        # Padded slabs: consumers (e.g. the VAE loss) can fuse their own
        # slicing instead of paying three extra HBM round-trips here.
        return xhat_p, mv_p

    x_hat = xhat_p if (Bp == B and Ip == input_dim) else xhat_p[:B, :input_dim]
    mean = mv_p[:B, :latent_dim]
    log_var = mv_p[:B, Lp:Lp + latent_dim]
    return x_hat, mean, log_var


# ---------------------------------------------------------------------------
# PyTorch-style init (weights stored as (in, out), biases (1, out))
# ---------------------------------------------------------------------------
def init_params(key, input_dim, hidden_dim, latent_dim):
    def linear(k, fan_in, fan_out):
        kw, kb = jax.random.split(k)
        scale = 1.0 / jnp.sqrt(fan_in)
        w = jax.random.uniform(kw, (fan_in, fan_out), jnp.float32, -scale, scale)
        b = jax.random.uniform(kb, (1, fan_out), jnp.float32, -scale, scale)
        return w, b

    keys = jax.random.split(key, 7)
    p = {}
    p["w_in"], p["b_in"] = linear(keys[0], input_dim, hidden_dim)
    p["w_in2"], p["b_in2"] = linear(keys[1], hidden_dim, hidden_dim)
    p["w_mean"], p["b_mean"] = linear(keys[2], hidden_dim, latent_dim)
    p["w_var"], p["b_var"] = linear(keys[3], hidden_dim, latent_dim)
    p["w_h1"], p["b_h1"] = linear(keys[4], latent_dim, hidden_dim)
    p["w_h2"], p["b_h2"] = linear(keys[5], hidden_dim, hidden_dim)
    p["w_out"], p["b_out"] = linear(keys[6], hidden_dim, input_dim)
    return p


if __name__ == "__main__":
    # Small MLP-VAE shapes (module defaults: hidden=400, latent=200, MNIST 784),
    # shrunk and deliberately NOT multiples of 128 / 8 so the padding and
    # batch-grid paths are exercised.
    B, input_dim, hidden_dim, latent_dim = 200, 196, 96, 48

    key = jax.random.PRNGKey(0)
    k_x, k_eps, k_p = jax.random.split(key, 3)

    x = jax.random.uniform(k_x, (B, input_dim), jnp.float32)      # "image" batch
    eps = jax.random.normal(k_eps, (B, latent_dim), jnp.float32)  # randn_like
    params = init_params(k_p, input_dim, hidden_dim, latent_dim)

    # One-time weight prep (pad / bf16-cast / [mean|log_var] fusion), hoisted
    # out of the per-call forward path.
    weights, dims = prepare_params(params)
    jax.block_until_ready(weights)

    x_hat, mean, log_var = vae_forward(x, eps, weights, dims)
    jax.block_until_ready((x_hat, mean, log_var))

    # Plain-JAX reference mirroring the kernel's bf16-matmul / f32-accumulate.
    def ref_forward(x, eps, p):
        bf16, f32 = jnp.bfloat16, jnp.float32

        def dense(a, w, b):
            return jnp.dot(a.astype(bf16), w.astype(bf16),
                           preferred_element_type=f32) + b

        lrelu = lambda v: jnp.maximum(v, 0.2 * v)
        h = lrelu(dense(x, p["w_in"], p["b_in"]))
        h = lrelu(dense(h, p["w_in2"], p["b_in2"]))
        mean = dense(h, p["w_mean"], p["b_mean"])
        log_var = dense(h, p["w_var"], p["b_var"])
        z = mean + jnp.exp(0.5 * log_var) * eps
        d = lrelu(dense(z, p["w_h1"], p["b_h1"]))
        d = lrelu(dense(d, p["w_h2"], p["b_h2"]))
        return jax.nn.sigmoid(dense(d, p["w_out"], p["b_out"])), mean, log_var

    rx, rm, rv = ref_forward(x, eps, params)
    assert x_hat.shape == (B, input_dim)
    assert mean.shape == (B, latent_dim) and log_var.shape == (B, latent_dim)
    assert jnp.allclose(mean, rm, atol=1e-3), float(jnp.max(jnp.abs(mean - rm)))
    assert jnp.allclose(log_var, rv, atol=1e-3), float(jnp.max(jnp.abs(log_var - rv)))
    assert jnp.allclose(x_hat, rx, atol=5e-3), float(jnp.max(jnp.abs(x_hat - rx)))

    print("KERNEL_OK")
</pallas_src>

<mosaic_0001>
module attributes {stable_mosaic.version = 11 : i64} {
  func.func @vae_kernel(%arg0: i32, %arg1: memref<200x196xbf16, #tpu.memory_space<vmem>>, %arg2: memref<200x128xf32, #tpu.memory_space<vmem>>, %arg3: memref<196x128xbf16, #tpu.memory_space<vmem>>, %arg4: memref<1x128xf32, #tpu.memory_space<vmem>>, %arg5: memref<128x128xbf16, #tpu.memory_space<vmem>>, %arg6: memref<1x128xf32, #tpu.memory_space<vmem>>, %arg7: memref<128x256xbf16, #tpu.memory_space<vmem>>, %arg8: memref<1x256xf32, #tpu.memory_space<vmem>>, %arg9: memref<128x128xbf16, #tpu.memory_space<vmem>>, %arg10: memref<1x128xf32, #tpu.memory_space<vmem>>, %arg11: memref<128x128xbf16, #tpu.memory_space<vmem>>, %arg12: memref<1x128xf32, #tpu.memory_space<vmem>>, %arg13: memref<128x256xbf16, #tpu.memory_space<vmem>>, %arg14: memref<1x256xf32, #tpu.memory_space<vmem>>, %arg15: memref<200x256xf32, #tpu.memory_space<vmem>>, %arg16: memref<200x256xf32, #tpu.memory_space<vmem>>) attributes {dimension_semantics = [#tpu.dimension_semantics<parallel>], iteration_bounds = array<i64: 1>, scalar_prefetch = 0 : i64, scratch_operands = 0 : i64, tpu.core_type = #tpu.core_type<tc>, window_params = [{transform_indices = @transform_0, window_bounds = array<i64: 200, 196>}, {transform_indices = @transform_1, window_bounds = array<i64: 200, 128>}, {pipeline_mode = #tpu.pipeline_mode<synchronous>, transform_indices = @transform_2, window_bounds = array<i64: 196, 128>}, {pipeline_mode = #tpu.pipeline_mode<synchronous>, transform_indices = @transform_3, window_bounds = array<i64: 1, 128>}, {pipeline_mode = #tpu.pipeline_mode<synchronous>, transform_indices = @transform_4, window_bounds = array<i64: 128, 128>}, {pipeline_mode = #tpu.pipeline_mode<synchronous>, transform_indices = @transform_5, window_bounds = array<i64: 1, 128>}, {pipeline_mode = #tpu.pipeline_mode<synchronous>, transform_indices = @transform_6, window_bounds = array<i64: 128, 256>}, {pipeline_mode = #tpu.pipeline_mode<synchronous>, transform_indices = @transform_7, window_bounds = array<i64: 1, 256>}, {pipeline_mode = #tpu.pipeline_mode<synchronous>, transform_indices = @transform_8, window_bounds = array<i64: 128, 128>}, {pipeline_mode = #tpu.pipeline_mode<synchronous>, transform_indices = @transform_9, window_bounds = array<i64: 1, 128>}, {pipeline_mode = #tpu.pipeline_mode<synchronous>, transform_indices = @transform_10, window_bounds = array<i64: 128, 128>}, {pipeline_mode = #tpu.pipeline_mode<synchronous>, transform_indices = @transform_11, window_bounds = array<i64: 1, 128>}, {pipeline_mode = #tpu.pipeline_mode<synchronous>, transform_indices = @transform_12, window_bounds = array<i64: 128, 256>}, {pipeline_mode = #tpu.pipeline_mode<synchronous>, transform_indices = @transform_13, window_bounds = array<i64: 1, 256>}, {transform_indices = @transform_14, window_bounds = array<i64: 200, 256>}, {transform_indices = @transform_15, window_bounds = array<i64: 200, 256>}]} {
    %c0 = arith.constant 0 : index
    %c0_0 = arith.constant 0 : index
    %0 = vector.load %arg1[%c0, %c0_0] : memref<200x196xbf16, #tpu.memory_space<vmem>>, vector<200x196xbf16>
    %c0_1 = arith.constant 0 : index
    %c0_2 = arith.constant 0 : index
    %1 = vector.load %arg3[%c0_1, %c0_2] : memref<196x128xbf16, #tpu.memory_space<vmem>>, vector<196x128xbf16>
    %cst = arith.constant dense<0.000000e+00> : vector<200x128xf32>
    %2 = tpu.matmul %0, %1, %cst {dimension_numbers = #tpu.dot_dimension_numbers<[1], [0], [0], [1], [0, 0, 1, 1], [], []>} : vector<200x196xbf16>, vector<196x128xbf16>, vector<200x128xf32> -> vector<200x128xf32>
    %c0_3 = arith.constant 0 : index
    %c0_4 = arith.constant 0 : index
    %3 = vector.load %arg4[%c0_3, %c0_4] : memref<1x128xf32, #tpu.memory_space<vmem>>, vector<1x128xf32>
    %4 = vector.broadcast %3 : vector<1x128xf32> to vector<200x128xf32>
    %5 = arith.addf %2, %4 : vector<200x128xf32>
    %cst_5 = arith.constant 2.000000e-01 : f32
    %6 = vector.broadcast %cst_5 : f32 to vector<200x128xf32>
    %7 = arith.mulf %6, %5 : vector<200x128xf32>
    %8 = arith.maximumf %5, %7 : vector<200x128xf32>
    %9 = arith.truncf %8 : vector<200x128xf32> to vector<200x128xbf16>
    %c0_6 = arith.constant 0 : index
    %c0_7 = arith.constant 0 : index
    %10 = vector.load %arg5[%c0_6, %c0_7] : memref<128x128xbf16, #tpu.memory_space<vmem>>, vector<128x128xbf16>
    %cst_8 = arith.constant dense<0.000000e+00> : vector<200x128xf32>
    %11 = tpu.matmul %9, %10, %cst_8 {dimension_numbers = #tpu.dot_dimension_numbers<[1], [0], [0], [1], [0, 0, 1, 1], [], []>} : vector<200x128xbf16>, vector<128x128xbf16>, vector<200x128xf32> -> vector<200x128xf32>
    %c0_9 = arith.constant 0 : index
    %c0_10 = arith.constant 0 : index
    %12 = vector.load %arg6[%c0_9, %c0_10] : memref<1x128xf32, #tpu.memory_space<vmem>>, vector<1x128xf32>
    %13 = vector.broadcast %12 : vector<1x128xf32> to vector<200x128xf32>
    %14 = arith.addf %11, %13 : vector<200x128xf32>
    %cst_11 = arith.constant 2.000000e-01 : f32
    %15 = vector.broadcast %cst_11 : f32 to vector<200x128xf32>
    %16 = arith.mulf %15, %14 : vector<200x128xf32>
    %17 = arith.maximumf %14, %16 : vector<200x128xf32>
    %18 = arith.truncf %17 : vector<200x128xf32> to vector<200x128xbf16>
    %c0_12 = arith.constant 0 : index
    %c0_13 = arith.constant 0 : index
    %19 = vector.load %arg7[%c0_12, %c0_13] : memref<128x256xbf16, #tpu.memory_space<vmem>>, vector<128x256xbf16>
    %cst_14 = arith.constant dense<0.000000e+00> : vector<200x256xf32>
    %20 = tpu.matmul %18, %19, %cst_14 {dimension_numbers = #tpu.dot_dimension_numbers<[1], [0], [0], [1], [0, 0, 1, 1], [], []>} : vector<200x128xbf16>, vector<128x256xbf16>, vector<200x256xf32> -> vector<200x256xf32>
    %c0_15 = arith.constant 0 : index
    %c0_16 = arith.constant 0 : index
    %21 = vector.load %arg8[%c0_15, %c0_16] : memref<1x256xf32, #tpu.memory_space<vmem>>, vector<1x256xf32>
    %22 = vector.broadcast %21 : vector<1x256xf32> to vector<200x256xf32>
    %23 = arith.addf %20, %22 : vector<200x256xf32>
    %c0_17 = arith.constant 0 : index
    %c0_18 = arith.constant 0 : index
    %24 = vector.load %arg16[%c0_17, %c0_18] : memref<200x256xf32, #tpu.memory_space<vmem>>, vector<200x256xf32>
    tpu.vector_store %arg16[%c0_17, %c0_18], %23 {strides = array<i32>} : memref<200x256xf32, #tpu.memory_space<vmem>>, vector<200x256xf32>,
    %25 = vector.extract_strided_slice %23 {offsets = [0, 0], sizes = [200, 128], strides = [1, 1]} : vector<200x256xf32> to vector<200x128xf32>
    %26 = vector.extract_strided_slice %23 {offsets = [0, 128], sizes = [200, 128], strides = [1, 1]} : vector<200x256xf32> to vector<200x128xf32>
    %cst_19 = arith.constant 5.000000e-01 : f32
    %27 = vector.broadcast %cst_19 : f32 to vector<200x128xf32>
    %28 = arith.mulf %27, %26 : vector<200x128xf32>
    %29 = math.exp %28 : vector<200x128xf32>
    %c0_20 = arith.constant 0 : index
    %c0_21 = arith.constant 0 : index
    %30 = vector.load %arg2[%c0_20, %c0_21] : memref<200x128xf32, #tpu.memory_space<vmem>>, vector<200x128xf32>
    %31 = arith.mulf %29, %30 : vector<200x128xf32>
    %32 = arith.addf %25, %31 : vector<200x128xf32>
    %33 = arith.truncf %32 : vector<200x128xf32> to vector<200x128xbf16>
    %c0_22 = arith.constant 0 : index
    %c0_23 = arith.constant 0 : index
    %34 = vector.load %arg9[%c0_22, %c0_23] : memref<128x128xbf16, #tpu.memory_space<vmem>>, vector<128x128xbf16>
    %cst_24 = arith.constant dense<0.000000e+00> : vector<200x128xf32>
    %35 = tpu.matmul %33, %34, %cst_24 {dimension_numbers = #tpu.dot_dimension_numbers<[1], [0], [0], [1], [0, 0, 1, 1], [], []>} : vector<200x128xbf16>, vector<128x128xbf16>, vector<200x128xf32> -> vector<200x128xf32>
    %c0_25 = arith.constant 0 : index
    %c0_26 = arith.constant 0 : index
    %36 = vector.load %arg10[%c0_25, %c0_26] : memref<1x128xf32, #tpu.memory_space<vmem>>, vector<1x128xf32>
    %37 = vector.broadcast %36 : vector<1x128xf32> to vector<200x128xf32>
    %38 = arith.addf %35, %37 : vector<200x128xf32>
    %cst_27 = arith.constant 2.000000e-01 : f32
    %39 = vector.broadcast %cst_27 : f32 to vector<200x128xf32>
    %40 = arith.mulf %39, %38 : vector<200x128xf32>
    %41 = arith.maximumf %38, %40 : vector<200x128xf32>
    %42 = arith.truncf %41 : vector<200x128xf32> to vector<200x128xbf16>
    %c0_28 = arith.constant 0 : index
    %c0_29 = arith.constant 0 : index
    %43 = vector.load %arg11[%c0_28, %c0_29] : memref<128x128xbf16, #tpu.memory_space<vmem>>, vector<128x128xbf16>
    %cst_30 = arith.constant dense<0.000000e+00> : vector<200x128xf32>
    %44 = tpu.matmul %42, %43, %cst_30 {dimension_numbers = #tpu.dot_dimension_numbers<[1], [0], [0], [1], [0, 0, 1, 1], [], []>} : vector<200x128xbf16>, vector<128x128xbf16>, vector<200x128xf32> -> vector<200x128xf32>
    %c0_31 = arith.constant 0 : index
    %c0_32 = arith.constant 0 : index
    %45 = vector.load %arg12[%c0_31, %c0_32] : memref<1x128xf32, #tpu.memory_space<vmem>>, vector<1x128xf32>
    %46 = vector.broadcast %45 : vector<1x128xf32> to vector<200x128xf32>
    %47 = arith.addf %44, %46 : vector<200x128xf32>
    %cst_33 = arith.constant 2.000000e-01 : f32
    %48 = vector.broadcast %cst_33 : f32 to vector<200x128xf32>
    %49 = arith.mulf %48, %47 : vector<200x128xf32>
    %50 = arith.maximumf %47, %49 : vector<200x128xf32>
    %51 = arith.truncf %50 : vector<200x128xf32> to vector<200x128xbf16>
    %c0_34 = arith.constant 0 : index
    %c0_35 = arith.constant 0 : index
    %52 = vector.load %arg13[%c0_34, %c0_35] : memref<128x256xbf16, #tpu.memory_space<vmem>>, vector<128x256xbf16>
    %cst_36 = arith.constant dense<0.000000e+00> : vector<200x256xf32>
    %53 = tpu.matmul %51, %52, %cst_36 {dimension_numbers = #tpu.dot_dimension_numbers<[1], [0], [0], [1], [0, 0, 1, 1], [], []>} : vector<200x128xbf16>, vector<128x256xbf16>, vector<200x256xf32> -> vector<200x256xf32>
    %c0_37 = arith.constant 0 : index
    %c0_38 = arith.constant 0 : index
    %54 = vector.load %arg14[%c0_37, %c0_38] : memref<1x256xf32, #tpu.memory_space<vmem>>, vector<1x256xf32>
    %55 = vector.broadcast %54 : vector<1x256xf32> to vector<200x256xf32>
    %56 = arith.addf %53, %55 : vector<200x256xf32>
    %cst_39 = arith.constant 5.000000e-01 : f32
    %57 = vector.broadcast %cst_39 : f32 to vector<200x256xf32>
    %58 = arith.mulf %57, %56 : vector<200x256xf32>
    %59 = math.tanh %58 : vector<200x256xf32>
    %cst_40 = arith.constant 5.000000e-01 : f32
    %60 = vector.broadcast %cst_40 : f32 to vector<200x256xf32>
    %61 = arith.mulf %60, %59 : vector<200x256xf32>
    %cst_41 = arith.constant 5.000000e-01 : f32
    %62 = vector.broadcast %cst_41 : f32 to vector<200x256xf32>
    %63 = arith.addf %61, %62 : vector<200x256xf32>
    %c0_42 = arith.constant 0 : index
    %c0_43 = arith.constant 0 : index
    %64 = vector.load %arg15[%c0_42, %c0_43] : memref<200x256xf32, #tpu.memory_space<vmem>>, vector<200x256xf32>
    tpu.vector_store %arg15[%c0_42, %c0_43], %63 {strides = array<i32>} : memref<200x256xf32, #tpu.memory_space<vmem>>, vector<200x256xf32>,
    return
  }
  func.func @transform_0(%arg0: i32) -> (i32, i32) {
    %c0_i32 = arith.constant 0 : i32
    %c0_i32_0 = arith.constant 0 : i32
    return %arg0, %c0_i32 : i32, i32
  }
  func.func @transform_1(%arg0: i32) -> (i32, i32) {
    %c0_i32 = arith.constant 0 : i32
    %c0_i32_0 = arith.constant 0 : i32
    return %arg0, %c0_i32 : i32, i32
  }
  func.func @transform_2(%arg0: i32) -> (i32, i32) {
    %c0_i32 = arith.constant 0 : i32
    %c0_i32_0 = arith.constant 0 : i32
    %c0_i32_1 = arith.constant 0 : i32
    return %c0_i32, %c0_i32_0 : i32, i32
  }
  func.func @transform_3(%arg0: i32) -> (i32, i32) {
    %c0_i32 = arith.constant 0 : i32
    %c0_i32_0 = arith.constant 0 : i32
    %c0_i32_1 = arith.constant 0 : i32
    return %c0_i32, %c0_i32_0 : i32, i32
  }
  func.func @transform_4(%arg0: i32) -> (i32, i32) {
    %c0_i32 = arith.constant 0 : i32
    %c0_i32_0 = arith.constant 0 : i32
    %c0_i32_1 = arith.constant 0 : i32
    return %c0_i32, %c0_i32_0 : i32, i32
  }
  func.func @transform_5(%arg0: i32) -> (i32, i32) {
    %c0_i32 = arith.constant 0 : i32
    %c0_i32_0 = arith.constant 0 : i32
    %c0_i32_1 = arith.constant 0 : i32
    return %c0_i32, %c0_i32_0 : i32, i32
  }
  func.func @transform_6(%arg0: i32) -> (i32, i32) {
    %c0_i32 = arith.constant 0 : i32
    %c0_i32_0 = arith.constant 0 : i32
    %c0_i32_1 = arith.constant 0 : i32
    return %c0_i32, %c0_i32_0 : i32, i32
  }
  func.func @transform_7(%arg0: i32) -> (i32, i32) {
    %c0_i32 = arith.constant 0 : i32
    %c0_i32_0 = arith.constant 0 : i32
    %c0_i32_1 = arith.constant 0 : i32
    return %c0_i32, %c0_i32_0 : i32, i32
  }
  func.func @transform_8(%arg0: i32) -> (i32, i32) {
    %c0_i32 = arith.constant 0 : i32
    %c0_i32_0 = arith.constant 0 : i32
    %c0_i32_1 = arith.constant 0 : i32
    return %c0_i32, %c0_i32_0 : i32, i32
  }
  func.func @transform_9(%arg0: i32) -> (i32, i32) {
    %c0_i32 = arith.constant 0 : i32
    %c0_i32_0 = arith.constant 0 : i32
    %c0_i32_1 = arith.constant 0 : i32
    return %c0_i32, %c0_i32_0 : i32, i32
  }
  func.func @transform_10(%arg0: i32) -> (i32, i32) {
    %c0_i32 = arith.constant 0 : i32
    %c0_i32_0 = arith.constant 0 : i32
    %c0_i32_1 = arith.constant 0 : i32
    return %c0_i32, %c0_i32_0 : i32, i32
  }
  func.func @transform_11(%arg0: i32) -> (i32, i32) {
    %c0_i32 = arith.constant 0 : i32
    %c0_i32_0 = arith.constant 0 : i32
    %c0_i32_1 = arith.constant 0 : i32
    return %c0_i32, %c0_i32_0 : i32, i32
  }
  func.func @transform_12(%arg0: i32) -> (i32, i32) {
    %c0_i32 = arith.constant 0 : i32
    %c0_i32_0 = arith.constant 0 : i32
    %c0_i32_1 = arith.constant 0 : i32
    return %c0_i32, %c0_i32_0 : i32, i32
  }
  func.func @transform_13(%arg0: i32) -> (i32, i32) {
    %c0_i32 = arith.constant 0 : i32
    %c0_i32_0 = arith.constant 0 : i32
    %c0_i32_1 = arith.constant 0 : i32
    return %c0_i32, %c0_i32_0 : i32, i32
  }
  func.func @transform_14(%arg0: i32) -> (i32, i32) {
    %c0_i32 = arith.constant 0 : i32
    %c0_i32_0 = arith.constant 0 : i32
    return %arg0, %c0_i32 : i32, i32
  }
  func.func @transform_15(%arg0: i32) -> (i32, i32) {
    %c0_i32 = arith.constant 0 : i32
    %c0_i32_0 = arith.constant 0 : i32
    return %arg0, %c0_i32 : i32, i32
  }
}

module attributes {stable_mosaic.version = 11 : i64} {
  func.func @vae_kernel(%arg0: i32, %arg1: memref<200x196xbf16, #tpu.memory_space<vmem>>, %arg2: memref<200x128xf32, #tpu.memory_space<vmem>>, %arg3: memref<196x128xbf16, #tpu.memory_space<vmem>>, %arg4: memref<1x128xf32, #tpu.memory_space<vmem>>, %arg5: memref<128x128xbf16, #tpu.memory_space<vmem>>, %arg6: memref<1x128xf32, #tpu.memory_space<vmem>>, %arg7: memref<128x256xbf16, #tpu.memory_space<vmem>>, %arg8: memref<1x256xf32, #tpu.memory_space<vmem>>, %arg9: memref<128x128xbf16, #tpu.memory_space<vmem>>, %arg10: memref<1x128xf32, #tpu.memory_space<vmem>>, %arg11: memref<128x128xbf16, #tpu.memory_space<vmem>>, %arg12: memref<1x128xf32, #tpu.memory_space<vmem>>, %arg13: memref<128x256xbf16, #tpu.memory_space<vmem>>, %arg14: memref<1x256xf32, #tpu.memory_space<vmem>>, %arg15: memref<200x256xf32, #tpu.memory_space<vmem>>, %arg16: memref<200x256xf32, #tpu.memory_space<vmem>>) attributes {dimension_semantics = [#tpu.dimension_semantics<parallel>], iteration_bounds = array<i64: 1>, scalar_prefetch = 0 : i64, scratch_operands = 0 : i64, tpu.core_type = #tpu.core_type<tc>, window_params = [{transform_indices = @transform_0, window_bounds = array<i64: 200, 196>}, {transform_indices = @transform_1, window_bounds = array<i64: 200, 128>}, {pipeline_mode = #tpu.pipeline_mode<synchronous>, transform_indices = @transform_2, window_bounds = array<i64: 196, 128>}, {pipeline_mode = #tpu.pipeline_mode<synchronous>, transform_indices = @transform_3, window_bounds = array<i64: 1, 128>}, {pipeline_mode = #tpu.pipeline_mode<synchronous>, transform_indices = @transform_4, window_bounds = array<i64: 128, 128>}, {pipeline_mode = #tpu.pipeline_mode<synchronous>, transform_indices = @transform_5, window_bounds = array<i64: 1, 128>}, {pipeline_mode = #tpu.pipeline_mode<synchronous>, transform_indices = @transform_6, window_bounds = array<i64: 128, 256>}, {pipeline_mode = #tpu.pipeline_mode<synchronous>, transform_indices = @transform_7, window_bounds = array<i64: 1, 256>}, {pipeline_mode = #tpu.pipeline_mode<synchronous>, transform_indices = @transform_8, window_bounds = array<i64: 128, 128>}, {pipeline_mode = #tpu.pipeline_mode<synchronous>, transform_indices = @transform_9, window_bounds = array<i64: 1, 128>}, {pipeline_mode = #tpu.pipeline_mode<synchronous>, transform_indices = @transform_10, window_bounds = array<i64: 128, 128>}, {pipeline_mode = #tpu.pipeline_mode<synchronous>, transform_indices = @transform_11, window_bounds = array<i64: 1, 128>}, {pipeline_mode = #tpu.pipeline_mode<synchronous>, transform_indices = @transform_12, window_bounds = array<i64: 128, 256>}, {pipeline_mode = #tpu.pipeline_mode<synchronous>, transform_indices = @transform_13, window_bounds = array<i64: 1, 256>}, {transform_indices = @transform_14, window_bounds = array<i64: 200, 256>}, {transform_indices = @transform_15, window_bounds = array<i64: 200, 256>}]} {
    %c0 = arith.constant 0 : index
    %c0_0 = arith.constant 0 : index
    %0 = vector.load %arg1[%c0, %c0_0] : memref<200x196xbf16, #tpu.memory_space<vmem>>, vector<200x196xbf16>
    %c0_1 = arith.constant 0 : index
    %c0_2 = arith.constant 0 : index
    %1 = vector.load %arg3[%c0_1, %c0_2] : memref<196x128xbf16, #tpu.memory_space<vmem>>, vector<196x128xbf16>
    %cst = arith.constant dense<0.000000e+00> : vector<200x128xf32>
    %2 = tpu.matmul %0, %1, %cst {dimension_numbers = #tpu.dot_dimension_numbers<[1], [0], [0], [1], [0, 0, 1, 1], [], []>} : vector<200x196xbf16>, vector<196x128xbf16>, vector<200x128xf32> -> vector<200x128xf32>
    %c0_3 = arith.constant 0 : index
    %c0_4 = arith.constant 0 : index
    %3 = vector.load %arg4[%c0_3, %c0_4] : memref<1x128xf32, #tpu.memory_space<vmem>>, vector<1x128xf32>
    %4 = vector.broadcast %3 : vector<1x128xf32> to vector<200x128xf32>
    %5 = arith.addf %2, %4 : vector<200x128xf32>
    %cst_5 = arith.constant 2.000000e-01 : f32
    %6 = vector.broadcast %cst_5 : f32 to vector<200x128xf32>
    %7 = arith.mulf %6, %5 : vector<200x128xf32>
    %8 = arith.maximumf %5, %7 : vector<200x128xf32>
    %9 = arith.truncf %8 : vector<200x128xf32> to vector<200x128xbf16>
    %c0_6 = arith.constant 0 : index
    %c0_7 = arith.constant 0 : index
    %10 = vector.load %arg5[%c0_6, %c0_7] : memref<128x128xbf16, #tpu.memory_space<vmem>>, vector<128x128xbf16>
    %cst_8 = arith.constant dense<0.000000e+00> : vector<200x128xf32>
    %11 = tpu.matmul %9, %10, %cst_8 {dimension_numbers = #tpu.dot_dimension_numbers<[1], [0], [0], [1], [0, 0, 1, 1], [], []>} : vector<200x128xbf16>, vector<128x128xbf16>, vector<200x128xf32> -> vector<200x128xf32>
    %c0_9 = arith.constant 0 : index
    %c0_10 = arith.constant 0 : index
    %12 = vector.load %arg6[%c0_9, %c0_10] : memref<1x128xf32, #tpu.memory_space<vmem>>, vector<1x128xf32>
    %13 = vector.broadcast %12 : vector<1x128xf32> to vector<200x128xf32>
    %14 = arith.addf %11, %13 : vector<200x128xf32>
    %cst_11 = arith.constant 2.000000e-01 : f32
    %15 = vector.broadcast %cst_11 : f32 to vector<200x128xf32>
    %16 = arith.mulf %15, %14 : vector<200x128xf32>
    %17 = arith.maximumf %14, %16 : vector<200x128xf32>
    %18 = arith.truncf %17 : vector<200x128xf32> to vector<200x128xbf16>
    %c0_12 = arith.constant 0 : index
    %c0_13 = arith.constant 0 : index
    %19 = vector.load %arg7[%c0_12, %c0_13] : memref<128x256xbf16, #tpu.memory_space<vmem>>, vector<128x256xbf16>
    %cst_14 = arith.constant dense<0.000000e+00> : vector<200x256xf32>
    %20 = tpu.matmul %18, %19, %cst_14 {dimension_numbers = #tpu.dot_dimension_numbers<[1], [0], [0], [1], [0, 0, 1, 1], [], []>} : vector<200x128xbf16>, vector<128x256xbf16>, vector<200x256xf32> -> vector<200x256xf32>
    %c0_15 = arith.constant 0 : index
    %c0_16 = arith.constant 0 : index
    %21 = vector.load %arg8[%c0_15, %c0_16] : memref<1x256xf32, #tpu.memory_space<vmem>>, vector<1x256xf32>
    %22 = vector.broadcast %21 : vector<1x256xf32> to vector<200x256xf32>
    %23 = arith.addf %20, %22 : vector<200x256xf32>
    %c0_17 = arith.constant 0 : index
    %c0_18 = arith.constant 0 : index
    %24 = vector.load %arg16[%c0_17, %c0_18] : memref<200x256xf32, #tpu.memory_space<vmem>>, vector<200x256xf32>
    tpu.vector_store %arg16[%c0_17, %c0_18], %23 {strides = array<i32>} : memref<200x256xf32, #tpu.memory_space<vmem>>, vector<200x256xf32>,
    %25 = vector.extract_strided_slice %23 {offsets = [0, 0], sizes = [200, 128], strides = [1, 1]} : vector<200x256xf32> to vector<200x128xf32>
    %26 = vector.extract_strided_slice %23 {offsets = [0, 128], sizes = [200, 128], strides = [1, 1]} : vector<200x256xf32> to vector<200x128xf32>
    %cst_19 = arith.constant 5.000000e-01 : f32
    %27 = vector.broadcast %cst_19 : f32 to vector<200x128xf32>
    %28 = arith.mulf %27, %26 : vector<200x128xf32>
    %29 = math.exp %28 : vector<200x128xf32>
    %c0_20 = arith.constant 0 : index
    %c0_21 = arith.constant 0 : index
    %30 = vector.load %arg2[%c0_20, %c0_21] : memref<200x128xf32, #tpu.memory_space<vmem>>, vector<200x128xf32>
    %31 = arith.mulf %29, %30 : vector<200x128xf32>
    %32 = arith.addf %25, %31 : vector<200x128xf32>
    %33 = arith.truncf %32 : vector<200x128xf32> to vector<200x128xbf16>
    %c0_22 = arith.constant 0 : index
    %c0_23 = arith.constant 0 : index
    %34 = vector.load %arg9[%c0_22, %c0_23] : memref<128x128xbf16, #tpu.memory_space<vmem>>, vector<128x128xbf16>
    %cst_24 = arith.constant dense<0.000000e+00> : vector<200x128xf32>
    %35 = tpu.matmul %33, %34, %cst_24 {dimension_numbers = #tpu.dot_dimension_numbers<[1], [0], [0], [1], [0, 0, 1, 1], [], []>} : vector<200x128xbf16>, vector<128x128xbf16>, vector<200x128xf32> -> vector<200x128xf32>
    %c0_25 = arith.constant 0 : index
    %c0_26 = arith.constant 0 : index
    %36 = vector.load %arg10[%c0_25, %c0_26] : memref<1x128xf32, #tpu.memory_space<vmem>>, vector<1x128xf32>
    %37 = vector.broadcast %36 : vector<1x128xf32> to vector<200x128xf32>
    %38 = arith.addf %35, %37 : vector<200x128xf32>
    %cst_27 = arith.constant 2.000000e-01 : f32
    %39 = vector.broadcast %cst_27 : f32 to vector<200x128xf32>
    %40 = arith.mulf %39, %38 : vector<200x128xf32>
    %41 = arith.maximumf %38, %40 : vector<200x128xf32>
    %42 = arith.truncf %41 : vector<200x128xf32> to vector<200x128xbf16>
    %c0_28 = arith.constant 0 : index
    %c0_29 = arith.constant 0 : index
    %43 = vector.load %arg11[%c0_28, %c0_29] : memref<128x128xbf16, #tpu.memory_space<vmem>>, vector<128x128xbf16>
    %cst_30 = arith.constant dense<0.000000e+00> : vector<200x128xf32>
    %44 = tpu.matmul %42, %43, %cst_30 {dimension_numbers = #tpu.dot_dimension_numbers<[1], [0], [0], [1], [0, 0, 1, 1], [], []>} : vector<200x128xbf16>, vector<128x128xbf16>, vector<200x128xf32> -> vector<200x128xf32>
    %c0_31 = arith.constant 0 : index
    %c0_32 = arith.constant 0 : index
    %45 = vector.load %arg12[%c0_31, %c0_32] : memref<1x128xf32, #tpu.memory_space<vmem>>, vector<1x128xf32>
    %46 = vector.broadcast %45 : vector<1x128xf32> to vector<200x128xf32>
    %47 = arith.addf %44, %46 : vector<200x128xf32>
    %cst_33 = arith.constant 2.000000e-01 : f32
    %48 = vector.broadcast %cst_33 : f32 to vector<200x128xf32>
    %49 = arith.mulf %48, %47 : vector<200x128xf32>
    %50 = arith.maximumf %47, %49 : vector<200x128xf32>
    %51 = arith.truncf %50 : vector<200x128xf32> to vector<200x128xbf16>
    %c0_34 = arith.constant 0 : index
    %c0_35 = arith.constant 0 : index
    %52 = vector.load %arg13[%c0_34, %c0_35] : memref<128x256xbf16, #tpu.memory_space<vmem>>, vector<128x256xbf16>
    %cst_36 = arith.constant dense<0.000000e+00> : vector<200x256xf32>
    %53 = tpu.matmul %51, %52, %cst_36 {dimension_numbers = #tpu.dot_dimension_numbers<[1], [0], [0], [1], [0, 0, 1, 1], [], []>} : vector<200x128xbf16>, vector<128x256xbf16>, vector<200x256xf32> -> vector<200x256xf32>
    %c0_37 = arith.constant 0 : index
    %c0_38 = arith.constant 0 : index
    %54 = vector.load %arg14[%c0_37, %c0_38] : memref<1x256xf32, #tpu.memory_space<vmem>>, vector<1x256xf32>
    %55 = vector.broadcast %54 : vector<1x256xf32> to vector<200x256xf32>
    %56 = arith.addf %53, %55 : vector<200x256xf32>
    %cst_39 = arith.constant 5.000000e-01 : f32
    %57 = vector.broadcast %cst_39 : f32 to vector<200x256xf32>
    %58 = arith.mulf %57, %56 : vector<200x256xf32>
    %59 = math.tanh %58 : vector<200x256xf32>
    %cst_40 = arith.constant 5.000000e-01 : f32
    %60 = vector.broadcast %cst_40 : f32 to vector<200x256xf32>
    %61 = arith.mulf %60, %59 : vector<200x256xf32>
    %cst_41 = arith.constant 5.000000e-01 : f32
    %62 = vector.broadcast %cst_41 : f32 to vector<200x256xf32>
    %63 = arith.addf %61, %62 : vector<200x256xf32>
    %c0_42 = arith.constant 0 : index
    %c0_43 = arith.constant 0 : index
    %64 = vector.load %arg15[%c0_42, %c0_43] : memref<200x256xf32, #tpu.memory_space<vmem>>, vector<200x256xf32>
    tpu.vector_store %arg15[%c0_42, %c0_43], %63 {strides = array<i32>} : memref<200x256xf32, #tpu.memory_space<vmem>>, vector<200x256xf32>,
    return
  }
  func.func @transform_0(%arg0: i32) -> (i32, i32) {
    %c0_i32 = arith.constant 0 : i32
    %c0_i32_0 = arith.constant 0 : i32
    return %arg0, %c0_i32 : i32, i32
  }
  func.func @transform_1(%arg0: i32) -> (i32, i32) {
    %c0_i32 = arith.constant 0 : i32
    %c0_i32_0 = arith.constant 0 : i32
    return %arg0, %c0_i32 : i32, i32
  }
  func.func @transform_2(%arg0: i32) -> (i32, i32) {
    %c0_i32 = arith.constant 0 : i32
    %c0_i32_0 = arith.constant 0 : i32
    %c0_i32_1 = arith.constant 0 : i32
    return %c0_i32, %c0_i32_0 : i32, i32
  }
  func.func @transform_3(%arg0: i32) -> (i32, i32) {
    %c0_i32 = arith.constant 0 : i32
    %c0_i32_0 = arith.constant 0 : i32
    %c0_i32_1 = arith.constant 0 : i32
    return %c0_i32, %c0_i32_0 : i32, i32
  }
  func.func @transform_4(%arg0: i32) -> (i32, i32) {
    %c0_i32 = arith.constant 0 : i32
    %c0_i32_0 = arith.constant 0 : i32
    %c0_i32_1 = arith.constant 0 : i32
    return %c0_i32, %c0_i32_0 : i32, i32
  }
  func.func @transform_5(%arg0: i32) -> (i32, i32) {
    %c0_i32 = arith.constant 0 : i32
    %c0_i32_0 = arith.constant 0 : i32
    %c0_i32_1 = arith.constant 0 : i32
    return %c0_i32, %c0_i32_0 : i32, i32
  }
  func.func @transform_6(%arg0: i32) -> (i32, i32) {
    %c0_i32 = arith.constant 0 : i32
    %c0_i32_0 = arith.constant 0 : i32
    %c0_i32_1 = arith.constant 0 : i32
    return %c0_i32, %c0_i32_0 : i32, i32
  }
  func.func @transform_7(%arg0: i32) -> (i32, i32) {
    %c0_i32 = arith.constant 0 : i32
    %c0_i32_0 = arith.constant 0 : i32
    %c0_i32_1 = arith.constant 0 : i32
    return %c0_i32, %c0_i32_0 : i32, i32
  }
  func.func @transform_8(%arg0: i32) -> (i32, i32) {
    %c0_i32 = arith.constant 0 : i32
    %c0_i32_0 = arith.constant 0 : i32
    %c0_i32_1 = arith.constant 0 : i32
    return %c0_i32, %c0_i32_0 : i32, i32
  }
  func.func @transform_9(%arg0: i32) -> (i32, i32) {
    %c0_i32 = arith.constant 0 : i32
    %c0_i32_0 = arith.constant 0 : i32
    %c0_i32_1 = arith.constant 0 : i32
    return %c0_i32, %c0_i32_0 : i32, i32
  }
  func.func @transform_10(%arg0: i32) -> (i32, i32) {
    %c0_i32 = arith.constant 0 : i32
    %c0_i32_0 = arith.constant 0 : i32
    %c0_i32_1 = arith.constant 0 : i32
    return %c0_i32, %c0_i32_0 : i32, i32
  }
  func.func @transform_11(%arg0: i32) -> (i32, i32) {
    %c0_i32 = arith.constant 0 : i32
    %c0_i32_0 = arith.constant 0 : i32
    %c0_i32_1 = arith.constant 0 : i32
    return %c0_i32, %c0_i32_0 : i32, i32
  }
  func.func @transform_12(%arg0: i32) -> (i32, i32) {
    %c0_i32 = arith.constant 0 : i32
    %c0_i32_0 = arith.constant 0 : i32
    %c0_i32_1 = arith.constant 0 : i32
    return %c0_i32, %c0_i32_0 : i32, i32
  }
  func.func @transform_13(%arg0: i32) -> (i32, i32) {
    %c0_i32 = arith.constant 0 : i32
    %c0_i32_0 = arith.constant 0 : i32
    %c0_i32_1 = arith.constant 0 : i32
    return %c0_i32, %c0_i32_0 : i32, i32
  }
  func.func @transform_14(%arg0: i32) -> (i32, i32) {
    %c0_i32 = arith.constant 0 : i32
    %c0_i32_0 = arith.constant 0 : i32
    return %arg0, %c0_i32 : i32, i32
  }
  func.func @transform_15(%arg0: i32) -> (i32, i32) {
    %c0_i32 = arith.constant 0 : i32
    %c0_i32_0 = arith.constant 0 : i32
    return %arg0, %c0_i32 : i32, i32
  }
}

</mosaic_0001>

<bundles_post_ra>
// kernel: tpu_custom_call.1
= control target key start
LH: loop header
LB: loop body
LE: loop exit
PB: predicated region body
PF: predicated region fallthrough
CT: control target
= control target key end

     0   :  { %21 = vsyncpa [#allocation3], 0  ;;  %s4086_s0 = inlined_call_operand.hbm [shape: bf16[200,196], index: 0, kind: input, shape index: {}]   ;;  %s4087_s1 = inlined_call_operand.hbm [shape: f32[200,128], index: 1, kind: input, shape index: {}]   ;;  %s4088_s2 = inlined_call_operand.hbm [shape: bf16[196,128], index: 2, kind: input, shape index: {}]   ;;  %s4089_s3 = inlined_call_operand.vmem [shape: f32[1,128], index: 3, kind: input, shape index: {}]   ;;  %s4090_s4 = inlined_call_operand.hbm [shape: bf16[128,128], index: 4, kind: input, shape index: {}]   ;;  %s4091_s5 = inlined_call_operand.vmem [shape: f32[1,128], index: 5, kind: input, shape index: {}]   ;;  %s4092_s6 = inlined_call_operand.hbm [shape: bf16[128,256], index: 6, kind: input, shape index: {}]   ;;  %s4093_s7 = inlined_call_operand.vmem [shape: f32[1,256], index: 7, kind: input, shape index: {}]   ;;  %s4094_s8 = inlined_call_operand.hbm [shape: bf16[128,128], index: 8, kind: input, shape index: {}]   ;;  %s4095_s9 = inlined_call_operand.vmem [shape: f32[1,128], index: 9, kind: input, shape index: {}]   ;;  %s4096_s10 = inlined_call_operand.hbm [shape: bf16[128,128], index: 10, kind: input, shape index: {}]   ;;  %s4097_s11 = inlined_call_operand.vmem [shape: f32[1,128], index: 11, kind: input, shape index: {}]   ;;  %s4098_s12 = inlined_call_operand.hbm [shape: bf16[128,256], index: 12, kind: input, shape index: {}]   ;;  %s4099_s13 = inlined_call_operand.vmem [shape: f32[1,256], index: 13, kind: input, shape index: {}]   ;;  %s4100_s14 = inlined_call_operand.hbm [shape: f32[200,256], index: 14, kind: output, shape index: {0}]   ;;  %s4101_s15 = inlined_call_operand.hbm [shape: f32[200,256], index: 15, kind: output, shape index: {1}]  }
   0x1   :  { %22 = vsyncpa [#allocation6], 0 }
   0x2   :  { %23 = vsyncpa [#allocation9], 0 }
   0x3   :  { %24 = vsyncpa [#allocation12], 0 }
   0x4   :  { %25 = vsyncpa [#allocation15], 0 }
   0x5   :  { %26 = vsyncpa [#allocation4], 0 }
   0x6   :  { %27 = vsyncpa [#allocation18], 0  ;;  %s3399_s18 = smov [#allocation5]  }
   0x7   :  { %s45_s19 = sshll.u32 %s3399_s18, 4  ;;  %s46_s19 = int_to_ptr.vmem [resolvable:$true] %s45_s19 }
   0x8   :  { %s3193_s20 = scalar_lea.vmem %s46_s19, 3200  ;;  %p3198_p1 = scmp.lt.s32.totalorder %s46_s19, %s46_s19 }
   0x9   :  { %p3194_p0 = scmp.ne.s32.totalorder %s46_s19, %s3193_s20  ;;  %p3199_p2 = scmp.lt.s32.totalorder %s3193_s20, %s3193_s20 }
   0xb   :  { %p3200_p3 = por %p3199_p2, %p3198_p1 }
   0xd   :  { %p3201_p4 = pnand %p3200_p3, %p3194_p0 }
   0xf   :  { %3204 = shalt.err (!%p3201_p4)
}
  0x10   :  { %s3400_s21 = smov 128   ;;  %s3401_s22 = smov 8  }
  0x11   :  { %51 = dma.hbm_to_vmem [thread:$0]  %s4087_s1, 3200, %s46_s19, [#allocation6], %s3400_s21, %s3400_s21, %s3401_s22  }
  0x12   :  { %s3402_s25 = smov [#allocation8]   ;;  %s3403_s27 = smov [#allocation11]  }
  0x13   :  { %s71_s26 = sshll.u32 %s3402_s25, 4  ;;  %s99_s28 = sshll.u32 %s3403_s27, 4  ;;  %s72_s26 = int_to_ptr.vmem [resolvable:$true] %s71_s26  ;;  %s100_s28 = int_to_ptr.vmem [resolvable:$true] %s99_s28 }
  0x14   :  { %s3213_s29 = scalar_lea.vmem %s72_s26, 1024  ;;  %p3218_p6 = scmp.lt.s32.totalorder %s72_s26, %s72_s26 }
  0x15   :  { %p3214_p5 = scmp.ne.s32.totalorder %s72_s26, %s3213_s29  ;;  %p3219_p7 = scmp.lt.s32.totalorder %s3213_s29, %s3213_s29 }
  0x17   :  { %p3220_p8 = por %p3219_p7, %p3218_p6 }
  0x19   :  { %p3221_p9 = pnand %p3220_p8, %p3214_p5 }
  0x1b   :  { %3224 = shalt.err (!%p3221_p9)
}
  0x1c   :  { %s3404_s30 = smov 64   ;;  %s3405_s16 = smov 4  }
  0x1d   :  { %77 = dma.hbm_to_vmem [thread:$0]  %s4090_s4, 1024, %s72_s26, [#allocation9], %s3404_s30, %s3404_s30, %s3405_s16  }
  0x1e   :  { %s3233_s1 = scalar_lea.vmem %s100_s28, 1024  ;;  %p3238_p11 = scmp.lt.s32.totalorder %s100_s28, %s100_s28 }
  0x1f   :  { %p3234_p10 = scmp.ne.s32.totalorder %s100_s28, %s3233_s1  ;;  %p3239_p12 = scmp.lt.s32.totalorder %s3233_s1, %s3233_s1 }
  0x21   :  { %p3240_p13 = por %p3239_p12, %p3238_p11 }
  0x23   :  { %p3241_p0 = pnand %p3240_p13, %p3234_p10 }
  0x25   :  { %3244 = shalt.err (!%p3241_p0)
}
  0x26   :  { %105 = dma.hbm_to_vmem [thread:$0]  %s4094_s8, 1024, %s100_s28, [#allocation12], %s3404_s30, %s3404_s30, %s3405_s16  }
  0x27   :  { %s3406_s23 = smov [#allocation2]   ;;  %s3407_s25 = smov [#allocation7]  }
  0x28   :  { %s33_s24 = sshll.u32 %s3406_s23, 4  ;;  %s57_s4 = sshll.u32 %s3407_s25, 4  ;;  %s34_s24 = int_to_ptr.vmem [resolvable:$true] %s33_s24  ;;  %s58_s4 = int_to_ptr.vmem [resolvable:$true] %s57_s4 }
  0x29   :  { %s3253_s26 = scalar_lea.vmem %s34_s24, 3200  ;;  %p3258_p2 = scmp.lt.s32.totalorder %s34_s24, %s34_s24 }
  0x2a   :  { %p3254_p1 = scmp.ne.s32.totalorder %s34_s24, %s3253_s26  ;;  %p3259_p3 = scmp.lt.s32.totalorder %s3253_s26, %s3253_s26 }
  0x2c   :  { %p3260_p4 = por %p3259_p3, %p3258_p2 }
  0x2e   :  { %p3261_p5 = pnand %p3260_p4, %p3254_p1 }
  0x30   :  { %3264 = shalt.err (!%p3261_p5)
}
  0x31   :  { %39 = dma.hbm_to_vmem [thread:$0]  %s4086_s0, 3200, %s34_s24, [#allocation3], %s3400_s21, %s3400_s21, %s3401_s22  }
  0x32   :  { %s3273_s8 = scalar_lea.vmem %s58_s4, 1600  ;;  %p3278_p7 = scmp.lt.s32.totalorder %s58_s4, %s58_s4 }
  0x33   :  { %p3274_p6 = scmp.ne.s32.totalorder %s58_s4, %s3273_s8  ;;  %p3279_p8 = scmp.lt.s32.totalorder %s3273_s8, %s3273_s8 }
  0x35   :  { %p3280_p9 = por %p3279_p8, %p3278_p7 }
  0x37   :  { %p3281_p10 = pnand %p3280_p9, %p3274_p6 }
  0x39   :  { %3284 = shalt.err (!%p3281_p10)
}
  0x3a   :  { %63 = dma.hbm_to_vmem [thread:$0]  %s4088_s2, 1600, %s58_s4, [#allocation6], %s3404_s30, %s3404_s30, %s3405_s16  }
  0x3b   :  { %s3408_s18 = smov [#allocation10]   ;;  %s3409_s19 = smov [#allocation13]  }
  0x3c   :  { %s85_s1 = sshll.u32 %s3408_s18, 4  ;;  %s113_s0 = sshll.u32 %s3409_s19, 4  ;;  %s86_s1 = int_to_ptr.vmem [resolvable:$true] %s85_s1  ;;  %s114_s0 = int_to_ptr.vmem [resolvable:$true] %s113_s0 }
  0x3d   :  { %s3293_s20 = scalar_lea.vmem %s86_s1, 2048  ;;  %p3298_p12 = scmp.lt.s32.totalorder %s86_s1, %s86_s1 }
  0x3e   :  { %p3294_p11 = scmp.ne.s32.totalorder %s86_s1, %s3293_s20  ;;  %p3299_p13 = scmp.lt.s32.totalorder %s3293_s20, %s3293_s20 }
  0x40   :  { %p3300_p0 = por %p3299_p13, %p3298_p12 }
  0x42   :  { %p3301_p1 = pnand %p3300_p0, %p3294_p11 }
  0x44   :  { %3304 = shalt.err (!%p3301_p1)
}
  0x45   :  { %91 = dma.hbm_to_vmem [thread:$0]  %s4092_s6, 2048, %s86_s1, [#allocation9], %s3400_s21, %s3400_s21, %s3401_s22  }
  0x46   :  { %s3313_s2 = scalar_lea.vmem %s114_s0, 1024  ;;  %p3318_p3 = scmp.lt.s32.totalorder %s114_s0, %s114_s0 }
  0x47   :  { %p3314_p2 = scmp.ne.s32.totalorder %s114_s0, %s3313_s2  ;;  %p3319_p4 = scmp.lt.s32.totalorder %s3313_s2, %s3313_s2 }
  0x49   :  { %p3320_p5 = por %p3319_p4, %p3318_p3 }
  0x4b   :  { %p3321_p6 = pnand %p3320_p5, %p3314_p2 }
  0x4d   :  { %3324 = shalt.err (!%p3321_p6)
}
  0x4e   :  { %119 = dma.hbm_to_vmem [thread:$0]  %s4096_s10, 1024, %s114_s0, [#allocation12], %s3404_s30, %s3404_s30, %s3405_s16  }
  0x4f   :  { %s3410_s26 = smov [#allocation14]  }
  0x50   :  { %s127_s27 = sshll.u32 %s3410_s26, 4  ;;  %s128_s27 = int_to_ptr.vmem [resolvable:$true] %s127_s27 }
  0x51   :  { %s3333_s29 = scalar_lea.vmem %s128_s27, 2048  ;;  %p3338_p8 = scmp.lt.s32.totalorder %s128_s27, %s128_s27 }
  0x52   :  { %p3334_p7 = scmp.ne.s32.totalorder %s128_s27, %s3333_s29  ;;  %p3339_p9 = scmp.lt.s32.totalorder %s3333_s29, %s3333_s29 }
  0x54   :  { %p3340_p10 = por %p3339_p9, %p3338_p8 }
  0x56   :  { %p3341_p11 = pnand %p3340_p10, %p3334_p7 }
  0x58   :  { %3344 = shalt.err (!%p3341_p11)
}
  0x59   :  { %133 = dma.hbm_to_vmem [thread:$0]  %s4098_s12, 2048, %s128_s27, [#allocation15], %s3400_s21, %s3400_s21, %s3401_s22  }
  0x5a   :  { %3385 = dma.done.wait [#allocation3], 3200  }
  0x5b   :  { %3386 = vsyncadd [#allocation3], 4294964096 }
  0x5c   :  { %3387 = dma.done.wait [#allocation6], 4800  }
  0x5d   :  { %3388 = vsyncadd [#allocation6], 4294962496 }
  0x5e   :  { %3389 = dma.done.wait [#allocation9], 3072  }
  0x5f   :  { %3390 = vsyncadd [#allocation9], 4294964224 }
  0x60   :  { %3391 = dma.done.wait [#allocation12], 2048  }
  0x61   :  { %3392 = vsyncadd [#allocation12], 4294965248 }
  0x62   :  { %3393 = dma.done.wait [#allocation15], 2048  }
  0x63   :  { %3394 = vsyncadd [#allocation15], 4294965248  ;;  %v3411_v0 = vmov 0   ;;  %v2912_v1 = vld [vmem:[#allocation7 + $0x38] sm:$0xff]   ;;  %v2913_v2 = vld [vmem:[#allocation7 + $0x30] sm:$0xff]   ;;  %vm407_vm0 = vcmask 556032  }
  0x64   :  { %451 = vmatprep.subr.bf16.mxu0 %v3411_v0  ;;  %v2914_v3 = vld [vmem:[#allocation7 + $0x28] sm:$0xff]   ;;  %v2915_v4 = vld [vmem:[#allocation7 + $0x20] sm:$0xff]   ;;  %v2927_v5 = vld [vmem:[#allocation2 + $0x4] ss:$8 sps:$4 sm:$0xff]   ;;  %v3412_v9 = vmov 0.0   ;;  %vm447_vm1 = vcmask 1041408  }
  0x65   :  { %452 = vmatpush1.bf16.msra.mxu0 %v2912_v1  ;;  %v2916_v6 = vld [vmem:[#allocation7 + $0x18] sm:$0xff]   ;;  %2538 = vmatprep.mubr.msk.bf16.mxu0 %vm407_vm0, %v2927_v5  ;;  %v2917_v7 = vld [vmem:[#allocation7 + $0x10] sm:$0xff]   ;;  %v2918_v8 = vld [vmem:[#allocation7 + $0x8] sm:$0xff]   ;;  %vm3413_vm2 = vmmov 0  }
  0x66   :  { %453 = vmatprep.subr.bf16.mxu0 %v3411_v0  ;;  %2673 = vmatprep.subr.bf16.mxu1 %v3412_v9  ;;  %v2919_v10 = vld [vmem:[#allocation7] sm:$0xff]   ;;  %v2964_v14 = vld [vmem:[#allocation8 + $0x30] sm:$0xff]   ;;  %v2965_v16 = vld [vmem:[#allocation8 + $0x28] sm:$0xff]  }
  0x67   :  { %v2920_v11 = vld [vmem:[#allocation7 + $0x60] ss:$0 sps:$4 sm:$0x33]   ;;  %v2921_v15 = vld [vmem:[#allocation7 + $0x58] sm:$0xff]   ;;  %v2922_v17 = vld [vmem:[#allocation7 + $0x50] sm:$0xff]   ;;  %2689 = vmatprep.mubr.msk.bf16.mxu1 %vm3413_vm2, %v3412_v9 }
  0x68   :  { %v2963_v12 = vld [vmem:[#allocation8 + $0x38] sm:$0xff]   ;;  %v449_v13 = vsel %vm447_vm1, %v2920_v11, 0  ;;  %v2966_v18 = vld [vmem:[#allocation8 + $0x20] sm:$0xff]   ;;  %v2925_v22 = vld [vmem:[#allocation2] ss:$8 sps:$4 sm:$0xff]  }
  0x69   :  { %454 = vmatpush1.bf16.msra.mxu0 %v2913_v2  ;;  %2674 = vmatpush3.bf16.msra.mxu1 %v2963_v12  ;;  %v2923_v19 = vld [vmem:[#allocation7 + $0x48] sm:$0xff]   ;;  %v2967_v20 = vld [vmem:[#allocation8 + $0x18] sm:$0xff]   ;;  %v2933_v26 = vld [vmem:[#allocation2 + $0x20] ss:$8 sps:$4 sm:$0xff]  }
  0x6a   :  { %455 = vmatprep.subr.bf16.mxu0 %v3411_v0  ;;  %2675 = vmatprep.subr.bf16.mxu1 %v3412_v9  ;;  %v2924_v21 = vld [vmem:[#allocation7 + $0x40] sm:$0xff]   ;;  %v2931_v25 = vld [vmem:[#allocation2 + $0x24] ss:$8 sps:$4 sm:$0xff]   ;;  %v2939_v30 = vld [vmem:[#allocation2 + $0x40] ss:$8 sps:$4 sm:$0xff]  }
  0x6b   :  { %v2928_v23 = vld [vmem:[#allocation2 + $0x14] ss:$8 sps:$4 sm:$0xff]   ;;  %v2930_v24 = vld [vmem:[#allocation2 + $0x10] ss:$8 sps:$4 sm:$0xff]   ;;  %v2937_v29 = vld [vmem:[#allocation2 + $0x44] ss:$8 sps:$4 sm:$0xff]  }
  0x6c   :  { %v2934_v27 = vld [vmem:[#allocation2 + $0x34] ss:$8 sps:$4 sm:$0xff]   ;;  %v2936_v28 = vld [vmem:[#allocation2 + $0x30] ss:$8 sps:$4 sm:$0xff]   ;;  %v2943_v33 = vld [vmem:[#allocation2 + $0x64] ss:$8 sps:$4 sm:$0xff]  }
  0x6d   :  { %456 = vmatpush1.bf16.msra.mxu0 %v2914_v3  ;;  %2676 = vmatpush3.bf16.msra.mxu1 %v2964_v14  ;;  %v2940_v31 = vld [vmem:[#allocation2 + $0x54] ss:$8 sps:$4 sm:$0xff]   ;;  %v2942_v32 = vld [vmem:[#allocation2 + $0x50] ss:$8 sps:$4 sm:$0xff]   ;;  %v2945_v34 = vld [vmem:[#allocation2 + $0x60] ss:$8 sps:$4 sm:$0xff]  }
  0x6e   :  { %457 = vmatprep.subr.bf16.mxu0 %v3411_v0  ;;  %2677 = vmatprep.subr.bf16.mxu1 %v3412_v9  ;;  %v2946_v35 = vld [vmem:[#allocation2 + $0x74] ss:$8 sps:$4 sm:$0xff]   ;;  %v2948_v36 = vld [vmem:[#allocation2 + $0x70] ss:$8 sps:$4 sm:$0xff]   ;;  %v2949_v37 = vld [vmem:[#allocation2 + $0x84] ss:$8 sps:$4 sm:$0xff]  }
  0x6f   :  { %v2951_v38 = vld [vmem:[#allocation2 + $0x80] ss:$8 sps:$4 sm:$0xff]   ;;  %v2952_v39 = vld [vmem:[#allocation2 + $0x94] ss:$8 sps:$4 sm:$0xff]   ;;  %v2954_v41 = vld [vmem:[#allocation2 + $0x90] ss:$8 sps:$4 sm:$0xff]  }
  0x70   :  { %v2968_v40 = vld [vmem:[#allocation8 + $0x10] sm:$0xff]   ;;  %v2969_v42 = vld [vmem:[#allocation8 + $0x8] sm:$0xff]   ;;  %v2970_v44 = vld [vmem:[#allocation8] sm:$0xff]  }
  0x71   :  { %458 = vmatpush1.bf16.msra.mxu0 %v2915_v4  ;;  %2678 = vmatpush3.bf16.msra.mxu1 %v2965_v16  ;;  %v2955_v43 = vld [vmem:[#allocation2 + $0xa4] ss:$8 sps:$4 sm:$0xff]   ;;  %v2957_v45 = vld [vmem:[#allocation2 + $0xa0] ss:$8 sps:$4 sm:$0xff]   ;;  %v2958_v46 = vld [vmem:[#allocation2 + $0xb4] ss:$8 sps:$4 sm:$0xff]  }
  0x72   :  { %459 = vmatprep.subr.bf16.mxu0 %v3411_v0  ;;  %2679 = vmatprep.subr.bf16.mxu1 %v3412_v9  ;;  %v185_v47 = vld [vmem:[#allocation2 + $0xc0] sm:$0xff]  ;;  %v2960_v48 = vld [vmem:[#allocation2 + $0xb0] ss:$8 sps:$4 sm:$0xff]   ;;  %v2974_v11 = vld [vmem:[#allocation10 + $0x60] ss:$8 sps:$4 sm:$0xff]  }
  0x73   :  { %v2524_v49 = vcombine.high %v185_v47, %v185_v47  ;;  %v2523_v50 = vcombine.low %v185_v47, %v185_v47  ;;  %v2973_v51 = vld [vmem:[#allocation10 + $0x74] ss:$8 sps:$4 sm:$0xff]   ;;  %v3588_v52 = vld [vmem:[%s4089_s3] ss:$0 sm:$0xff]  ;;  %v2971_v3 = vld [vmem:[#allocation10 + $0x70] ss:$8 sps:$4 sm:$0xff]  }
  0x74   :  { %v2976_v5 = vld [vmem:[#allocation10 + $0x64] ss:$8 sps:$4 sm:$0xff]  }
  0x75   :  { %460 = vmatpush1.bf16.msra.mxu0 %v2916_v6  ;;  %2680 = vmatpush3.bf16.msra.mxu1 %v2966_v18 }
  0x76   :  { %461 = vmatprep.subr.bf16.mxu0 %v3411_v0  ;;  %2681 = vmatprep.subr.bf16.mxu1 %v3412_v9 }
  0x79   :  { %462 = vmatpush1.bf16.msra.mxu0 %v2917_v7  ;;  %2682 = vmatpush3.bf16.msra.mxu1 %v2967_v20 }
  0x7a   :  { %463 = vmatprep.subr.bf16.mxu0 %v3411_v0  ;;  %2683 = vmatprep.subr.bf16.mxu1 %v3412_v9 }
  0x7d   :  { %464 = vmatpush1.bf16.msra.mxu0 %v2918_v8  ;;  %2684 = vmatpush3.bf16.msra.mxu1 %v2968_v40 }
  0x7e   :  { %465 = vmatprep.subr.bf16.mxu0 %v3411_v0  ;;  %2685 = vmatprep.subr.bf16.mxu1 %v3412_v9 }
  0x81   :  { %466 = vmatpush1.bf16.msra.mxu0 %v2919_v10  ;;  %2686 = vmatpush3.bf16.msra.mxu1 %v2969_v42 }
  0x82   :  { %473 = vmatprep.subr.bf16.mxu0 %v3411_v0  ;;  %2687 = vmatprep.subr.bf16.mxu1 %v3412_v9 }
  0x85   :  { %474 = vmatpush2.bf16.msra.mxu0 %v449_v13  ;;  %2688 = vmatpush3.bf16.msra.mxu1 %v2970_v44  ;;  %v2979_v13 = vld [vmem:[#allocation10 + $0x54] ss:$8 sps:$4 sm:$0xff]  }
  0x86   :  { %475 = vmatprep.subr.bf16.mxu0 %v3411_v0  ;;  %1028 = vmatprep.subr.bf16.mxu1 %v2973_v51  ;;  %v2994_v51 = vld [vmem:[#allocation10 + $0x4] ss:$8 sps:$4 sm:$0xff]  }
  0x89   :  { %476 = vmatpush2.bf16.msra.mxu0 %v2921_v15 }
  0x8a   :  { %477 = vmatprep.subr.bf16.mxu0 %v3411_v0 }
  0x8d   :  { %478 = vmatpush2.bf16.msra.mxu0 %v2922_v17 }
  0x8e   :  { %479 = vmatprep.subr.bf16.mxu0 %v3411_v0 }
  0x91   :  { %480 = vmatpush2.bf16.msra.mxu0 %v2923_v19  ;;  %v2977_v19 = vld [vmem:[#allocation10 + $0x50] ss:$8 sps:$4 sm:$0xff]  }
  0x92   :  { %481 = vmatprep.subr.bf16.mxu0 %v3411_v0 }
  0x95   :  { %482 = vmatpush2.bf16.msra.mxu0 %v2924_v21  ;;  %v2982_v21 = vld [vmem:[#allocation10 + $0x44] ss:$8 sps:$4 sm:$0xff]  }
  0x96   :  { %2741 = vmatprep.subr.bf16.mxu0 %v3412_v9 }
  0x98   :  { %484 = vmatmul.mubr.bf16.vlgmr.msra.gmra.mxu0 %v2925_v22 }
  0x99   :  { %2539 = vmatprep.mubr.msk.bf16.mxu0 %vm407_vm0, %v2928_v23 }
  0xa0   :  { %492 = vmatmul.mubr.bf16.gmra.mxu0 %v2930_v24 }
  0xa1   :  { %2540 = vmatprep.mubr.msk.bf16.mxu0 %vm407_vm0, %v2931_v25 }
  0xa8   :  { %500 = vmatmul.mubr.bf16.gmra.mxu0 %v2933_v26  ;;  %v2980_v26 = vld [vmem:[#allocation10 + $0x40] ss:$8 sps:$4 sm:$0xff]  }
  0xa9   :  { %2541 = vmatprep.mubr.msk.bf16.mxu0 %vm407_vm0, %v2934_v27 }
  0xb0   :  { %508 = vmatmul.mubr.bf16.gmra.mxu0 %v2936_v28  ;;  %v2985_v28 = vld [vmem:[#allocation10 + $0x34] ss:$8 sps:$4 sm:$0xff]  }
  0xb1   :  { %2542 = vmatprep.mubr.msk.bf16.mxu0 %vm407_vm0, %v2937_v29 }
  0xb8   :  { %516 = vmatmul.mubr.bf16.gmra.mxu0 %v2939_v30 }
  0xb9   :  { %2543 = vmatprep.mubr.msk.bf16.mxu0 %vm407_vm0, %v2940_v31 }
  0xc0   :  { %524 = vmatmul.mubr.bf16.gmra.mxu0 %v2942_v32 }
  0xc1   :  { %2544 = vmatprep.mubr.msk.bf16.mxu0 %vm407_vm0, %v2943_v33 }
  0xc8   :  { %532 = vmatmul.mubr.bf16.gmra.mxu0 %v2945_v34  ;;  %v2983_v34 = vld [vmem:[#allocation10 + $0x30] ss:$8 sps:$4 sm:$0xff]  }
  0xc9   :  { %2545 = vmatprep.mubr.msk.bf16.mxu0 %vm407_vm0, %v2946_v35 }
  0xd0   :  { %540 = vmatmul.mubr.bf16.gmra.mxu0 %v2948_v36  ;;  %v2988_v36 = vld [vmem:[#allocation10 + $0x24] ss:$8 sps:$4 sm:$0xff]  }
  0xd1   :  { %2546 = vmatprep.mubr.msk.bf16.mxu0 %vm407_vm0, %v2949_v37 }
  0xd8   :  { %548 = vmatmul.mubr.bf16.gmra.mxu0 %v2951_v38 }
  0xd9   :  { %2547 = vmatprep.mubr.msk.bf16.mxu0 %vm407_vm0, %v2952_v39 }
  0xe0   :  { %556 = vmatmul.mubr.bf16.gmra.mxu0 %v2954_v41  ;;  %v2986_v41 = vld [vmem:[#allocation10 + $0x20] ss:$8 sps:$4 sm:$0xff]  }
  0xe1   :  { %2548 = vmatprep.mubr.msk.bf16.mxu0 %vm407_vm0, %v2955_v43  ;;  %v2991_v43 = vld [vmem:[#allocation10 + $0x14] ss:$8 sps:$4 sm:$0xff]  }
  0xe8   :  { %564 = vmatmul.mubr.bf16.gmra.mxu0 %v2957_v45 }
  0xe9   :  { %2549 = vmatprep.mubr.msk.bf16.mxu0 %vm407_vm0, %v2958_v46 }
  0xf0   :  { %572 = vmatmul.mubr.bf16.gmra.mxu0 %v2960_v48 }
  0xf1   :  { %2550 = vmatprep.mubr.msk.bf16.mxu0 %vm407_vm0, %v2524_v49  ;;  %v2989_v49 = vld [vmem:[#allocation10 + $0x10] ss:$8 sps:$4 sm:$0xff]  }
  0xf8   :  { %580 = vmatmul.mubr.bf16.gmra.mxu0 %v2523_v50 }
  0xf9   :  { %2757 = vmatprep.mubr.msk.bf16.mxu0 %vm3413_vm2, %v3412_v9 }
 0x158   :  { %v485_v53 = vpop.f32.mrf.mxu0 }
 0x159   :  { %v486_v54 = vadd.f32 %v3588_v52, %v485_v53 }
 0x15a   :  { %v487_v55 = vpop.f32.mrf.mxu0 }
 0x15b   :  { %v587_v57 = vmul.f32 0.2, %v486_v54 }
 0x15c   :  { %v488_v56 = vpop.f32.mrf.mxu0 }
 0x15d   :  { %v489_v58 = vadd.f32 %v3588_v52, %v488_v56  ;;  %v612_v62 = vmax.f32 %v486_v54, %v587_v57  ;;  %v2992_v57 = vld [vmem:[#allocation10] ss:$8 sps:$4 sm:$0xff]  }
 0x15e   :  { %v490_v59 = vpop.f32.mrf.mxu0 }
 0x15f   :  { %v588_v60 = vmul.f32 0.2, %v489_v58 }
 0x160   :  { %v493_v61 = vpop.f32.mrf.mxu0 }
 0x161   :  { %v613_v63 = vmax.f32 %v489_v58, %v588_v60  ;;  %v494_v1 = vadd.f32 %v3588_v52, %v493_v61 }
 0x162   :  { %v495_v2 = vpop.f32.mrf.mxu0 }
 0x163   :  { %v637_v4 = vpack.c.bf16 %v613_v63, %v612_v62  ;;  %v589_v7 = vmul.f32 0.2, %v494_v1 }
 0x164   :  { %v496_v6 = vpop.f32.mrf.mxu0 }
 0x165   :  { %v497_v8 = vadd.f32 %v3588_v52, %v496_v6  ;;  %2690 = vmatmul.mubr.bf16.vlgmr.msra.gmra.mxu1 %v637_v4  ;;  %v614_v15 = vmax.f32 %v494_v1, %v589_v7 }
 0x166   :  { %v498_v10 = vpop.f32.mrf.mxu0  ;;  %2693 = vmatprep.mubr.msk.bf16.mxu1 %vm3413_vm2, %v3412_v9  ;;  %1029 = vmatpush1.bf16.msra.mxu1 %v2971_v3 }
 0x167   :  { %v590_v12 = vmul.f32 0.2, %v497_v8  ;;  %1030 = vmatprep.subr.bf16.mxu1 %v2976_v5 }
 0x168   :  { %v501_v14 = vpop.f32.mrf.mxu0 }
 0x169   :  { %v615_v16 = vmax.f32 %v497_v8, %v590_v12  ;;  %v502_v17 = vadd.f32 %v3588_v52, %v501_v14 }
 0x16a   :  { %v503_v18 = vpop.f32.mrf.mxu0  ;;  %1031 = vmatpush1.bf16.msra.mxu1 %v2974_v11 }
 0x16b   :  { %v638_v20 = vpack.c.bf16 %v615_v16, %v614_v15  ;;  %1032 = vmatprep.subr.bf16.mxu1 %v2979_v13  ;;  %v591_v23 = vmul.f32 0.2, %v502_v17 }
 0x16c   :  { %v504_v22 = vpop.f32.mrf.mxu0 }
 0x16d   :  { %v505_v24 = vadd.f32 %v3588_v52, %v504_v22  ;;  %2694 = vmatmul.mubr.bf16.gmra.mxu1 %v638_v20  ;;  %v616_v30 = vmax.f32 %v502_v17, %v591_v23 }
 0x16e   :  { %v506_v25 = vpop.f32.mrf.mxu0  ;;  %2697 = vmatprep.mubr.msk.bf16.mxu1 %vm3413_vm2, %v3412_v9  ;;  %1033 = vmatpush1.bf16.msra.mxu1 %v2977_v19 }
 0x16f   :  { %v592_v27 = vmul.f32 0.2, %v505_v24  ;;  %1034 = vmatprep.subr.bf16.mxu1 %v2982_v21 }
 0x170   :  { %v509_v29 = vpop.f32.mrf.mxu0 }
 0x171   :  { %v617_v31 = vmax.f32 %v505_v24, %v592_v27  ;;  %v510_v32 = vadd.f32 %v3588_v52, %v509_v29 }
 0x172   :  { %v511_v33 = vpop.f32.mrf.mxu0  ;;  %1035 = vmatpush1.bf16.msra.mxu1 %v2980_v26 }
 0x173   :  { %v639_v35 = vpack.c.bf16 %v617_v31, %v616_v30  ;;  %1036 = vmatprep.subr.bf16.mxu1 %v2985_v28  ;;  %v593_v38 = vmul.f32 0.2, %v510_v32 }
 0x174   :  { %v512_v37 = vpop.f32.mrf.mxu0 }
 0x175   :  { %v513_v39 = vadd.f32 %v3588_v52, %v512_v37  ;;  %2698 = vmatmul.mubr.bf16.gmra.mxu1 %v639_v35  ;;  %v618_v45 = vmax.f32 %v510_v32, %v593_v38 }
 0x176   :  { %v514_v40 = vpop.f32.mrf.mxu0  ;;  %2701 = vmatprep.mubr.msk.bf16.mxu1 %vm3413_vm2, %v3412_v9  ;;  %1037 = vmatpush1.bf16.msra.mxu1 %v2983_v34 }
 0x177   :  { %v594_v42 = vmul.f32 0.2, %v513_v39  ;;  %1038 = vmatprep.subr.bf16.mxu1 %v2988_v36 }
 0x178   :  { %v517_v44 = vpop.f32.mrf.mxu0 }
 0x179   :  { %v619_v46 = vmax.f32 %v513_v39, %v594_v42  ;;  %v518_v47 = vadd.f32 %v3588_v52, %v517_v44 }
 0x17a   :  { %v519_v48 = vpop.f32.mrf.mxu0  ;;  %1039 = vmatpush1.bf16.msra.mxu1 %v2986_v41 }
 0x17b   :  { %v640_v50 = vpack.c.bf16 %v619_v46, %v618_v45  ;;  %1040 = vmatprep.subr.bf16.mxu1 %v2991_v43  ;;  %v595_v54 = vmul.f32 0.2, %v518_v47 }
 0x17c   :  { %v520_v53 = vpop.f32.mrf.mxu0 }
 0x17d   :  { %v521_v55 = vadd.f32 %v3588_v52, %v520_v53  ;;  %2702 = vmatmul.mubr.bf16.gmra.mxu1 %v640_v50  ;;  %v620_v60 = vmax.f32 %v518_v47, %v595_v54 }
 0x17e   :  { %v522_v56 = vpop.f32.mrf.mxu0  ;;  %2705 = vmatprep.mubr.msk.bf16.mxu1 %vm3413_vm2, %v3412_v9  ;;  %1041 = vmatpush1.bf16.msra.mxu1 %v2989_v49 }
 0x17f   :  { %v596_v58 = vmul.f32 0.2, %v521_v55  ;;  %1042 = vmatprep.subr.bf16.mxu1 %v2994_v51 }
 0x180   :  { %v525_v59 = vpop.f32.mrf.mxu0 }
 0x181   :  { %v621_v61 = vmax.f32 %v521_v55, %v596_v58  ;;  %v526_v62 = vadd.f32 %v3588_v52, %v525_v59 }
 0x182   :  { %v527_v63 = vpop.f32.mrf.mxu0  ;;  %1043 = vmatpush1.bf16.msra.mxu1 %v2992_v57 }
 0x183   :  { %v641_v1 = vpack.c.bf16 %v621_v61, %v620_v60  ;;  %2809 = vmatprep.subr.bf16.mxu1 %v3412_v9  ;;  %v597_v3 = vmul.f32 0.2, %v526_v62 }
 0x184   :  { %v528_v2 = vpop.f32.mrf.mxu0 }
 0x185   :  { %v529_v4 = vadd.f32 %v3588_v52, %v528_v2  ;;  %2706 = vmatmul.mubr.bf16.gmra.mxu1 %v641_v1  ;;  %v622_v8 = vmax.f32 %v526_v62, %v597_v3 }
 0x186   :  { %v530_v5 = vpop.f32.mrf.mxu0  ;;  %2709 = vmatprep.mubr.msk.bf16.mxu1 %vm3413_vm2, %v3412_v9 }
 0x187   :  { %v598_v6 = vmul.f32 0.2, %v529_v4 }
 0x188   :  { %v533_v7 = vpop.f32.mrf.mxu0 }
 0x189   :  { %v623_v10 = vmax.f32 %v529_v4, %v598_v6  ;;  %v534_v11 = vadd.f32 %v3588_v52, %v533_v7 }
 0x18a   :  { %v535_v12 = vpop.f32.mrf.mxu0 }
 0x18b   :  { %v642_v13 = vpack.c.bf16 %v623_v10, %v622_v8  ;;  %v599_v15 = vmul.f32 0.2, %v534_v11 }
 0x18c   :  { %v536_v14 = vpop.f32.mrf.mxu0 }
 0x18d   :  { %v537_v16 = vadd.f32 %v3588_v52, %v536_v14  ;;  %2710 = vmatmul.mubr.bf16.gmra.mxu1 %v642_v13  ;;  %v624_v20 = vmax.f32 %v534_v11, %v599_v15 }
 0x18e   :  { %v538_v17 = vpop.f32.mrf.mxu0  ;;  %2713 = vmatprep.mubr.msk.bf16.mxu1 %vm3413_vm2, %v3412_v9 }
 0x18f   :  { %v600_v18 = vmul.f32 0.2, %v537_v16 }
 0x190   :  { %v541_v19 = vpop.f32.mrf.mxu0 }
 0x191   :  { %v625_v21 = vmax.f32 %v537_v16, %v600_v18  ;;  %v542_v22 = vadd.f32 %v3588_v52, %v541_v19 }
 0x192   :  { %v543_v23 = vpop.f32.mrf.mxu0 }
 0x193   :  { %v643_v24 = vpack.c.bf16 %v625_v21, %v624_v20  ;;  %v601_v26 = vmul.f32 0.2, %v542_v22 }
 0x194   :  { %v544_v25 = vpop.f32.mrf.mxu0 }
 0x195   :  { %v545_v27 = vadd.f32 %v3588_v52, %v544_v25  ;;  %2714 = vmatmul.mubr.bf16.gmra.mxu1 %v643_v24  ;;  %v626_v31 = vmax.f32 %v542_v22, %v601_v26  ;;  %v2995_v24 = vld [vmem:[#allocation11 + $0x38] sm:$0xff]   ;;  %v2996_v25 = vld [vmem:[#allocation11 + $0x30] sm:$0xff]   ;;  %v2998_v26 = vld [vmem:[#allocation11 + $0x20] sm:$0xff]  }
 0x196   :  { %v546_v28 = vpop.f32.mrf.mxu0  ;;  %2717 = vmatprep.mubr.msk.bf16.mxu1 %vm3413_vm2, %v3412_v9  ;;  %2742 = vmatpush3.bf16.msra.mxu0 %v2995_v24 }
 0x197   :  { %v602_v29 = vmul.f32 0.2, %v545_v27  ;;  %2743 = vmatprep.subr.bf16.mxu0 %v3412_v9  ;;  %v3648_v28 = vld [vmem:[%s4091_s5] ss:$0 sm:$0xff] }
 0x198   :  { %v549_v30 = vpop.f32.mrf.mxu0 }
 0x199   :  { %v627_v32 = vmax.f32 %v545_v27, %v602_v29  ;;  %v550_v33 = vadd.f32 %v3588_v52, %v549_v30  ;;  %v2999_v27 = vld [vmem:[#allocation11 + $0x18] sm:$0xff]   ;;  %v3000_v29 = vld [vmem:[#allocation11 + $0x10] sm:$0xff]  }
 0x19a   :  { %v551_v34 = vpop.f32.mrf.mxu0  ;;  %2744 = vmatpush3.bf16.msra.mxu0 %v2996_v25 }
 0x19b   :  { %v644_v35 = vpack.c.bf16 %v627_v32, %v626_v31  ;;  %v603_v37 = vmul.f32 0.2, %v550_v33  ;;  %2745 = vmatprep.subr.bf16.mxu0 %v3412_v9 }
 0x19c   :  { %v552_v36 = vpop.f32.mrf.mxu0 }
 0x19d   :  { %v553_v38 = vadd.f32 %v3588_v52, %v552_v36  ;;  %2718 = vmatmul.mubr.bf16.gmra.mxu1 %v644_v35  ;;  %v628_v42 = vmax.f32 %v550_v33, %v603_v37 }
 0x19e   :  { %v554_v39 = vpop.f32.mrf.mxu0  ;;  %2721 = vmatprep.mubr.msk.bf16.mxu1 %vm3413_vm2, %v3412_v9 }
 0x19f   :  { %v604_v40 = vmul.f32 0.2, %v553_v38 }
 0x1a0   :  { %v557_v41 = vpop.f32.mrf.mxu0 }
 0x1a1   :  { %v629_v43 = vmax.f32 %v553_v38, %v604_v40  ;;  %v558_v44 = vadd.f32 %v3588_v52, %v557_v41 }
 0x1a2   :  { %v559_v45 = vpop.f32.mrf.mxu0 }
 0x1a3   :  { %v645_v46 = vpack.c.bf16 %v629_v43, %v628_v42  ;;  %v605_v48 = vmul.f32 0.2, %v558_v44 }
 0x1a4   :  { %v560_v47 = vpop.f32.mrf.mxu0 }
 0x1a5   :  { %v561_v49 = vadd.f32 %v3588_v52, %v560_v47  ;;  %2722 = vmatmul.mubr.bf16.gmra.mxu1 %v645_v46  ;;  %v630_v54 = vmax.f32 %v558_v44, %v605_v48 }
 0x1a6   :  { %v562_v50 = vpop.f32.mrf.mxu0  ;;  %2725 = vmatprep.mubr.msk.bf16.mxu1 %vm3413_vm2, %v3412_v9 }
 0x1a7   :  { %v606_v51 = vmul.f32 0.2, %v561_v49 }
 0x1a8   :  { %v565_v53 = vpop.f32.mrf.mxu0 }
 0x1a9   :  { %v631_v55 = vmax.f32 %v561_v49, %v606_v51  ;;  %v566_v56 = vadd.f32 %v3588_v52, %v565_v53 }
 0x1aa   :  { %v567_v57 = vpop.f32.mrf.mxu0 }
 0x1ab   :  { %v646_v58 = vpack.c.bf16 %v631_v55, %v630_v54  ;;  %v607_v60 = vmul.f32 0.2, %v566_v56 }
 0x1ac   :  { %v568_v59 = vpop.f32.mrf.mxu0 }
 0x1ad   :  { %v569_v61 = vadd.f32 %v3588_v52, %v568_v59  ;;  %2726 = vmatmul.mubr.bf16.gmra.mxu1 %v646_v58  ;;  %v632_v2 = vmax.f32 %v566_v56, %v607_v60 }
 0x1ae   :  { %v570_v62 = vpop.f32.mrf.mxu0  ;;  %2729 = vmatprep.mubr.msk.bf16.mxu1 %vm3413_vm2, %v3412_v9 }
 0x1af   :  { %v608_v63 = vmul.f32 0.2, %v569_v61 }
 0x1b0   :  { %v573_v1 = vpop.f32.mrf.mxu0 }
 0x1b1   :  { %v633_v3 = vmax.f32 %v569_v61, %v608_v63  ;;  %v574_v4 = vadd.f32 %v3588_v52, %v573_v1 }
 0x1b2   :  { %v575_v5 = vpop.f32.mrf.mxu0 }
 0x1b3   :  { %v647_v6 = vpack.c.bf16 %v633_v3, %v632_v2  ;;  %v609_v8 = vmul.f32 0.2, %v574_v4 }
 0x1b4   :  { %v576_v7 = vpop.f32.mrf.mxu0 }
 0x1b5   :  { %v577_v10 = vadd.f32 %v3588_v52, %v576_v7  ;;  %2730 = vmatmul.mubr.bf16.gmra.mxu1 %v647_v6  ;;  %v634_v14 = vmax.f32 %v574_v4, %v609_v8 }
 0x1b6   :  { %v578_v11 = vpop.f32.mrf.mxu0  ;;  %2733 = vmatprep.mubr.msk.bf16.mxu1 %vm3413_vm2, %v3412_v9 }
 0x1b7   :  { %v610_v12 = vmul.f32 0.2, %v577_v10 }
 0x1b8   :  { %v581_v13 = vpop.f32.mrf.mxu0 }
 0x1b9   :  { %v635_v15 = vmax.f32 %v577_v10, %v610_v12  ;;  %v582_v16 = vadd.f32 %v3588_v52, %v581_v13  ;;  %v2997_v52 = vld [vmem:[#allocation11 + $0x28] sm:$0xff]  }
 0x1ba   :  { %v583_v17 = vpop.f32.mrf.mxu0  ;;  %2746 = vmatpush3.bf16.msra.mxu0 %v2997_v52 }
 0x1bb   :  { %v648_v18 = vpack.c.bf16 %v635_v15, %v634_v14  ;;  %v611_v19 = vmul.f32 0.2, %v582_v16  ;;  %2747 = vmatprep.subr.bf16.mxu0 %v3412_v9 }
 0x1bc   :  { %v584_v20 = vpop.f32.mrf.mxu0 }
 0x1bd   :  { %2734 = vmatmul.mubr.bf16.gmra.mxu1 %v648_v18  ;;  %v636_v21 = vmax.f32 %v582_v16, %v611_v19 }
 0x1be   :  { %v585_v22 = vpop.f32.mrf.mxu0  ;;  %2737 = vmatprep.mubr.msk.bf16.mxu1 %vm3413_vm2, %v3412_v9  ;;  %2748 = vmatpush3.bf16.msra.mxu0 %v2998_v26 }
 0x1bf   :  { %v649_v23 = vpack.c.bf16 %v636_v21, %v636_v21  ;;  %2749 = vmatprep.subr.bf16.mxu0 %v3412_v9 }
 0x1c2   :  { %2750 = vmatpush3.bf16.msra.mxu0 %v2999_v27 }
 0x1c3   :  { %2751 = vmatprep.subr.bf16.mxu0 %v3412_v9 }
 0x1c5   :  { %2738 = vmatmul.mubr.bf16.gmra.mxu1 %v649_v23 }
 0x1c6   :  { %1060 = vmatprep.mubr.bf16.mxu1 %v3411_v0  ;;  %2752 = vmatpush3.bf16.msra.mxu0 %v3000_v29 }
 0x1c7   :  { %2753 = vmatprep.subr.bf16.mxu0 %v3412_v9 }
 0x225   :  { %v755_v30 = vpop.f32.mrf.mxu1 }
 0x226   :  { %v756_v31 = vadd.f32 %v3648_v28, %v755_v30 }
 0x227   :  { %v2691_v32 = vpop.f32.mrf.mxu1 }
 0x228   :  { %v857_v34 = vmul.f32 0.2, %v756_v31 }
 0x229   :  { %v758_v33 = vpop.f32.mrf.mxu1 }
 0x22a   :  { %v759_v35 = vadd.f32 %v3648_v28, %v758_v33  ;;  %v882_v39 = vmax.f32 %v756_v31, %v857_v34 }
 0x22b   :  { %v2692_v36 = vpop.f32.mrf.mxu1 }
 0x22c   :  { %v858_v37 = vmul.f32 0.2, %v759_v35 }
 0x22d   :  { %v763_v38 = vpop.f32.mrf.mxu1 }
 0x22e   :  { %v883_v40 = vmax.f32 %v759_v35, %v858_v37  ;;  %v764_v41 = vadd.f32 %v3648_v28, %v763_v38 }
 0x22f   :  { %v2695_v42 = vpop.f32.mrf.mxu1 }
 0x230   :  { %v907_v43 = vpack.c.bf16 %v883_v40, %v882_v39  ;;  %v859_v45 = vmul.f32 0.2, %v764_v41 }
 0x231   :  { %v766_v44 = vpop.f32.mrf.mxu1 }
 0x232   :  { %v767_v46 = vadd.f32 %v3648_v28, %v766_v44  ;;  %1061 = vmatmul.mubr.bf16.vlgmr.msra.gmra.mxu1 %v907_v43  ;;  %v884_v50 = vmax.f32 %v764_v41, %v859_v45 }
 0x233   :  { %v2696_v47 = vpop.f32.mrf.mxu1  ;;  %1070 = vmatprep.mubr.bf16.mxu1 %v3411_v0 }
 0x234   :  { %v860_v48 = vmul.f32 0.2, %v767_v46 }
 0x235   :  { %v771_v49 = vpop.f32.mrf.mxu1 }
 0x236   :  { %v885_v51 = vmax.f32 %v767_v46, %v860_v48  ;;  %v772_v53 = vadd.f32 %v3648_v28, %v771_v49 }
 0x237   :  { %v2699_v54 = vpop.f32.mrf.mxu1 }
 0x238   :  { %v908_v55 = vpack.c.bf16 %v885_v51, %v884_v50  ;;  %v861_v57 = vmul.f32 0.2, %v772_v53 }
 0x239   :  { %v774_v56 = vpop.f32.mrf.mxu1 }
 0x23a   :  { %v775_v58 = vadd.f32 %v3648_v28, %v774_v56  ;;  %1071 = vmatmul.mubr.bf16.gmra.mxu1 %v908_v55  ;;  %v886_v62 = vmax.f32 %v772_v53, %v861_v57 }
 0x23b   :  { %v2700_v59 = vpop.f32.mrf.mxu1  ;;  %1080 = vmatprep.mubr.bf16.mxu1 %v3411_v0 }
 0x23c   :  { %v862_v60 = vmul.f32 0.2, %v775_v58 }
 0x23d   :  { %v779_v61 = vpop.f32.mrf.mxu1 }
 0x23e   :  { %v887_v63 = vmax.f32 %v775_v58, %v862_v60  ;;  %v780_v1 = vadd.f32 %v3648_v28, %v779_v61 }
 0x23f   :  { %v2703_v2 = vpop.f32.mrf.mxu1 }
 0x240   :  { %v909_v3 = vpack.c.bf16 %v887_v63, %v886_v62  ;;  %v863_v5 = vmul.f32 0.2, %v780_v1 }
 0x241   :  { %v782_v4 = vpop.f32.mrf.mxu1 }
 0x242   :  { %v783_v6 = vadd.f32 %v3648_v28, %v782_v4  ;;  %1081 = vmatmul.mubr.bf16.gmra.mxu1 %v909_v3  ;;  %v888_v11 = vmax.f32 %v780_v1, %v863_v5 }
 0x243   :  { %v2704_v7 = vpop.f32.mrf.mxu1  ;;  %1090 = vmatprep.mubr.bf16.mxu1 %v3411_v0 }
 0x244   :  { %v864_v8 = vmul.f32 0.2, %v783_v6 }
 0x245   :  { %v787_v10 = vpop.f32.mrf.mxu1 }
 0x246   :  { %v889_v12 = vmax.f32 %v783_v6, %v864_v8  ;;  %v788_v13 = vadd.f32 %v3648_v28, %v787_v10 }
 0x247   :  { %v2707_v14 = vpop.f32.mrf.mxu1 }
 0x248   :  { %v910_v15 = vpack.c.bf16 %v889_v12, %v888_v11  ;;  %v865_v17 = vmul.f32 0.2, %v788_v13 }
 0x249   :  { %v790_v16 = vpop.f32.mrf.mxu1 }
 0x24a   :  { %v791_v18 = vadd.f32 %v3648_v28, %v790_v16  ;;  %1091 = vmatmul.mubr.bf16.gmra.mxu1 %v910_v15  ;;  %v890_v22 = vmax.f32 %v788_v13, %v865_v17 }
 0x24b   :  { %v2708_v19 = vpop.f32.mrf.mxu1  ;;  %1100 = vmatprep.mubr.bf16.mxu1 %v3411_v0 }
 0x24c   :  { %v866_v20 = vmul.f32 0.2, %v791_v18 }
 0x24d   :  { %v795_v21 = vpop.f32.mrf.mxu1 }
 0x24e   :  { %v891_v23 = vmax.f32 %v791_v18, %v866_v20  ;;  %v796_v24 = vadd.f32 %v3648_v28, %v795_v21 }
 0x24f   :  { %v2711_v25 = vpop.f32.mrf.mxu1 }
 0x250   :  { %v911_v52 = vpack.c.bf16 %v891_v23, %v890_v22  ;;  %v867_v27 = vmul.f32 0.2, %v796_v24 }
 0x251   :  { %v798_v26 = vpop.f32.mrf.mxu1 }
 0x252   :  { %v799_v29 = vadd.f32 %v3648_v28, %v798_v26  ;;  %1101 = vmatmul.mubr.bf16.gmra.mxu1 %v911_v52  ;;  %v892_v33 = vmax.f32 %v796_v24, %v867_v27 }
 0x253   :  { %v2712_v30 = vpop.f32.mrf.mxu1  ;;  %1110 = vmatprep.mubr.bf16.mxu1 %v3411_v0 }
 0x254   :  { %v868_v31 = vmul.f32 0.2, %v799_v29 }
 0x255   :  { %v803_v32 = vpop.f32.mrf.mxu1 }
 0x256   :  { %v893_v34 = vmax.f32 %v799_v29, %v868_v31  ;;  %v804_v35 = vadd.f32 %v3648_v28, %v803_v32  ;;  %v3001_v31 = vld [vmem:[#allocation11 + $0x8] sm:$0xff]  }
 0x257   :  { %v2715_v36 = vpop.f32.mrf.mxu1  ;;  %2754 = vmatpush3.bf16.msra.mxu0 %v3001_v31 }
 0x258   :  { %v912_v37 = vpack.c.bf16 %v893_v34, %v892_v33  ;;  %v869_v39 = vmul.f32 0.2, %v804_v35  ;;  %2755 = vmatprep.subr.bf16.mxu0 %v3412_v9 }
 0x259   :  { %v806_v38 = vpop.f32.mrf.mxu1 }
 0x25a   :  { %v807_v40 = vadd.f32 %v3648_v28, %v806_v38  ;;  %1111 = vmatmul.mubr.bf16.gmra.mxu1 %v912_v37  ;;  %v894_v44 = vmax.f32 %v804_v35, %v869_v39 }
 0x25b   :  { %v2716_v41 = vpop.f32.mrf.mxu1  ;;  %1120 = vmatprep.mubr.bf16.mxu1 %v3411_v0 }
 0x25c   :  { %v870_v42 = vmul.f32 0.2, %v807_v40 }
 0x25d   :  { %v811_v43 = vpop.f32.mrf.mxu1 }
 0x25e   :  { %v895_v45 = vmax.f32 %v807_v40, %v870_v42  ;;  %v812_v46 = vadd.f32 %v3648_v28, %v811_v43 }
 0x25f   :  { %v2719_v47 = vpop.f32.mrf.mxu1 }
 0x260   :  { %v913_v48 = vpack.c.bf16 %v895_v45, %v894_v44  ;;  %v871_v50 = vmul.f32 0.2, %v812_v46 }
 0x261   :  { %v814_v49 = vpop.f32.mrf.mxu1 }
 0x262   :  { %v815_v51 = vadd.f32 %v3648_v28, %v814_v49  ;;  %1121 = vmatmul.mubr.bf16.gmra.mxu1 %v913_v48  ;;  %v896_v56 = vmax.f32 %v812_v46, %v871_v50  ;;  %v3002_v48 = vld [vmem:[#allocation11] sm:$0xff]   ;;  %v938_v50 = vlaneseq }
 0x263   :  { %v2720_v53 = vpop.f32.mrf.mxu1  ;;  %1130 = vmatprep.mubr.bf16.mxu1 %v3411_v0  ;;  %2756 = vmatpush3.bf16.msra.mxu0 %v3002_v48 }
 0x264   :  { %v872_v54 = vmul.f32 0.2, %v815_v51  ;;  %v936_v53 = vld [vmem:[%s4093_s7] sm:$0x3] }
 0x265   :  { %v819_v55 = vpop.f32.mrf.mxu1 }
 0x266   :  { %v897_v57 = vmax.f32 %v815_v51, %v872_v54  ;;  %v820_v58 = vadd.f32 %v3648_v28, %v819_v55  ;;  %v3692_v51 = vshrl.u32 %v938_v50, 7 }
 0x267   :  { %v2723_v59 = vpop.f32.mrf.mxu1 }
 0x268   :  { %v914_v60 = vpack.c.bf16 %v897_v57, %v896_v56  ;;  %v873_v62 = vmul.f32 0.2, %v820_v58  ;;  %v944_v54 = vsub.s32 1, %v3692_v51  ;;  %v3003_v59 = vld [vmem:[#allocation13 + $0x38] sm:$0xff]  }
 0x269   :  { %v822_v61 = vpop.f32.mrf.mxu1  ;;  %2810 = vmatpush3.bf16.msra.mxu1 %v3003_v59  ;;  %v1316_v59 = vld [vmem:[#allocation5 + $0x10] sm:$0xff] }
 0x26a   :  { %v823_v63 = vadd.f32 %v3648_v28, %v822_v61  ;;  %1131 = vmatmul.mubr.bf16.gmra.mxu1 %v914_v60  ;;  %v898_v4 = vmax.f32 %v820_v58, %v873_v62  ;;  %v3705_v56 = vrot.slane %v936_v53, %v944_v54  ;;  %v3004_v62 = vld [vmem:[#allocation13 + $0x30] sm:$0xff]   ;;  %2811 = vmatprep.subr.bf16.mxu1 %v3412_v9 }
 0x26b   :  { %v2724_v1 = vpop.f32.mrf.mxu1  ;;  %1140 = vmatprep.mubr.bf16.mxu1 %v3411_v0 }
 0x26c   :  { %v874_v2 = vmul.f32 0.2, %v823_v63 }
 0x26d   :  { %v827_v3 = vpop.f32.mrf.mxu1  ;;  %2812 = vmatpush3.bf16.msra.mxu1 %v3004_v62 }
 0x26e   :  { %v899_v5 = vmax.f32 %v823_v63, %v874_v2  ;;  %v828_v6 = vadd.f32 %v3648_v28, %v827_v3  ;;  %2813 = vmatprep.subr.bf16.mxu1 %v3412_v9 }
 0x26f   :  { %v2727_v7 = vpop.f32.mrf.mxu1 }
 0x270   :  { %v915_v8 = vpack.c.bf16 %v899_v5, %v898_v4  ;;  %v875_v11 = vmul.f32 0.2, %v828_v6 }
 0x271   :  { %v830_v10 = vpop.f32.mrf.mxu1 }
 0x272   :  { %v831_v12 = vadd.f32 %v3648_v28, %v830_v10  ;;  %1141 = vmatmul.mubr.bf16.gmra.mxu1 %v915_v8  ;;  %v900_v16 = vmax.f32 %v828_v6, %v875_v11  ;;  %v3005_v6 = vld [vmem:[#allocation13 + $0x28] sm:$0xff]  }
 0x273   :  { %v2728_v13 = vpop.f32.mrf.mxu1  ;;  %1150 = vmatprep.mubr.bf16.mxu1 %v3411_v0  ;;  %2814 = vmatpush3.bf16.msra.mxu1 %v3005_v6 }
 0x274   :  { %v876_v14 = vmul.f32 0.2, %v831_v12  ;;  %2815 = vmatprep.subr.bf16.mxu1 %v3412_v9 }
 0x275   :  { %v835_v15 = vpop.f32.mrf.mxu1 }
 0x276   :  { %v901_v17 = vmax.f32 %v831_v12, %v876_v14  ;;  %v836_v18 = vadd.f32 %v3648_v28, %v835_v15  ;;  %v3006_v14 = vld [vmem:[#allocation13 + $0x20] sm:$0xff]  }
 0x277   :  { %v2731_v19 = vpop.f32.mrf.mxu1  ;;  %2816 = vmatpush3.bf16.msra.mxu1 %v3006_v14 }
 0x278   :  { %v916_v20 = vpack.c.bf16 %v901_v17, %v900_v16  ;;  %v877_v22 = vmul.f32 0.2, %v836_v18  ;;  %2817 = vmatprep.subr.bf16.mxu1 %v3412_v9 }
 0x279   :  { %v838_v21 = vpop.f32.mrf.mxu1 }
 0x27a   :  { %v839_v23 = vadd.f32 %v3648_v28, %v838_v21  ;;  %1151 = vmatmul.mubr.bf16.gmra.mxu1 %v916_v20  ;;  %v902_v26 = vmax.f32 %v836_v18, %v877_v22  ;;  %v3007_v21 = vld [vmem:[#allocation13 + $0x18] sm:$0xff]  }
 0x27b   :  { %v2732_v24 = vpop.f32.mrf.mxu1  ;;  %1160 = vmatprep.mubr.bf16.mxu1 %v3411_v0  ;;  %2818 = vmatpush3.bf16.msra.mxu1 %v3007_v21 }
 0x27c   :  { %v878_v25 = vmul.f32 0.2, %v839_v23  ;;  %2819 = vmatprep.subr.bf16.mxu1 %v3412_v9 }
 0x27d   :  { %v843_v52 = vpop.f32.mrf.mxu1 }
 0x27e   :  { %v903_v27 = vmax.f32 %v839_v23, %v878_v25  ;;  %v844_v29 = vadd.f32 %v3648_v28, %v843_v52 }
 0x27f   :  { %v2735_v30 = vpop.f32.mrf.mxu1 }
 0x280   :  { %v917_v32 = vpack.c.bf16 %v903_v27, %v902_v26  ;;  %v879_v34 = vmul.f32 0.2, %v844_v29  ;;  %v3008_v27 = vld [vmem:[#allocation13 + $0x10] sm:$0xff]  }
 0x281   :  { %v846_v33 = vpop.f32.mrf.mxu1  ;;  %2820 = vmatpush3.bf16.msra.mxu1 %v3008_v27 }
 0x282   :  { %v847_v35 = vadd.f32 %v3648_v28, %v846_v33  ;;  %1161 = vmatmul.mubr.bf16.gmra.mxu1 %v917_v32  ;;  %v904_v39 = vmax.f32 %v844_v29, %v879_v34  ;;  %v1314_v32 = vld [vmem:[#allocation5] sm:$0xff]  ;;  %2821 = vmatprep.subr.bf16.mxu1 %v3412_v9 }
 0x283   :  { %v2736_v36 = vpop.f32.mrf.mxu1  ;;  %1170 = vmatprep.mubr.bf16.mxu1 %v3411_v0 }
 0x284   :  { %v880_v37 = vmul.f32 0.2, %v847_v35 }
 0x285   :  { %v851_v38 = vpop.f32.mrf.mxu1 }
 0x286   :  { %v905_v40 = vmax.f32 %v847_v35, %v880_v37  ;;  %v852_v41 = vadd.f32 %v3648_v28, %v851_v38  ;;  %v940_v28 = vsub.s32 0, %v3692_v51  ;;  %v3009_v37 = vld [vmem:[#allocation13 + $0x8] sm:$0xff]  }
 0x287   :  { %v2739_v42 = vpop.f32.mrf.mxu1  ;;  %2822 = vmatpush3.bf16.msra.mxu1 %v3009_v37 }
 0x288   :  { %v881_v43 = vmul.f32 0.2, %v852_v41  ;;  %v918_v44 = vpack.c.bf16 %v905_v40, %v904_v39  ;;  %v3701_v55 = vrot.slane %v936_v53, %v940_v28  ;;  %v1315_v39 = vld [vmem:[#allocation5 + $0x8] sm:$0xff]  ;;  %2823 = vmatprep.subr.bf16.mxu1 %v3412_v9 }
 0x289   :  { %v854_v45 = vpop.f32.mrf.mxu1 }
 0x28a   :  { %v906_v46 = vmax.f32 %v852_v41, %v881_v43  ;;  %1171 = vmatmul.mubr.bf16.gmra.mxu1 %v918_v44 }
 0x28b   :  { %v2740_v47 = vpop.f32.mrf.mxu1  ;;  %1180 = vmatprep.mubr.bf16.mxu1 %v3411_v0 }
 0x28c   :  { %v919_v49 = vpack.c.bf16 %v906_v46, %v906_v46 }
 0x292   :  { %1181 = vmatmul.mubr.bf16.gmra.mxu1 %v919_v49 }
 0x293   :  { %2825 = vmatprep.mubr.msk.bf16.mxu1 %vm3413_vm2, %v3412_v9 }
 0x2f2   :  { %v1062_v57 = vpop.f32.mrf.mxu1 }
 0x2f3   :  { %v3708_v58 = vadd.f32 %v1062_v57, %v3701_v55 }
 0x2f4   :  { %v1064_v60 = vpop.f32.mrf.mxu1 }
 0x2f5   :  { %1189 = vst [vmem:[#allocation17] sm:$0xff] %v3708_v58  ;;  %v1065_v61 = vadd.f32 %v1064_v60, %v3705_v56 }
 0x2f6   :  { %v1066_v63 = vpop.f32.mrf.mxu1 }
 0x2f7   :  { %1190 = vst [vmem:[#allocation17 + $0x8] sm:$0xff] %v1065_v61  ;;  %v1239_v1 = vmul.f32 0.5, %v1065_v61  ;;  %v3714_v2 = vadd.f32 %v1066_v63, %v3701_v55 }
 0x2f8   :  { %v1068_v3 = vpop.f32.mrf.mxu1 }
 0x2f9   :  { %v1264_v4 = vmul.f32 1.442695, %v1239_v1  ;;  %1191 = vst [vmem:[#allocation17 + $0x10] sm:$0xff] %v3714_v2  ;;  %v1069_v5 = vadd.f32 %v1068_v3, %v3705_v56  ;;  %v1317_v3 = vld [vmem:[#allocation5 + $0x18] sm:$0xff] }
 0x2fa   :  { %v1072_v7 = vpop.f32.mrf.mxu1 }
 0x2fb   :  { %3035 = vpow2.f32 %v1264_v4  ;;  %1192 = vst [vmem:[#allocation17 + $0x18] sm:$0xff] %v1069_v5  ;;  %v1240_v8 = vmul.f32 0.5, %v1069_v5  ;;  %v3720_v10 = vadd.f32 %v1072_v7, %v3701_v55 }
 0x2fc   :  { %v1074_v11 = vpop.f32.mrf.mxu1 }
 0x2fd   :  { %v1266_v12 = vmul.f32 1.442695, %v1240_v8  ;;  %1193 = vst [vmem:[#allocation17 + $0x20] sm:$0xff] %v3720_v10  ;;  %v1075_v13 = vadd.f32 %v1074_v11, %v3705_v56 }
 0x2fe   :  { %v1076_v15 = vpop.f32.mrf.mxu1 }
 0x2ff   :  { %3037 = vpow2.f32 %v1266_v12  ;;  %1194 = vst [vmem:[#allocation17 + $0x28] sm:$0xff] %v1075_v13  ;;  %v1241_v16 = vmul.f32 0.5, %v1075_v13  ;;  %v3726_v17 = vadd.f32 %v1076_v15, %v3701_v55 }
 0x300   :  { %v1078_v18 = vpop.f32.mrf.mxu1 }
 0x301   :  { %v1268_v19 = vmul.f32 1.442695, %v1241_v16  ;;  %1195 = vst [vmem:[#allocation17 + $0x30] sm:$0xff] %v3726_v17  ;;  %v1079_v20 = vadd.f32 %v1078_v18, %v3705_v56 }
 0x302   :  { %v1082_v22 = vpop.f32.mrf.mxu1 }
 0x303   :  { %3039 = vpow2.f32 %v1268_v19  ;;  %1196 = vst [vmem:[#allocation17 + $0x38] sm:$0xff] %v1079_v20  ;;  %v1242_v23 = vmul.f32 0.5, %v1079_v20  ;;  %v3732_v24 = vadd.f32 %v1082_v22, %v3701_v55  ;;  %v1318_v19 = vld [vmem:[#allocation5 + $0x20] sm:$0xff] }
 0x304   :  { %v1084_v25 = vpop.f32.mrf.mxu1 }
 0x305   :  { %v1270_v52 = vmul.f32 1.442695, %v1242_v23  ;;  %1197 = vst [vmem:[#allocation17 + $0x40] sm:$0xff] %v3732_v24  ;;  %v1085_v26 = vadd.f32 %v1084_v25, %v3705_v56 }
 0x306   :  { %v1086_v29 = vpop.f32.mrf.mxu1 }
 0x307   :  { %3041 = vpow2.f32 %v1270_v52  ;;  %1198 = vst [vmem:[#allocation17 + $0x48] sm:$0xff] %v1085_v26  ;;  %v1243_v30 = vmul.f32 0.5, %v1085_v26  ;;  %v3738_v31 = vadd.f32 %v1086_v29, %v3701_v55  ;;  %v1319_v26 = vld [vmem:[#allocation5 + $0x28] sm:$0xff] }
 0x308   :  { %v3036_v33 = vpop.eup %3035  ;;  %v1088_v34 = vpop.f32.mrf.mxu1 }
 0x309   :  { %v1272_v35 = vmul.f32 1.442695, %v1243_v30  ;;  %1199 = vst [vmem:[#allocation17 + $0x50] sm:$0xff] %v3738_v31  ;;  %v1089_v36 = vadd.f32 %v1088_v34, %v3705_v56  ;;  %v1339_v40 = vmul.f32 %v3036_v33, %v1314_v32 }
 0x30a   :  { %v1092_v38 = vpop.f32.mrf.mxu1 }
 0x30b   :  { %3043 = vpow2.f32 %v1272_v35  ;;  %1200 = vst [vmem:[#allocation17 + $0x58] sm:$0xff] %v1089_v36  ;;  %v1244_v41 = vmul.f32 0.5, %v1089_v36  ;;  %v3744_v42 = vadd.f32 %v1092_v38, %v3701_v55  ;;  %v1364_v49 = vadd.f32 %v1339_v40, %v3708_v58  ;;  %v1320_v40 = vld [vmem:[#allocation5 + $0x30] sm:$0xff] }
 0x30c   :  { %v3038_v43 = vpop.eup %3037  ;;  %v1094_v44 = vpop.f32.mrf.mxu1 }
 0x30d   :  { %v1274_v45 = vmul.f32 1.442695, %v1244_v41  ;;  %1201 = vst [vmem:[#allocation17 + $0x60] sm:$0xff] %v3744_v42  ;;  %v1095_v46 = vadd.f32 %v1094_v44, %v3705_v56  ;;  %v1340_v47 = vmul.f32 %v3038_v43, %v1315_v39 }
 0x30e   :  { %v1096_v48 = vpop.f32.mrf.mxu1 }
 0x30f   :  { %3045 = vpow2.f32 %v1274_v45  ;;  %1202 = vst [vmem:[#allocation17 + $0x68] sm:$0xff] %v1095_v46  ;;  %v1245_v50 = vmul.f32 0.5, %v1095_v46  ;;  %v3751_v53 = vadd.f32 %v1096_v48, %v3701_v55  ;;  %v1365_v57 = vadd.f32 %v1340_v47, %v3714_v2  ;;  %v1321_v48 = vld [vmem:[#allocation5 + $0x38] sm:$0xff] }
 0x310   :  { %v3040_v60 = vpop.eup %3039  ;;  %v1098_v61 = vpop.f32.mrf.mxu1 }
 0x311   :  { %v1276_v62 = vmul.f32 1.442695, %v1245_v50  ;;  %1203 = vst [vmem:[#allocation17 + $0x70] sm:$0xff] %v3751_v53  ;;  %v1099_v63 = vadd.f32 %v1098_v61, %v3705_v56  ;;  %v1389_v1 = vpack.c.bf16 %v1365_v57, %v1364_v49  ;;  %v1341_v4 = vmul.f32 %v3040_v60, %v1316_v59 }
 0x312   :  { %v1102_v58 = vpop.f32.mrf.mxu1 }
 0x313   :  { %3047 = vpow2.f32 %v1276_v62  ;;  %1204 = vst [vmem:[#allocation17 + $0x78] sm:$0xff] %v1099_v63  ;;  %v1246_v5 = vmul.f32 0.5, %v1099_v63  ;;  %v3757_v6 = vadd.f32 %v1102_v58, %v3701_v55  ;;  %2758 = vmatmul.mubr.bf16.vlgmr.msra.gmra.mxu0 %v1389_v1  ;;  %v1366_v14 = vadd.f32 %v1341_v4, %v3720_v10  ;;  %v1322_v4 = vld [vmem:[#allocation5 + $0x40] sm:$0xff] }
 0x314   :  { %v3042_v2 = vpop.eup %3041  ;;  %v1104_v7 = vpop.f32.mrf.mxu1  ;;  %2761 = vmatprep.mubr.msk.bf16.mxu0 %vm3413_vm2, %v3412_v9 }
 0x315   :  { %v1278_v8 = vmul.f32 1.442695, %v1246_v5  ;;  %1205 = vst [vmem:[#allocation17 + $0x80] sm:$0xff] %v3757_v6  ;;  %v1105_v11 = vadd.f32 %v1104_v7, %v3705_v56  ;;  %v1342_v12 = vmul.f32 %v3042_v2, %v1317_v3 }
 0x316   :  { %v1106_v13 = vpop.f32.mrf.mxu1 }
 0x317   :  { %3049 = vpow2.f32 %v1278_v8  ;;  %1206 = vst [vmem:[#allocation17 + $0x88] sm:$0xff] %v1105_v11  ;;  %v1247_v15 = vmul.f32 0.5, %v1105_v11  ;;  %v3765_v16 = vadd.f32 %v1106_v13, %v3701_v55  ;;  %v1367_v18 = vadd.f32 %v1342_v12, %v3726_v17  ;;  %v1323_v13 = vld [vmem:[#allocation5 + $0x48] sm:$0xff] }
 0x318   :  { %v3044_v20 = vpop.eup %3043  ;;  %v1108_v21 = vpop.f32.mrf.mxu1 }
 0x319   :  { %v1280_v22 = vmul.f32 1.442695, %v1247_v15  ;;  %1207 = vst [vmem:[#allocation17 + $0x90] sm:$0xff] %v3765_v16  ;;  %v1109_v23 = vadd.f32 %v1108_v21, %v3705_v56  ;;  %v1390_v25 = vpack.c.bf16 %v1367_v18, %v1366_v14  ;;  %v1343_v10 = vmul.f32 %v3044_v20, %v1318_v19 }
 0x31a   :  { %v1112_v52 = vpop.f32.mrf.mxu1 }
 0x31b   :  { %3051 = vpow2.f32 %v1280_v22  ;;  %1208 = vst [vmem:[#allocation17 + $0x98] sm:$0xff] %v1109_v23  ;;  %v1248_v27 = vmul.f32 0.5, %v1109_v23  ;;  %v3771_v29 = vadd.f32 %v1112_v52, %v3701_v55  ;;  %2762 = vmatmul.mubr.bf16.gmra.mxu0 %v1390_v25  ;;  %v1368_v36 = vadd.f32 %v1343_v10, %v3732_v24  ;;  %v1324_v10 = vld [vmem:[#allocation5 + $0x50] sm:$0xff] }
 0x31c   :  { %v3046_v17 = vpop.eup %3045  ;;  %v1114_v30 = vpop.f32.mrf.mxu1  ;;  %2765 = vmatprep.mubr.msk.bf16.mxu0 %vm3413_vm2, %v3412_v9 }
 0x31d   :  { %v1282_v32 = vmul.f32 1.442695, %v1248_v27  ;;  %1209 = vst [vmem:[#allocation17 + $0xa0] sm:$0xff] %v3771_v29  ;;  %v1115_v33 = vadd.f32 %v1114_v30, %v3705_v56  ;;  %v1344_v34 = vmul.f32 %v3046_v17, %v1319_v26 }
 0x31e   :  { %v1116_v35 = vpop.f32.mrf.mxu1 }
 0x31f   :  { %3053 = vpow2.f32 %v1282_v32  ;;  %1210 = vst [vmem:[#allocation17 + $0xa8] sm:$0xff] %v1115_v33  ;;  %v1249_v37 = vmul.f32 0.5, %v1115_v33  ;;  %v3779_v38 = vadd.f32 %v1116_v35, %v3701_v55  ;;  %v1369_v39 = vadd.f32 %v1344_v34, %v3738_v31  ;;  %v1325_v35 = vld [vmem:[#allocation5 + $0x58] sm:$0xff] }
 0x320   :  { %v3048_v41 = vpop.eup %3047  ;;  %v1118_v43 = vpop.f32.mrf.mxu1 }
 0x321   :  { %v1284_v44 = vmul.f32 1.442695, %v1249_v37  ;;  %1211 = vst [vmem:[#allocation17 + $0xb0] sm:$0xff] %v3779_v38  ;;  %v1119_v45 = vadd.f32 %v1118_v43, %v3705_v56  ;;  %v1391_v46 = vpack.c.bf16 %v1369_v39, %v1368_v36  ;;  %v1345_v24 = vmul.f32 %v3048_v41, %v1320_v40 }
 0x322   :  { %v1122_v47 = vpop.f32.mrf.mxu1 }
 0x323   :  { %3055 = vpow2.f32 %v1284_v44  ;;  %1212 = vst [vmem:[#allocation17 + $0xb8] sm:$0xff] %v1119_v45  ;;  %v1250_v49 = vmul.f32 0.5, %v1119_v45  ;;  %v3785_v50 = vadd.f32 %v1122_v47, %v3701_v55  ;;  %2766 = vmatmul.mubr.bf16.gmra.mxu0 %v1391_v46  ;;  %v1370_v63 = vadd.f32 %v1345_v24, %v3744_v42  ;;  %v1326_v24 = vld [vmem:[#allocation5 + $0x60] sm:$0xff] }
 0x324   :  { %v3050_v31 = vpop.eup %3049  ;;  %v1124_v57 = vpop.f32.mrf.mxu1  ;;  %2769 = vmatprep.mubr.msk.bf16.mxu0 %vm3413_vm2, %v3412_v9 }
 0x325   :  { %v1286_v59 = vmul.f32 1.442695, %v1250_v49  ;;  %1213 = vst [vmem:[#allocation17 + $0xc0] sm:$0xff] %v3785_v50  ;;  %v1125_v60 = vadd.f32 %v1124_v57, %v3705_v56  ;;  %v1346_v61 = vmul.f32 %v3050_v31, %v1321_v48 }
 0x326   :  { %v1126_v62 = vpop.f32.mrf.mxu1 }
 0x327   :  { %3057 = vpow2.f32 %v1286_v59  ;;  %1214 = vst [vmem:[#allocation17 + $0xc8] sm:$0xff] %v1125_v60  ;;  %v1251_v1 = vmul.f32 0.5, %v1125_v60  ;;  %v3793_v58 = vadd.f32 %v1126_v62, %v3701_v55  ;;  %v1371_v3 = vadd.f32 %v1346_v61, %v3751_v53  ;;  %v1327_v62 = vld [vmem:[#allocation5 + $0x68] sm:$0xff] }
 0x328   :  { %v3052_v5 = vpop.eup %3051  ;;  %v1128_v2 = vpop.f32.mrf.mxu1 }
 0x329   :  { %v1288_v7 = vmul.f32 1.442695, %v1251_v1  ;;  %1215 = vst [vmem:[#allocation17 + $0xd0] sm:$0xff] %v3793_v58  ;;  %v1129_v8 = vadd.f32 %v1128_v2, %v3705_v56  ;;  %v1392_v11 = vpack.c.bf16 %v1371_v3, %v1370_v63  ;;  %v1347_v42 = vmul.f32 %v3052_v5, %v1322_v4 }
 0x32a   :  { %v1132_v12 = vpop.f32.mrf.mxu1 }
 0x32b   :  { %3059 = vpow2.f32 %v1288_v7  ;;  %1216 = vst [vmem:[#allocation17 + $0xd8] sm:$0xff] %v1129_v8  ;;  %v1252_v14 = vmul.f32 0.5, %v1129_v8  ;;  %v3799_v15 = vadd.f32 %v1132_v12, %v3701_v55  ;;  %2770 = vmatmul.mubr.bf16.gmra.mxu0 %v1392_v11  ;;  %v1372_v23 = vadd.f32 %v1347_v42, %v3757_v6  ;;  %v1328_v42 = vld [vmem:[#allocation5 + $0x70] sm:$0xff] }
 0x32c   :  { %v3054_v53 = vpop.eup %3053  ;;  %v1134_v18 = vpop.f32.mrf.mxu1  ;;  %2773 = vmatprep.mubr.msk.bf16.mxu0 %vm3413_vm2, %v3412_v9 }
 0x32d   :  { %v1290_v19 = vmul.f32 1.442695, %v1252_v14  ;;  %1217 = vst [vmem:[#allocation17 + $0xe0] sm:$0xff] %v3799_v15  ;;  %v1135_v20 = vadd.f32 %v1134_v18, %v3705_v56  ;;  %v1348_v21 = vmul.f32 %v3054_v53, %v1323_v13 }
 0x32e   :  { %v1136_v22 = vpop.f32.mrf.mxu1 }
 0x32f   :  { %3061 = vpow2.f32 %v1290_v19  ;;  %1218 = vst [vmem:[#allocation17 + $0xe8] sm:$0xff] %v1135_v20  ;;  %v1253_v25 = vmul.f32 0.5, %v1135_v20  ;;  %v3807_v52 = vadd.f32 %v1136_v22, %v3701_v55  ;;  %v1373_v26 = vadd.f32 %v1348_v21, %v3765_v16  ;;  %v1329_v22 = vld [vmem:[#allocation5 + $0x78] sm:$0xff] }
 0x330   :  { %v3056_v27 = vpop.eup %3055  ;;  %v1138_v17 = vpop.f32.mrf.mxu1 }
 0x331   :  { %v1292_v30 = vmul.f32 1.442695, %v1253_v25  ;;  %1219 = vst [vmem:[#allocation17 + $0xf0] sm:$0xff] %v3807_v52  ;;  %v1139_v32 = vadd.f32 %v1138_v17, %v3705_v56  ;;  %v1393_v33 = vpack.c.bf16 %v1373_v26, %v1372_v23  ;;  %v1349_v6 = vmul.f32 %v3056_v27, %v1324_v10 }
 0x332   :  { %v1142_v34 = vpop.f32.mrf.mxu1 }
 0x333   :  { %3063 = vpow2.f32 %v1292_v30  ;;  %1220 = vst [vmem:[#allocation17 + $0xf8] sm:$0xff] %v1139_v32  ;;  %v1254_v36 = vmul.f32 0.5, %v1139_v32  ;;  %v3813_v37 = vadd.f32 %v1142_v34, %v3701_v55  ;;  %2774 = vmatmul.mubr.bf16.gmra.mxu0 %v1393_v33  ;;  %v1374_v45 = vadd.f32 %v1349_v6, %v3771_v29  ;;  %v1330_v6 = vld [vmem:[#allocation5 + $0x80] sm:$0xff] }
 0x334   :  { %v3058_v16 = vpop.eup %3057  ;;  %v1144_v39 = vpop.f32.mrf.mxu1  ;;  %2777 = vmatprep.mubr.msk.bf16.mxu0 %vm3413_vm2, %v3412_v9 }
 0x335   :  { %v1294_v40 = vmul.f32 1.442695, %v1254_v36  ;;  %1221 = vst [vmem:[#allocation17 + $0x100] sm:$0xff] %v3813_v37  ;;  %v1145_v41 = vadd.f32 %v1144_v39, %v3705_v56  ;;  %v1350_v43 = vmul.f32 %v3058_v16, %v1325_v35 }
 0x336   :  { %v1146_v44 = vpop.f32.mrf.mxu1 }
 0x337   :  { %3065 = vpow2.f32 %v1294_v40  ;;  %1222 = vst [vmem:[#allocation17 + $0x108] sm:$0xff] %v1145_v41  ;;  %v1255_v46 = vmul.f32 0.5, %v1145_v41  ;;  %v3821_v47 = vadd.f32 %v1146_v44, %v3701_v55  ;;  %v1375_v48 = vadd.f32 %v1350_v43, %v3779_v38  ;;  %v1331_v44 = vld [vmem:[#allocation5 + $0x88] sm:$0xff] }
 0x338   :  { %v3060_v49 = vpop.eup %3059  ;;  %v1148_v31 = vpop.f32.mrf.mxu1 }
 0x339   :  { %v1296_v57 = vmul.f32 1.442695, %v1255_v46  ;;  %1223 = vst [vmem:[#allocation17 + $0x110] sm:$0xff] %v3821_v47  ;;  %v1149_v59 = vadd.f32 %v1148_v31, %v3705_v56  ;;  %v1394_v60 = vpack.c.bf16 %v1375_v48, %v1374_v45  ;;  %v1351_v29 = vmul.f32 %v3060_v49, %v1326_v24 }
 0x33a   :  { %v1152_v61 = vpop.f32.mrf.mxu1 }
 0x33b   :  { %3067 = vpow2.f32 %v1296_v57  ;;  %1224 = vst [vmem:[#allocation17 + $0x118] sm:$0xff] %v1149_v59  ;;  %v1256_v63 = vmul.f32 0.5, %v1149_v59  ;;  %v3827_v1 = vadd.f32 %v1152_v61, %v3701_v55  ;;  %2778 = vmatmul.mubr.bf16.gmra.mxu0 %v1394_v60  ;;  %v1376_v8 = vadd.f32 %v1351_v29, %v3785_v50 }
 0x33c   :  { %v3062_v38 = vpop.eup %3061  ;;  %v1154_v3 = vpop.f32.mrf.mxu1  ;;  %2781 = vmatprep.mubr.msk.bf16.mxu0 %vm3413_vm2, %v3412_v9 }
 0x33d   :  { %v1298_v4 = vmul.f32 1.442695, %v1256_v63  ;;  %1225 = vst [vmem:[#allocation17 + $0x120] sm:$0xff] %v3827_v1  ;;  %v1155_v5 = vadd.f32 %v1154_v3, %v3705_v56  ;;  %v1352_v2 = vmul.f32 %v3062_v38, %v1327_v62  ;;  %v1332_v38 = vld [vmem:[#allocation5 + $0x90] sm:$0xff] }
 0x33e   :  { %v1156_v7 = vpop.f32.mrf.mxu1 }
 0x33f   :  { %3069 = vpow2.f32 %v1298_v4  ;;  %1226 = vst [vmem:[#allocation17 + $0x128] sm:$0xff] %v1155_v5  ;;  %v1257_v11 = vmul.f32 0.5, %v1155_v5  ;;  %v3835_v12 = vadd.f32 %v1156_v7, %v3701_v55  ;;  %v1377_v13 = vadd.f32 %v1352_v2, %v3793_v58  ;;  %v1333_v7 = vld [vmem:[#allocation5 + $0x98] sm:$0xff] }
 0x340   :  { %v3064_v14 = vpop.eup %3063  ;;  %v1158_v53 = vpop.f32.mrf.mxu1 }
 0x341   :  { %v1300_v18 = vmul.f32 1.442695, %v1257_v11  ;;  %1227 = vst [vmem:[#allocation17 + $0x130] sm:$0xff] %v3835_v12  ;;  %v1159_v19 = vadd.f32 %v1158_v53, %v3705_v56  ;;  %v1395_v20 = vpack.c.bf16 %v1377_v13, %v1376_v8  ;;  %v1353_v50 = vmul.f32 %v3064_v14, %v1328_v42 }
 0x342   :  { %v1162_v21 = vpop.f32.mrf.mxu1 }
 0x343   :  { %3071 = vpow2.f32 %v1300_v18  ;;  %1228 = vst [vmem:[#allocation17 + $0x138] sm:$0xff] %v1159_v19  ;;  %v1258_v23 = vmul.f32 0.5, %v1159_v19  ;;  %v3841_v25 = vadd.f32 %v1162_v21, %v3701_v55  ;;  %2782 = vmatmul.mubr.bf16.gmra.mxu0 %v1395_v20  ;;  %v1378_v32 = vadd.f32 %v1353_v50, %v3799_v15  ;;  %v1334_v50 = vld [vmem:[#allocation5 + $0xa0] sm:$0xff] }
 0x344   :  { %v3066_v58 = vpop.eup %3065  ;;  %v1164_v26 = vpop.f32.mrf.mxu1  ;;  %2785 = vmatprep.mubr.msk.bf16.mxu0 %vm3413_vm2, %v3412_v9 }
 0x345   :  { %v1302_v10 = vmul.f32 1.442695, %v1258_v23  ;;  %1229 = vst [vmem:[#allocation17 + $0x140] sm:$0xff] %v3841_v25  ;;  %v1165_v27 = vadd.f32 %v1164_v26, %v3705_v56  ;;  %v1354_v17 = vmul.f32 %v3066_v58, %v1329_v22  ;;  %v3010_v23 = vld [vmem:[#allocation13] sm:$0xff]  }
 0x346   :  { %v1166_v30 = vpop.f32.mrf.mxu1  ;;  %2824 = vmatpush3.bf16.msra.mxu1 %v3010_v23 }
 0x347   :  { %3073 = vpow2.f32 %v1302_v10  ;;  %1230 = vst [vmem:[#allocation17 + $0x148] sm:$0xff] %v1165_v27  ;;  %v1259_v33 = vmul.f32 0.5, %v1165_v27  ;;  %v3849_v34 = vadd.f32 %v1166_v30, %v3701_v55  ;;  %v1379_v35 = vadd.f32 %v1354_v17, %v3807_v52  ;;  %v1335_v10 = vld [vmem:[#allocation5 + $0xa8] sm:$0xff] }
 0x348   :  { %v3068_v36 = vpop.eup %3067  ;;  %v1168_v16 = vpop.f32.mrf.mxu1 }
 0x349   :  { %v1304_v39 = vmul.f32 1.442695, %v1259_v33  ;;  %1231 = vst [vmem:[#allocation17 + $0x150] sm:$0xff] %v3849_v34  ;;  %v1169_v40 = vadd.f32 %v1168_v16, %v3705_v56  ;;  %v1396_v41 = vpack.c.bf16 %v1379_v35, %v1378_v32  ;;  %v1355_v15 = vmul.f32 %v3068_v36, %v1330_v6  ;;  %v1336_v32 = vld [vmem:[#allocation5 + $0xb0] sm:$0xff]  ;;  %v1337_v35 = vld [vmem:[#allocation5 + $0xb8] sm:$0xff] }
 0x34a   :  { %v1172_v43 = vpop.f32.mrf.mxu1 }
 0x34b   :  { %3075 = vpow2.f32 %v1304_v39  ;;  %1232 = vst [vmem:[#allocation17 + $0x158] sm:$0xff] %v1169_v40  ;;  %v1260_v45 = vmul.f32 0.5, %v1169_v40  ;;  %v3855_v46 = vadd.f32 %v1172_v43, %v3701_v55  ;;  %2786 = vmatmul.mubr.bf16.gmra.mxu0 %v1396_v41  ;;  %v1380_v59 = vadd.f32 %v1355_v15, %v3813_v37  ;;  %v1338_v39 = vld [vmem:[#allocation5 + $0xc0] sm:$0xff] }
 0x34c   :  { %v3070_v52 = vpop.eup %3069  ;;  %v1174_v48 = vpop.f32.mrf.mxu1  ;;  %2789 = vmatprep.mubr.msk.bf16.mxu0 %vm3413_vm2, %v3412_v9 }
 0x34d   :  { %v1306_v24 = vmul.f32 1.442695, %v1260_v45  ;;  %1233 = vst [vmem:[#allocation17 + $0x160] sm:$0xff] %v3855_v46  ;;  %v1175_v49 = vadd.f32 %v1174_v48, %v3705_v56  ;;  %v1356_v31 = vmul.f32 %v3070_v52, %v1331_v44  ;;  %v3011_v45 = vld [vmem:[#allocation14 + $0x70] ss:$8 sps:$4 sm:$0xff]  }
 0x34e   :  { %v1176_v57 = vpop.f32.mrf.mxu1  ;;  %v3013_v52 = vld [vmem:[#allocation14 + $0x74] ss:$8 sps:$4 sm:$0xff]   ;;  %v3016_v48 = vld [vmem:[#allocation14 + $0x64] ss:$8 sps:$4 sm:$0xff]  }
 0x34f   :  { %3077 = vpow2.f32 %v1306_v24  ;;  %1234 = vst [vmem:[#allocation17 + $0x168] sm:$0xff] %v1175_v49  ;;  %v1261_v60 = vmul.f32 0.5, %v1175_v49  ;;  %v1177_v61 = vadd.f32 %v1176_v57, %v3701_v55  ;;  %v1381_v62 = vadd.f32 %v1356_v31, %v3821_v47  ;;  %2050 = vmatprep.subr.bf16.mxu0 %v3013_v52  ;;  %2877 = vmatprep.subr.bf16.mxu1 %v3013_v52  ;;  %v3019_v24 = vld [vmem:[#allocation14 + $0x54] ss:$8 sps:$4 sm:$0xff]   ;;  %v3017_v49 = vld [vmem:[#allocation14 + $0x50] ss:$8 sps:$4 sm:$0xff]  }
 0x350   :  { %v3072_v29 = vpop.eup %3071  ;;  %v1178_v63 = vpop.f32.mrf.mxu1  ;;  %2051 = vmatpush1.bf16.msra.mxu0 %v3011_v45  ;;  %v3022_v31 = vld [vmem:[#allocation14 + $0x44] ss:$8 sps:$4 sm:$0xff]   ;;  %v3881_v57 = vld [vmem:[#allocation14 + $0x40] ss:$8 sps:$4 sm:$0xff]  }
 0x351   :  { %v1308_v3 = vmul.f32 1.442695, %v1261_v60  ;;  %1235 = vst [vmem:[#allocation17 + $0x170] sm:$0xff] %v1177_v61  ;;  %v1179_v4 = vadd.f32 %v1178_v63, %v3705_v56  ;;  %v1397_v5 = vpack.c.bf16 %v1381_v62, %v1380_v59  ;;  %v1357_v11 = vmul.f32 %v3072_v29, %v1332_v38  ;;  %2052 = vmatprep.subr.bf16.mxu0 %v3016_v48  ;;  %v3883_v59 = vld [vmem:[#allocation14 + $0x34] ss:$8 sps:$4 sm:$0xff]  }
 0x352   :  { %v1182_v2 = vpop.f32.mrf.mxu1  ;;  %v3886_v60 = vld [vmem:[#allocation14 + $0x30] ss:$8 sps:$4 sm:$0xff]   ;;  %v3894_v62 = vld [vmem:[%s4095_s9] ss:$0 sm:$0xff]  ;;  %v3897_v63 = vld [vmem:[#allocation14 + $0x20] ss:$8 sps:$4 sm:$0xff]  }
 0x353   :  { %3079 = vpow2.f32 %v1308_v3  ;;  %1236 = vst [vmem:[#allocation17 + $0x178] sm:$0xff] %v1179_v4  ;;  %v1262_v37 = vmul.f32 0.5, %v1179_v4  ;;  %v1183_v8 = vadd.f32 %v1182_v2, %v3701_v55  ;;  %2790 = vmatmul.mubr.bf16.gmra.mxu0 %v1397_v5  ;;  %v1382_v20 = vadd.f32 %v1357_v11, %v3827_v1  ;;  %v3901_v3 = vld [vmem:[#allocation14 + $0x14] ss:$8 sps:$4 sm:$0xff]   ;;  %v3904_v2 = vld [vmem:[#allocation14 + $0x10] ss:$8 sps:$4 sm:$0xff]  }
 0x354   :  { %v3074_v13 = vpop.eup %3073  ;;  %v1184_v42 = vpop.f32.mrf.mxu1  ;;  %2793 = vmatprep.mubr.msk.bf16.mxu0 %vm3413_vm2, %v3412_v9 }
 0x355   :  { %v1310_v47 = vmul.f32 1.442695, %v1262_v37  ;;  %1237 = vst [vmem:[#allocation17 + $0x180] sm:$0xff] %v1183_v8  ;;  %v1185_v14 = vadd.f32 %v1184_v42, %v3705_v56  ;;  %v1358_v53 = vmul.f32 %v3074_v13, %v1333_v7 }
 0x356   :  { %v1186_v18 = vpop.f32.mrf.mxu1 }
 0x357   :  { %3081 = vpow2.f32 %v1310_v47  ;;  %1238 = vst [vmem:[#allocation17 + $0x188] sm:$0xff] %v1185_v14  ;;  %v1263_v19 = vmul.f32 0.5, %v1185_v14  ;;  %v1383_v55 = vadd.f32 %v1358_v53, %v3835_v12  ;;  %v3911_v47 = vld [vmem:[#allocation14] ss:$8 sps:$4 sm:$0xff]  }
 0x358   :  { %v3076_v21 = vpop.eup %3075  ;;  %v1187_v22 = vpop.f32.mrf.mxu1 }
 0x359   :  { %v1312_v58 = vmul.f32 1.442695, %v1263_v19  ;;  %v1398_v26 = vpack.c.bf16 %v1383_v55, %v1382_v20  ;;  %v1359_v56 = vmul.f32 %v3076_v21, %v1334_v50 }
 0x35b   :  { %3083 = vpow2.f32 %v1312_v58  ;;  %2794 = vmatmul.mubr.bf16.gmra.mxu0 %v1398_v26  ;;  %v1384_v1 = vadd.f32 %v1359_v56, %v3841_v25 }
 0x35c   :  { %v3078_v27 = vpop.eup %3077  ;;  %2797 = vmatprep.mubr.msk.bf16.mxu0 %vm3413_vm2, %v3412_v9 }
 0x35d   :  { %v1360_v17 = vmul.f32 %v3078_v27, %v1335_v10 }
 0x35f   :  { %v1385_v12 = vadd.f32 %v1360_v17, %v3849_v34 }
 0x360   :  { %v3080_v30 = vpop.eup %3079 }
 0x361   :  { %v1399_v33 = vpack.c.bf16 %v1385_v12, %v1384_v1  ;;  %v1361_v6 = vmul.f32 %v3080_v30, %v1336_v32 }
 0x363   :  { %2798 = vmatmul.mubr.bf16.gmra.mxu0 %v1399_v33  ;;  %v1386_v40 = vadd.f32 %v1361_v6, %v3855_v46  ;;  %v3014_v46 = vld [vmem:[#allocation14 + $0x60] ss:$8 sps:$4 sm:$0xff]  }
 0x364   :  { %v3082_v36 = vpop.eup %3081  ;;  %2801 = vmatprep.mubr.msk.bf16.mxu0 %vm3413_vm2, %v3412_v9  ;;  %2053 = vmatpush1.bf16.msra.mxu0 %v3014_v46 }
 0x365   :  { %v1362_v16 = vmul.f32 %v3082_v36, %v1337_v35  ;;  %2054 = vmatprep.subr.bf16.mxu0 %v3019_v24 }
 0x367   :  { %v1387_v41 = vadd.f32 %v1362_v16, %v1177_v61  ;;  %v3889_v61 = vld [vmem:[#allocation14 + $0x24] ss:$8 sps:$4 sm:$0xff]  }
 0x368   :  { %v3084_v43 = vpop.eup %3083  ;;  %2055 = vmatpush1.bf16.msra.mxu0 %v3017_v49 }
 0x369   :  { %v1400_v44 = vpack.c.bf16 %v1387_v41, %v1386_v40  ;;  %v1363_v25 = vmul.f32 %v3084_v43, %v1338_v39  ;;  %2056 = vmatprep.subr.bf16.mxu0 %v3022_v31 }
 0x36b   :  { %2802 = vmatmul.mubr.bf16.gmra.mxu0 %v1400_v44  ;;  %v1388_v34 = vadd.f32 %v1363_v25, %v1183_v8  ;;  %v3908_v8 = vld [vmem:[#allocation14 + $0x4] ss:$8 sps:$4 sm:$0xff]  }
 0x36c   :  { %2805 = vmatprep.mubr.msk.bf16.mxu0 %vm3413_vm2, %v3412_v9  ;;  %2057 = vmatpush1.bf16.msra.mxu0 %v3881_v57 }
 0x36d   :  { %v1401_v15 = vpack.c.bf16 %v1388_v34, %v1388_v34  ;;  %2058 = vmatprep.subr.bf16.mxu0 %v3883_v59 }
 0x370   :  { %2059 = vmatpush1.bf16.msra.mxu0 %v3886_v60 }
 0x371   :  { %2060 = vmatprep.subr.bf16.mxu0 %v3889_v61 }
 0x373   :  { %2806 = vmatmul.mubr.bf16.gmra.mxu0 %v1401_v15 }
 0x374   :  { %2082 = vmatprep.mubr.bf16.mxu0 %v3411_v0  ;;  %2061 = vmatpush1.bf16.msra.mxu0 %v3897_v63 }
 0x375   :  { %2062 = vmatprep.subr.bf16.mxu0 %v3901_v3 }
 0x378   :  { %2063 = vmatpush1.bf16.msra.mxu0 %v3904_v2 }
 0x379   :  { %2064 = vmatprep.subr.bf16.mxu0 %v3908_v8 }
 0x37c   :  { %2065 = vmatpush1.bf16.msra.mxu0 %v3911_v47 }
 0x3d3   :  { %v1507_v29 = vpop.f32.mrf.mxu0 }
 0x3d4   :  { %v1508_v38 = vadd.f32 %v3894_v62, %v1507_v29 }
 0x3d5   :  { %v2759_v4 = vpop.f32.mrf.mxu0 }
 0x3d6   :  { %v1609_v7 = vmul.f32 0.2, %v1508_v38 }
 0x3d7   :  { %v1510_v5 = vpop.f32.mrf.mxu0 }
 0x3d8   :  { %v1511_v37 = vadd.f32 %v3894_v62, %v1510_v5  ;;  %v1634_v14 = vmax.f32 %v1508_v38, %v1609_v7 }
 0x3d9   :  { %v2760_v11 = vpop.f32.mrf.mxu0 }
 0x3da   :  { %v1610_v13 = vmul.f32 0.2, %v1511_v37 }
 0x3db   :  { %v1515_v42 = vpop.f32.mrf.mxu0 }
 0x3dc   :  { %v1635_v53 = vmax.f32 %v1511_v37, %v1610_v13  ;;  %v1516_v18 = vadd.f32 %v3894_v62, %v1515_v42 }
 0x3dd   :  { %v2763_v19 = vpop.f32.mrf.mxu0 }
 0x3de   :  { %v1659_v20 = vpack.c.bf16 %v1635_v53, %v1634_v14  ;;  %v1611_v21 = vmul.f32 0.2, %v1516_v18 }
 0x3df   :  { %v1518_v55 = vpop.f32.mrf.mxu0 }
 0x3e0   :  { %v1519_v22 = vadd.f32 %v3894_v62, %v1518_v55  ;;  %2826 = vmatmul.mubr.bf16.vlgmr.msra.gmra.mxu1 %v1659_v20  ;;  %v1636_v26 = vmax.f32 %v1516_v18, %v1611_v21 }
 0x3e1   :  { %v2764_v50 = vpop.f32.mrf.mxu0  ;;  %2829 = vmatprep.mubr.msk.bf16.mxu1 %vm3413_vm2, %v3412_v9  ;;  %2885 = vmatpush1.bf16.msra.mxu1 %v3011_v45 }
 0x3e2   :  { %v1612_v23 = vmul.f32 0.2, %v1519_v22  ;;  %2878 = vmatprep.subr.bf16.mxu1 %v3016_v48 }
 0x3e3   :  { %v1523_v58 = vpop.f32.mrf.mxu0 }
 0x3e4   :  { %v1637_v10 = vmax.f32 %v1519_v22, %v1612_v23  ;;  %v1524_v56 = vadd.f32 %v3894_v62, %v1523_v58 }
 0x3e5   :  { %v2767_v27 = vpop.f32.mrf.mxu0  ;;  %2886 = vmatpush1.bf16.msra.mxu1 %v3014_v46 }
 0x3e6   :  { %v1660_v17 = vpack.c.bf16 %v1637_v10, %v1636_v26  ;;  %2879 = vmatprep.subr.bf16.mxu1 %v3019_v24  ;;  %v1613_v12 = vmul.f32 0.2, %v1524_v56 }
 0x3e7   :  { %v1526_v1 = vpop.f32.mrf.mxu0 }
 0x3e8   :  { %v1527_v30 = vadd.f32 %v3894_v62, %v1526_v1  ;;  %2830 = vmatmul.mubr.bf16.gmra.mxu1 %v1660_v17  ;;  %v1638_v6 = vmax.f32 %v1524_v56, %v1613_v12 }
 0x3e9   :  { %v2768_v32 = vpop.f32.mrf.mxu0  ;;  %2833 = vmatprep.mubr.msk.bf16.mxu1 %vm3413_vm2, %v3412_v9  ;;  %2887 = vmatpush1.bf16.msra.mxu1 %v3017_v49 }
 0x3ea   :  { %v1614_v33 = vmul.f32 0.2, %v1527_v30  ;;  %2880 = vmatprep.subr.bf16.mxu1 %v3022_v31 }
 0x3eb   :  { %v1531_v35 = vpop.f32.mrf.mxu0 }
 0x3ec   :  { %v1639_v36 = vmax.f32 %v1527_v30, %v1614_v33  ;;  %v1532_v16 = vadd.f32 %v3894_v62, %v1531_v35 }
 0x3ed   :  { %v2771_v39 = vpop.f32.mrf.mxu0  ;;  %2888 = vmatpush1.bf16.msra.mxu1 %v3881_v57 }
 0x3ee   :  { %v1661_v40 = vpack.c.bf16 %v1639_v36, %v1638_v6  ;;  %2881 = vmatprep.subr.bf16.mxu1 %v3883_v59  ;;  %v1615_v43 = vmul.f32 0.2, %v1532_v16 }
 0x3ef   :  { %v1534_v41 = vpop.f32.mrf.mxu0 }
 0x3f0   :  { %v1535_v44 = vadd.f32 %v3894_v62, %v1534_v41  ;;  %2834 = vmatmul.mubr.bf16.gmra.mxu1 %v1661_v40  ;;  %v1640_v45 = vmax.f32 %v1532_v16, %v1615_v43 }
 0x3f1   :  { %v2772_v25 = vpop.f32.mrf.mxu0  ;;  %2837 = vmatprep.mubr.msk.bf16.mxu1 %vm3413_vm2, %v3412_v9  ;;  %2889 = vmatpush1.bf16.msra.mxu1 %v3886_v60 }
 0x3f2   :  { %v1616_v34 = vmul.f32 0.2, %v1535_v44  ;;  %2882 = vmatprep.subr.bf16.mxu1 %v3889_v61 }
 0x3f3   :  { %v1539_v15 = vpop.f32.mrf.mxu0 }
 0x3f4   :  { %v1641_v52 = vmax.f32 %v1535_v44, %v1616_v34  ;;  %v1540_v48 = vadd.f32 %v3894_v62, %v1539_v15 }
 0x3f5   :  { %v2775_v46 = vpop.f32.mrf.mxu0  ;;  %2890 = vmatpush1.bf16.msra.mxu1 %v3897_v63 }
 0x3f6   :  { %v1662_v24 = vpack.c.bf16 %v1641_v52, %v1640_v45  ;;  %2883 = vmatprep.subr.bf16.mxu1 %v3901_v3  ;;  %v1617_v31 = vmul.f32 0.2, %v1540_v48 }
 0x3f7   :  { %v1542_v49 = vpop.f32.mrf.mxu0 }
 0x3f8   :  { %v1543_v57 = vadd.f32 %v3894_v62, %v1542_v49  ;;  %2838 = vmatmul.mubr.bf16.gmra.mxu1 %v1662_v24  ;;  %v1642_v29 = vmax.f32 %v1540_v48, %v1617_v31 }
 0x3f9   :  { %v2776_v59 = vpop.f32.mrf.mxu0  ;;  %2841 = vmatprep.mubr.msk.bf16.mxu1 %vm3413_vm2, %v3412_v9  ;;  %2891 = vmatpush1.bf16.msra.mxu1 %v3904_v2 }
 0x3fa   :  { %v1618_v60 = vmul.f32 0.2, %v1543_v57  ;;  %2884 = vmatprep.subr.bf16.mxu1 %v3908_v8 }
 0x3fb   :  { %v1547_v61 = vpop.f32.mrf.mxu0 }
 0x3fc   :  { %v1643_v63 = vmax.f32 %v1543_v57, %v1618_v60  ;;  %v1548_v38 = vadd.f32 %v3894_v62, %v1547_v61 }
 0x3fd   :  { %v2779_v3 = vpop.f32.mrf.mxu0  ;;  %2892 = vmatpush1.bf16.msra.mxu1 %v3911_v47 }
 0x3fe   :  { %v1663_v4 = vpack.c.bf16 %v1643_v63, %v1642_v29  ;;  %v1619_v7 = vmul.f32 0.2, %v1548_v38 }
 0x3ff   :  { %v1550_v5 = vpop.f32.mrf.mxu0 }
 0x400   :  { %v1551_v37 = vadd.f32 %v3894_v62, %v1550_v5  ;;  %2842 = vmatmul.mubr.bf16.gmra.mxu1 %v1663_v4  ;;  %v1644_v13 = vmax.f32 %v1548_v38, %v1619_v7 }
 0x401   :  { %v2780_v11 = vpop.f32.mrf.mxu0  ;;  %2845 = vmatprep.mubr.msk.bf16.mxu1 %vm3413_vm2, %v3412_v9 }
 0x402   :  { %v1620_v2 = vmul.f32 0.2, %v1551_v37 }
 0x403   :  { %v1555_v8 = vpop.f32.mrf.mxu0 }
 0x404   :  { %v1645_v42 = vmax.f32 %v1551_v37, %v1620_v2  ;;  %v1556_v14 = vadd.f32 %v3894_v62, %v1555_v8 }
 0x405   :  { %v2783_v53 = vpop.f32.mrf.mxu0 }
 0x406   :  { %v1664_v18 = vpack.c.bf16 %v1645_v42, %v1644_v13  ;;  %v1621_v47 = vmul.f32 0.2, %v1556_v14 }
 0x407   :  { %v1558_v19 = vpop.f32.mrf.mxu0 }
 0x408   :  { %v1559_v20 = vadd.f32 %v3894_v62, %v1558_v19  ;;  %2846 = vmatmul.mubr.bf16.gmra.mxu1 %v1664_v18  ;;  %v1646_v50 = vmax.f32 %v1556_v14, %v1621_v47 }
 0x409   :  { %v2784_v55 = vpop.f32.mrf.mxu0  ;;  %2849 = vmatprep.mubr.msk.bf16.mxu1 %vm3413_vm2, %v3412_v9 }
 0x40a   :  { %v1622_v21 = vmul.f32 0.2, %v1559_v20 }
 0x40b   :  { %v1563_v22 = vpop.f32.mrf.mxu0 }
 0x40c   :  { %v1647_v23 = vmax.f32 %v1559_v20, %v1622_v21  ;;  %v1564_v58 = vadd.f32 %v3894_v62, %v1563_v22 }
 0x40d   :  { %v2787_v26 = vpop.f32.mrf.mxu0 }
 0x40e   :  { %v1665_v10 = vpack.c.bf16 %v1647_v23, %v1646_v50  ;;  %v1623_v27 = vmul.f32 0.2, %v1564_v58 }
 0x40f   :  { %v1566_v56 = vpop.f32.mrf.mxu0 }
 0x410   :  { %v1567_v17 = vadd.f32 %v3894_v62, %v1566_v56  ;;  %2850 = vmatmul.mubr.bf16.gmra.mxu1 %v1665_v10  ;;  %v1648_v32 = vmax.f32 %v1564_v58, %v1623_v27 }
 0x411   :  { %v2788_v1 = vpop.f32.mrf.mxu0  ;;  %2853 = vmatprep.mubr.msk.bf16.mxu1 %vm3413_vm2, %v3412_v9 }
 0x412   :  { %v1624_v12 = vmul.f32 0.2, %v1567_v17 }
 0x413   :  { %v1571_v30 = vpop.f32.mrf.mxu0 }
 0x414   :  { %v1649_v33 = vmax.f32 %v1567_v17, %v1624_v12  ;;  %v1572_v35 = vadd.f32 %v3894_v62, %v1571_v30  ;;  %v3975_v17 = vld [vmem:[%s4097_s11] ss:$0 sm:$0xff]  ;;  %s3414_s11 = smov [#allocation17]  }
 0x415   :  { %v2791_v6 = vpop.f32.mrf.mxu0  ;;  %s2478_s28 = sshll.u32 %s3414_s11, 4  ;;  %s2479_s28 = int_to_ptr.vmem [resolvable:$true] %s2478_s28 }
 0x416   :  { %v1666_v36 = vpack.c.bf16 %v1649_v33, %v1648_v32  ;;  %v1625_v39 = vmul.f32 0.2, %v1572_v35  ;;  %s3345_s17 = scalar_lea.vmem %s2479_s28, 6400  ;;  %p3350_p13 = scmp.lt.s32.totalorder %s2479_s28, %s2479_s28 }
 0x417   :  { %v1574_v16 = vpop.f32.mrf.mxu0  ;;  %p3346_p12 = scmp.ne.s32.totalorder %s2479_s28, %s3345_s17  ;;  %p3351_p0 = scmp.lt.s32.totalorder %s3345_s17, %s3345_s17 }
 0x418   :  { %v1575_v40 = vadd.f32 %v3894_v62, %v1574_v16  ;;  %2854 = vmatmul.mubr.bf16.gmra.mxu1 %v1666_v36  ;;  %v1650_v25 = vmax.f32 %v1572_v35, %v1625_v39 }
 0x419   :  { %v2792_v41 = vpop.f32.mrf.mxu0  ;;  %2857 = vmatprep.mubr.msk.bf16.mxu1 %vm3413_vm2, %v3412_v9  ;;  %p3352_p1 = por %p3351_p0, %p3350_p13 }
 0x41a   :  { %v1626_v43 = vmul.f32 0.2, %v1575_v40 }
 0x41b   :  { %v1579_v44 = vpop.f32.mrf.mxu0  ;;  %p3353_p2 = pnand %p3352_p1, %p3346_p12 }
 0x41c   :  { %v1651_v34 = vmax.f32 %v1575_v40, %v1626_v43  ;;  %v1580_v15 = vadd.f32 %v3894_v62, %v1579_v44 }
 0x41d   :  { %v2795_v45 = vpop.f32.mrf.mxu0 }
 0x41e   :  { %v1667_v52 = vpack.c.bf16 %v1651_v34, %v1650_v25  ;;  %v1627_v46 = vmul.f32 0.2, %v1580_v15 }
 0x41f   :  { %v1582_v48 = vpop.f32.mrf.mxu0 }
 0x420   :  { %v1583_v24 = vadd.f32 %v3894_v62, %v1582_v48  ;;  %2858 = vmatmul.mubr.bf16.gmra.mxu1 %v1667_v52  ;;  %v1652_v59 = vmax.f32 %v1580_v15, %v1627_v46 }
 0x421   :  { %v2796_v49 = vpop.f32.mrf.mxu0  ;;  %2861 = vmatprep.mubr.msk.bf16.mxu1 %vm3413_vm2, %v3412_v9 }
 0x422   :  { %v1628_v31 = vmul.f32 0.2, %v1583_v24 }
 0x423   :  { %v1587_v57 = vpop.f32.mrf.mxu0 }
 0x424   :  { %v1653_v60 = vmax.f32 %v1583_v24, %v1628_v31  ;;  %v1588_v61 = vadd.f32 %v3894_v62, %v1587_v57 }
 0x425   :  { %v2799_v29 = vpop.f32.mrf.mxu0 }
 0x426   :  { %v1668_v63 = vpack.c.bf16 %v1653_v60, %v1652_v59  ;;  %v1629_v3 = vmul.f32 0.2, %v1588_v61 }
 0x427   :  { %v1590_v38 = vpop.f32.mrf.mxu0 }
 0x428   :  { %v1591_v4 = vadd.f32 %v3894_v62, %v1590_v38  ;;  %2862 = vmatmul.mubr.bf16.gmra.mxu1 %v1668_v63  ;;  %v1654_v11 = vmax.f32 %v1588_v61, %v1629_v3 }
 0x429   :  { %v2800_v5 = vpop.f32.mrf.mxu0  ;;  %2865 = vmatprep.mubr.msk.bf16.mxu1 %vm3413_vm2, %v3412_v9 }
 0x42a   :  { %v1630_v7 = vmul.f32 0.2, %v1591_v4 }
 0x42b   :  { %v1595_v37 = vpop.f32.mrf.mxu0 }
 0x42c   :  { %v1655_v2 = vmax.f32 %v1591_v4, %v1630_v7  ;;  %v1596_v8 = vadd.f32 %v3894_v62, %v1595_v37 }
 0x42d   :  { %v2803_v13 = vpop.f32.mrf.mxu0 }
 0x42e   :  { %v1669_v42 = vpack.c.bf16 %v1655_v2, %v1654_v11  ;;  %v1631_v53 = vmul.f32 0.2, %v1596_v8 }
 0x42f   :  { %v1598_v14 = vpop.f32.mrf.mxu0 }
 0x430   :  { %v1599_v18 = vadd.f32 %v3894_v62, %v1598_v14  ;;  %2866 = vmatmul.mubr.bf16.gmra.mxu1 %v1669_v42  ;;  %v1656_v55 = vmax.f32 %v1596_v8, %v1631_v53 }
 0x431   :  { %v2804_v19 = vpop.f32.mrf.mxu0  ;;  %2869 = vmatprep.mubr.msk.bf16.mxu1 %vm3413_vm2, %v3412_v9 }
 0x432   :  { %v1632_v47 = vmul.f32 0.2, %v1599_v18 }
 0x433   :  { %v1603_v20 = vpop.f32.mrf.mxu0 }
 0x434   :  { %v1657_v21 = vmax.f32 %v1599_v18, %v1632_v47  ;;  %v1604_v22 = vadd.f32 %v3894_v62, %v1603_v20 }
 0x435   :  { %v2807_v50 = vpop.f32.mrf.mxu0 }
 0x436   :  { %v1670_v23 = vpack.c.bf16 %v1657_v21, %v1656_v55  ;;  %v1633_v58 = vmul.f32 0.2, %v1604_v22 }
 0x437   :  { %v1606_v26 = vpop.f32.mrf.mxu0 }
 0x438   :  { %2870 = vmatmul.mubr.bf16.gmra.mxu1 %v1670_v23  ;;  %v1658_v56 = vmax.f32 %v1604_v22, %v1633_v58 }
 0x439   :  { %v2808_v10 = vpop.f32.mrf.mxu0  ;;  %2873 = vmatprep.mubr.msk.bf16.mxu1 %vm3413_vm2, %v3412_v9 }
 0x43a   :  { %v1671_v27 = vpack.c.bf16 %v1658_v56, %v1658_v56 }
 0x440   :  { %2874 = vmatmul.mubr.bf16.gmra.mxu1 %v1671_v27 }
 0x441   :  { %2202 = vmatprep.mubr.bf16.mxu1 %v3411_v0 }
 0x4a0   :  { %v1777_v62 = vpop.f32.mrf.mxu1 }
 0x4a1   :  { %v1778_v1 = vadd.f32 %v3975_v17, %v1777_v62 }
 0x4a2   :  { %v2827_v12 = vpop.f32.mrf.mxu1 }
 0x4a3   :  { %v1879_v32 = vmul.f32 0.2, %v1778_v1 }
 0x4a4   :  { %v1780_v30 = vpop.f32.mrf.mxu1 }
 0x4a5   :  { %v1781_v33 = vadd.f32 %v3975_v17, %v1780_v30  ;;  %v1904_v36 = vmax.f32 %v1778_v1, %v1879_v32 }
 0x4a6   :  { %v2828_v35 = vpop.f32.mrf.mxu1 }
 0x4a7   :  { %v1880_v9 = vmul.f32 0.2, %v1781_v33 }
 0x4a8   :  { %v1785_v6 = vpop.f32.mrf.mxu1 }
 0x4a9   :  { %v1905_v16 = vmax.f32 %v1781_v33, %v1880_v9  ;;  %v1786_v39 = vadd.f32 %v3975_v17, %v1785_v6 }
 0x4aa   :  { %v2831_v40 = vpop.f32.mrf.mxu1 }
 0x4ab   :  { %v1929_v41 = vpack.c.bf16 %v1905_v16, %v1904_v36  ;;  %v1881_v44 = vmul.f32 0.2, %v1786_v39 }
 0x4ac   :  { %v1788_v43 = vpop.f32.mrf.mxu1 }
 0x4ad   :  { %v1789_v25 = vadd.f32 %v3975_v17, %v1788_v43  ;;  %2083 = vmatmul.mubr.bf16.vlgmr.msra.gmra.mxu0 %v1929_v41  ;;  %v1906_v52 = vmax.f32 %v1786_v39, %v1881_v44 }
 0x4ae   :  { %v2832_v34 = vpop.f32.mrf.mxu1  ;;  %2092 = vmatprep.mubr.bf16.mxu0 %v3411_v0 }
 0x4af   :  { %v1882_v15 = vmul.f32 0.2, %v1789_v25 }
 0x4b0   :  { %v1793_v45 = vpop.f32.mrf.mxu1 }
 0x4b1   :  { %v1907_v48 = vmax.f32 %v1789_v25, %v1882_v15  ;;  %v1794_v46 = vadd.f32 %v3975_v17, %v1793_v45 }
 0x4b2   :  { %v2835_v24 = vpop.f32.mrf.mxu1 }
 0x4b3   :  { %v1930_v49 = vpack.c.bf16 %v1907_v48, %v1906_v52  ;;  %v1883_v57 = vmul.f32 0.2, %v1794_v46 }
 0x4b4   :  { %v1796_v31 = vpop.f32.mrf.mxu1 }
 0x4b5   :  { %v1797_v59 = vadd.f32 %v3975_v17, %v1796_v31  ;;  %2093 = vmatmul.mubr.bf16.gmra.mxu0 %v1930_v49  ;;  %v1908_v63 = vmax.f32 %v1794_v46, %v1883_v57 }
 0x4b6   :  { %v2836_v60 = vpop.f32.mrf.mxu1  ;;  %2102 = vmatprep.mubr.bf16.mxu0 %v3411_v0 }
 0x4b7   :  { %v1884_v61 = vmul.f32 0.2, %v1797_v59 }
 0x4b8   :  { %v1801_v29 = vpop.f32.mrf.mxu1 }
 0x4b9   :  { %v1909_v38 = vmax.f32 %v1797_v59, %v1884_v61  ;;  %v1802_v3 = vadd.f32 %v3975_v17, %v1801_v29 }
 0x4ba   :  { %v2839_v4 = vpop.f32.mrf.mxu1 }
 0x4bb   :  { %v1931_v5 = vpack.c.bf16 %v1909_v38, %v1908_v63  ;;  %v1885_v37 = vmul.f32 0.2, %v1802_v3 }
 0x4bc   :  { %v1804_v7 = vpop.f32.mrf.mxu1 }
 0x4bd   :  { %v1805_v11 = vadd.f32 %v3975_v17, %v1804_v7  ;;  %2103 = vmatmul.mubr.bf16.gmra.mxu0 %v1931_v5  ;;  %v1910_v42 = vmax.f32 %v1802_v3, %v1885_v37 }
 0x4be   :  { %v2840_v2 = vpop.f32.mrf.mxu1  ;;  %2112 = vmatprep.mubr.bf16.mxu0 %v3411_v0 }
 0x4bf   :  { %v1886_v8 = vmul.f32 0.2, %v1805_v11 }
 0x4c0   :  { %v1809_v13 = vpop.f32.mrf.mxu1 }
 0x4c1   :  { %v1911_v14 = vmax.f32 %v1805_v11, %v1886_v8  ;;  %v1810_v53 = vadd.f32 %v3975_v17, %v1809_v13 }
 0x4c2   :  { %v2843_v18 = vpop.f32.mrf.mxu1 }
 0x4c3   :  { %v1932_v19 = vpack.c.bf16 %v1911_v14, %v1910_v42  ;;  %v1887_v20 = vmul.f32 0.2, %v1810_v53 }
 0x4c4   :  { %v1812_v47 = vpop.f32.mrf.mxu1 }
 0x4c5   :  { %v1813_v55 = vadd.f32 %v3975_v17, %v1812_v47  ;;  %2113 = vmatmul.mubr.bf16.gmra.mxu0 %v1932_v19  ;;  %v1912_v23 = vmax.f32 %v1810_v53, %v1887_v20 }
 0x4c6   :  { %v2844_v21 = vpop.f32.mrf.mxu1  ;;  %2122 = vmatprep.mubr.bf16.mxu0 %v3411_v0 }
 0x4c7   :  { %v1888_v22 = vmul.f32 0.2, %v1813_v55 }
 0x4c8   :  { %v1817_v50 = vpop.f32.mrf.mxu1 }
 0x4c9   :  { %v1913_v58 = vmax.f32 %v1813_v55, %v1888_v22  ;;  %v1818_v26 = vadd.f32 %v3975_v17, %v1817_v50 }
 0x4ca   :  { %v2847_v10 = vpop.f32.mrf.mxu1 }
 0x4cb   :  { %v1933_v56 = vpack.c.bf16 %v1913_v58, %v1912_v23  ;;  %v1889_v62 = vmul.f32 0.2, %v1818_v26 }
 0x4cc   :  { %v1820_v27 = vpop.f32.mrf.mxu1 }
 0x4cd   :  { %v1821_v1 = vadd.f32 %v3975_v17, %v1820_v27  ;;  %2123 = vmatmul.mubr.bf16.gmra.mxu0 %v1933_v56  ;;  %v1914_v33 = vmax.f32 %v1818_v26, %v1889_v62 }
 0x4ce   :  { %v2848_v12 = vpop.f32.mrf.mxu1  ;;  %2132 = vmatprep.mubr.bf16.mxu0 %v3411_v0 }
 0x4cf   :  { %v1890_v30 = vmul.f32 0.2, %v1821_v1 }
 0x4d0   :  { %v1825_v32 = vpop.f32.mrf.mxu1 }
 0x4d1   :  { %v1915_v35 = vmax.f32 %v1821_v1, %v1890_v30  ;;  %v1826_v9 = vadd.f32 %v3975_v17, %v1825_v32 }
 0x4d2   :  { %v2851_v6 = vpop.f32.mrf.mxu1 }
 0x4d3   :  { %v1934_v36 = vpack.c.bf16 %v1915_v35, %v1914_v33  ;;  %v1891_v39 = vmul.f32 0.2, %v1826_v9 }
 0x4d4   :  { %v1828_v16 = vpop.f32.mrf.mxu1 }
 0x4d5   :  { %v1829_v40 = vadd.f32 %v3975_v17, %v1828_v16  ;;  %2133 = vmatmul.mubr.bf16.gmra.mxu0 %v1934_v36  ;;  %v1916_v25 = vmax.f32 %v1826_v9, %v1891_v39 }
 0x4d6   :  { %v2852_v41 = vpop.f32.mrf.mxu1  ;;  %2142 = vmatprep.mubr.bf16.mxu0 %v3411_v0 }
 0x4d7   :  { %v1892_v43 = vmul.f32 0.2, %v1829_v40 }
 0x4d8   :  { %v1833_v44 = vpop.f32.mrf.mxu1 }
 0x4d9   :  { %v1917_v34 = vmax.f32 %v1829_v40, %v1892_v43  ;;  %v1834_v15 = vadd.f32 %v3975_v17, %v1833_v44 }
 0x4da   :  { %v2855_v45 = vpop.f32.mrf.mxu1 }
 0x4db   :  { %v1935_v52 = vpack.c.bf16 %v1917_v34, %v1916_v25  ;;  %v1893_v46 = vmul.f32 0.2, %v1834_v15 }
 0x4dc   :  { %v1836_v48 = vpop.f32.mrf.mxu1 }
 0x4dd   :  { %v1837_v24 = vadd.f32 %v3975_v17, %v1836_v48  ;;  %2143 = vmatmul.mubr.bf16.gmra.mxu0 %v1935_v52  ;;  %v1918_v59 = vmax.f32 %v1834_v15, %v1893_v46 }
 0x4de   :  { %v2856_v49 = vpop.f32.mrf.mxu1  ;;  %2152 = vmatprep.mubr.bf16.mxu0 %v3411_v0 }
 0x4df   :  { %v1894_v31 = vmul.f32 0.2, %v1837_v24 }
 0x4e0   :  { %v1841_v57 = vpop.f32.mrf.mxu1 }
 0x4e1   :  { %v1919_v60 = vmax.f32 %v1837_v24, %v1894_v31  ;;  %v1842_v61 = vadd.f32 %v3975_v17, %v1841_v57 }
 0x4e2   :  { %v2859_v29 = vpop.f32.mrf.mxu1 }
 0x4e3   :  { %v1936_v63 = vpack.c.bf16 %v1919_v60, %v1918_v59  ;;  %v1895_v3 = vmul.f32 0.2, %v1842_v61 }
 0x4e4   :  { %v1844_v38 = vpop.f32.mrf.mxu1 }
 0x4e5   :  { %v1845_v4 = vadd.f32 %v3975_v17, %v1844_v38  ;;  %2153 = vmatmul.mubr.bf16.gmra.mxu0 %v1936_v63  ;;  %v1920_v11 = vmax.f32 %v1842_v61, %v1895_v3 }
 0x4e6   :  { %v2860_v5 = vpop.f32.mrf.mxu1  ;;  %2162 = vmatprep.mubr.bf16.mxu0 %v3411_v0 }
 0x4e7   :  { %v1896_v7 = vmul.f32 0.2, %v1845_v4 }
 0x4e8   :  { %v1849_v37 = vpop.f32.mrf.mxu1 }
 0x4e9   :  { %v1921_v2 = vmax.f32 %v1845_v4, %v1896_v7  ;;  %v1850_v8 = vadd.f32 %v3975_v17, %v1849_v37 }
 0x4ea   :  { %v2863_v13 = vpop.f32.mrf.mxu1 }
 0x4eb   :  { %v1937_v42 = vpack.c.bf16 %v1921_v2, %v1920_v11  ;;  %v1897_v53 = vmul.f32 0.2, %v1850_v8 }
 0x4ec   :  { %v1852_v14 = vpop.f32.mrf.mxu1 }
 0x4ed   :  { %v1853_v18 = vadd.f32 %v3975_v17, %v1852_v14  ;;  %2163 = vmatmul.mubr.bf16.gmra.mxu0 %v1937_v42  ;;  %v1922_v55 = vmax.f32 %v1850_v8, %v1897_v53 }
 0x4ee   :  { %v2864_v19 = vpop.f32.mrf.mxu1  ;;  %2172 = vmatprep.mubr.bf16.mxu0 %v3411_v0 }
 0x4ef   :  { %v1898_v47 = vmul.f32 0.2, %v1853_v18 }
 0x4f0   :  { %v1857_v20 = vpop.f32.mrf.mxu1 }
 0x4f1   :  { %v1923_v21 = vmax.f32 %v1853_v18, %v1898_v47  ;;  %v1858_v22 = vadd.f32 %v3975_v17, %v1857_v20 }
 0x4f2   :  { %v2867_v50 = vpop.f32.mrf.mxu1 }
 0x4f3   :  { %v1938_v23 = vpack.c.bf16 %v1923_v21, %v1922_v55  ;;  %v1899_v26 = vmul.f32 0.2, %v1858_v22 }
 0x4f4   :  { %v1860_v58 = vpop.f32.mrf.mxu1 }
 0x4f5   :  { %v1861_v10 = vadd.f32 %v3975_v17, %v1860_v58  ;;  %2173 = vmatmul.mubr.bf16.gmra.mxu0 %v1938_v23  ;;  %v1924_v1 = vmax.f32 %v1858_v22, %v1899_v26 }
 0x4f6   :  { %v2868_v56 = vpop.f32.mrf.mxu1  ;;  %2182 = vmatprep.mubr.bf16.mxu0 %v3411_v0 }
 0x4f7   :  { %v1900_v27 = vmul.f32 0.2, %v1861_v10 }
 0x4f8   :  { %v1865_v62 = vpop.f32.mrf.mxu1 }
 0x4f9   :  { %v1925_v12 = vmax.f32 %v1861_v10, %v1900_v27  ;;  %v1866_v30 = vadd.f32 %v3975_v17, %v1865_v62 }
 0x4fa   :  { %v2871_v32 = vpop.f32.mrf.mxu1 }
 0x4fb   :  { %v1939_v33 = vpack.c.bf16 %v1925_v12, %v1924_v1  ;;  %v1901_v9 = vmul.f32 0.2, %v1866_v30 }
 0x4fc   :  { %v1868_v35 = vpop.f32.mrf.mxu1 }
 0x4fd   :  { %v1869_v6 = vadd.f32 %v3975_v17, %v1868_v35  ;;  %2183 = vmatmul.mubr.bf16.gmra.mxu0 %v1939_v33  ;;  %v1926_v40 = vmax.f32 %v1866_v30, %v1901_v9 }
 0x4fe   :  { %v2872_v36 = vpop.f32.mrf.mxu1  ;;  %2192 = vmatprep.mubr.bf16.mxu0 %v3411_v0 }
 0x4ff   :  { %v1902_v16 = vmul.f32 0.2, %v1869_v6 }
 0x500   :  { %v1873_v39 = vpop.f32.mrf.mxu1 }
 0x501   :  { %v1927_v41 = vmax.f32 %v1869_v6, %v1902_v16  ;;  %v1874_v43 = vadd.f32 %v3975_v17, %v1873_v39 }
 0x502   :  { %v2875_v44 = vpop.f32.mrf.mxu1 }
 0x503   :  { %v1940_v25 = vpack.c.bf16 %v1927_v41, %v1926_v40  ;;  %v1903_v34 = vmul.f32 0.2, %v1874_v43 }
 0x504   :  { %v1876_v15 = vpop.f32.mrf.mxu1 }
 0x505   :  { %v1928_v45 = vmax.f32 %v1874_v43, %v1903_v34  ;;  %2193 = vmatmul.mubr.bf16.gmra.mxu0 %v1940_v25 }
 0x506   :  { %v2876_v52 = vpop.f32.mrf.mxu1 }
 0x507   :  { %v1941_v48 = vpack.c.bf16 %v1928_v45, %v1928_v45 }
 0x509   :  { %2203 = vmatmul.mubr.bf16.vlgmr.msra.gmra.mxu1 %v1941_v48 }
 0x50a   :  { %3356 = shalt.err (!%p3353_p2)
}
 0x50b   :  { %s3415_s18 = smov 256   ;;  %s3416_s1 = smov 16   ;;  %v1958_v0 = vld [vmem:[%s4099_s13] sm:$0x3] }
 0x50c   :  { %2484 = dma.vmem_to_hbm [thread:$0]  %s2479_s28, 6400, %s4101_s15, [#allocation18], %s3415_s18, %s3415_s18, %s3416_s1   ;;  %v4024_v17 = vrot.slane %v1958_v0, %v940_v28  ;;  %v4028_v46 = vrot.slane %v1958_v0, %v944_v54 }
 0x50d   :  { %s3417_s13 = smov [#allocation16]  }
 0x50e   :  { %s2466_s15 = sshll.u32 %s3417_s13, 4  ;;  %s2467_s15 = int_to_ptr.vmem [resolvable:$true] %s2466_s15 }
 0x50f   :  { %s3365_s24 = scalar_lea.vmem %s2467_s15, 6400  ;;  %p3370_p4 = scmp.lt.s32.totalorder %s2467_s15, %s2467_s15 }
 0x510   :  { %p3366_p3 = scmp.ne.s32.totalorder %s2467_s15, %s3365_s24  ;;  %p3371_p5 = scmp.lt.s32.totalorder %s3365_s24, %s3365_s24 }
 0x512   :  { %p3372_p6 = por %p3371_p5, %p3370_p4 }
 0x514   :  { %p3373_p7 = pnand %p3372_p6, %p3366_p3 }
 0x56d   :  { %v2084_v24 = vpop.f32.mrf.mxu0 }
 0x56e   :  { %v2085_v49 = vadd.f32 %v2084_v24, %v4024_v17 }
 0x56f   :  { %v2086_v31 = vpop.f32.mrf.mxu0 }
 0x570   :  { %v2211_v57 = vmul.f32 0.5, %v2085_v49  ;;  %v2087_v59 = vadd.f32 %v2086_v31, %v4028_v46 }
 0x571   :  { %v2088_v60 = vpop.f32.mrf.mxu0 }
 0x572   :  { %3085 = vtanh.f32 %v2211_v57  ;;  %v2212_v61 = vmul.f32 0.5, %v2087_v59  ;;  %v2089_v29 = vadd.f32 %v2088_v60, %v4024_v17 }
 0x573   :  { %v2090_v63 = vpop.f32.mrf.mxu0 }
 0x574   :  { %3087 = vtanh.f32 %v2212_v61  ;;  %v2213_v28 = vmul.f32 0.5, %v2089_v29  ;;  %v2091_v38 = vadd.f32 %v2090_v63, %v4028_v46 }
 0x575   :  { %v2094_v51 = vpop.f32.mrf.mxu0 }
 0x576   :  { %3089 = vtanh.f32 %v2213_v28  ;;  %v2214_v54 = vmul.f32 0.5, %v2091_v38  ;;  %v2095_v3 = vadd.f32 %v2094_v51, %v4024_v17 }
 0x577   :  { %v2096_v4 = vpop.f32.mrf.mxu0 }
 0x578   :  { %3091 = vtanh.f32 %v2214_v54  ;;  %v2215_v5 = vmul.f32 0.5, %v2095_v3  ;;  %v2097_v7 = vadd.f32 %v2096_v4, %v4028_v46 }
 0x579   :  { %v2098_v37 = vpop.f32.mrf.mxu0 }
 0x57a   :  { %3093 = vtanh.f32 %v2215_v5  ;;  %v2216_v11 = vmul.f32 0.5, %v2097_v7  ;;  %v2099_v2 = vadd.f32 %v2098_v37, %v4024_v17 }
 0x57b   :  { %v2100_v8 = vpop.f32.mrf.mxu0 }
 0x57c   :  { %3095 = vtanh.f32 %v2216_v11  ;;  %v2217_v13 = vmul.f32 0.5, %v2099_v2  ;;  %v2101_v42 = vadd.f32 %v2100_v8, %v4028_v46 }
 0x57d   :  { %v2104_v14 = vpop.f32.mrf.mxu0 }
 0x57e   :  { %3097 = vtanh.f32 %v2217_v13  ;;  %v2218_v53 = vmul.f32 0.5, %v2101_v42  ;;  %v2105_v18 = vadd.f32 %v2104_v14, %v4024_v17 }
 0x57f   :  { %v3086_v19 = vpop.eup %3085  ;;  %v2106_v47 = vpop.f32.mrf.mxu0 }
 0x580   :  { %v2311_v20 = vmul.f32 0.5, %v3086_v19  ;;  %3099 = vtanh.f32 %v2218_v53  ;;  %v2219_v55 = vmul.f32 0.5, %v2105_v18  ;;  %v2107_v21 = vadd.f32 %v2106_v47, %v4028_v46 }
 0x581   :  { %v3088_v22 = vpop.eup %3087  ;;  %v2108_v50 = vpop.f32.mrf.mxu0 }
 0x582   :  { %v2361_v23 = vadd.f32 0.5, %v2311_v20  ;;  %v2312_v58 = vmul.f32 0.5, %v3088_v22  ;;  %3101 = vtanh.f32 %v2219_v55  ;;  %v2220_v26 = vmul.f32 0.5, %v2107_v21 }
 0x583   :  { %v3090_v10 = vpop.eup %3089  ;;  %v2109_v56 = vadd.f32 %v2108_v50, %v4024_v17  ;;  %v2110_v27 = vpop.f32.mrf.mxu0 }
 0x584   :  { %2411 = vst [vmem:[#allocation16] sm:$0xff] %v2361_v23  ;;  %v2362_v62 = vadd.f32 0.5, %v2312_v58  ;;  %v2313_v1 = vmul.f32 0.5, %v3090_v10  ;;  %3103 = vtanh.f32 %v2220_v26  ;;  %v2111_v12 = vadd.f32 %v2110_v27, %v4028_v46 }
 0x585   :  { %v3092_v30 = vpop.eup %3091  ;;  %v2221_v32 = vmul.f32 0.5, %v2109_v56  ;;  %v2114_v33 = vpop.f32.mrf.mxu0 }
 0x586   :  { %2412 = vst [vmem:[#allocation16 + $0x8] sm:$0xff] %v2362_v62  ;;  %v2363_v35 = vadd.f32 0.5, %v2313_v1  ;;  %v2314_v9 = vmul.f32 0.5, %v3092_v30  ;;  %v2222_v6 = vmul.f32 0.5, %v2111_v12  ;;  %v2115_v36 = vadd.f32 %v2114_v33, %v4024_v17 }
 0x587   :  { %v3094_v16 = vpop.eup %3093  ;;  %3105 = vtanh.f32 %v2221_v32  ;;  %v2116_v39 = vpop.f32.mrf.mxu0 }
 0x588   :  { %2413 = vst [vmem:[#allocation16 + $0x10] sm:$0xff] %v2363_v35  ;;  %v2364_v40 = vadd.f32 0.5, %v2314_v9  ;;  %v2315_v41 = vmul.f32 0.5, %v3094_v16  ;;  %3107 = vtanh.f32 %v2222_v6  ;;  %v2223_v43 = vmul.f32 0.5, %v2115_v36 }
 0x589   :  { %v3096_v44 = vpop.eup %3095  ;;  %v2117_v25 = vadd.f32 %v2116_v39, %v4028_v46  ;;  %v2118_v34 = vpop.f32.mrf.mxu0 }
 0x58a   :  { %2414 = vst [vmem:[#allocation16 + $0x18] sm:$0xff] %v2364_v40  ;;  %v2365_v15 = vadd.f32 0.5, %v2315_v41  ;;  %v2316_v45 = vmul.f32 0.5, %v3096_v44  ;;  %3109 = vtanh.f32 %v2223_v43  ;;  %v2119_v52 = vadd.f32 %v2118_v34, %v4024_v17 }
 0x58b   :  { %v3098_v48 = vpop.eup %3097  ;;  %v2224_v0 = vmul.f32 0.5, %v2117_v25  ;;  %v2120_v24 = vpop.f32.mrf.mxu0 }
 0x58c   :  { %2415 = vst [vmem:[#allocation16 + $0x20] sm:$0xff] %v2365_v15  ;;  %v2366_v49 = vadd.f32 0.5, %v2316_v45  ;;  %v2317_v31 = vmul.f32 0.5, %v3098_v48  ;;  %v2225_v57 = vmul.f32 0.5, %v2119_v52  ;;  %v2121_v59 = vadd.f32 %v2120_v24, %v4028_v46 }
 0x58d   :  { %v3100_v60 = vpop.eup %3099  ;;  %3111 = vtanh.f32 %v2224_v0  ;;  %v2124_v61 = vpop.f32.mrf.mxu0 }
 0x58e   :  { %2416 = vst [vmem:[#allocation16 + $0x28] sm:$0xff] %v2366_v49  ;;  %v2367_v29 = vadd.f32 0.5, %v2317_v31  ;;  %v2318_v63 = vmul.f32 0.5, %v3100_v60  ;;  %3113 = vtanh.f32 %v2225_v57  ;;  %v2226_v28 = vmul.f32 0.5, %v2121_v59 }
 0x58f   :  { %v3102_v38 = vpop.eup %3101  ;;  %v2125_v51 = vadd.f32 %v2124_v61, %v4024_v17  ;;  %v2126_v54 = vpop.f32.mrf.mxu0 }
 0x590   :  { %2417 = vst [vmem:[#allocation16 + $0x30] sm:$0xff] %v2367_v29  ;;  %v2368_v3 = vadd.f32 0.5, %v2318_v63  ;;  %v2319_v4 = vmul.f32 0.5, %v3102_v38  ;;  %3115 = vtanh.f32 %v2226_v28  ;;  %v2127_v5 = vadd.f32 %v2126_v54, %v4028_v46 }
 0x591   :  { %v3104_v7 = vpop.eup %3103  ;;  %v2227_v37 = vmul.f32 0.5, %v2125_v51  ;;  %v2128_v11 = vpop.f32.mrf.mxu0 }
 0x592   :  { %2418 = vst [vmem:[#allocation16 + $0x38] sm:$0xff] %v2368_v3  ;;  %v2369_v2 = vadd.f32 0.5, %v2319_v4  ;;  %v2320_v8 = vmul.f32 0.5, %v3104_v7  ;;  %v2228_v13 = vmul.f32 0.5, %v2127_v5  ;;  %v2129_v42 = vadd.f32 %v2128_v11, %v4024_v17 }
 0x593   :  { %3117 = vtanh.f32 %v2227_v37  ;;  %v2130_v14 = vpop.f32.mrf.mxu0 }
 0x594   :  { %v3106_v53 = vpop.eup %3105  ;;  %2419 = vst [vmem:[#allocation16 + $0x40] sm:$0xff] %v2369_v2  ;;  %v2370_v18 = vadd.f32 0.5, %v2320_v8  ;;  %3119 = vtanh.f32 %v2228_v13  ;;  %v2229_v19 = vmul.f32 0.5, %v2129_v42  ;;  %v2131_v47 = vadd.f32 %v2130_v14, %v4028_v46 }
 0x595   :  { %v3108_v20 = vpop.eup %3107  ;;  %v2321_v55 = vmul.f32 0.5, %v3106_v53  ;;  %v2134_v21 = vpop.f32.mrf.mxu0 }
 0x596   :  { %2420 = vst [vmem:[#allocation16 + $0x48] sm:$0xff] %v2370_v18  ;;  %v2322_v22 = vmul.f32 0.5, %v3108_v20  ;;  %3121 = vtanh.f32 %v2229_v19  ;;  %v2230_v50 = vmul.f32 0.5, %v2131_v47  ;;  %v2135_v23 = vadd.f32 %v2134_v21, %v4024_v17 }
 0x597   :  { %v3110_v58 = vpop.eup %3109  ;;  %v2371_v26 = vadd.f32 0.5, %v2321_v55  ;;  %v2136_v10 = vpop.f32.mrf.mxu0 }
 0x598   :  { %v2372_v56 = vadd.f32 0.5, %v2322_v22  ;;  %v2323_v27 = vmul.f32 0.5, %v3110_v58  ;;  %3123 = vtanh.f32 %v2230_v50  ;;  %v2231_v62 = vmul.f32 0.5, %v2135_v23 }
 0x599   :  { %2421 = vst [vmem:[#allocation16 + $0x50] sm:$0xff] %v2371_v26  ;;  %v2137_v1 = vadd.f32 %v2136_v10, %v4028_v46  ;;  %v2138_v12 = vpop.f32.mrf.mxu0 }
 0x59a   :  { %v3112_v30 = vpop.eup %3111  ;;  %2422 = vst [vmem:[#allocation16 + $0x58] sm:$0xff] %v2372_v56  ;;  %v2373_v32 = vadd.f32 0.5, %v2323_v27  ;;  %3125 = vtanh.f32 %v2231_v62  ;;  %v2139_v33 = vadd.f32 %v2138_v12, %v4024_v17 }
 0x59b   :  { %v3114_v35 = vpop.eup %3113  ;;  %v2324_v9 = vmul.f32 0.5, %v3112_v30  ;;  %v2232_v6 = vmul.f32 0.5, %v2137_v1  ;;  %v2140_v36 = vpop.f32.mrf.mxu0 }
 0x59c   :  { %2423 = vst [vmem:[#allocation16 + $0x60] sm:$0xff] %v2373_v32  ;;  %v2325_v16 = vmul.f32 0.5, %v3114_v35  ;;  %v2233_v39 = vmul.f32 0.5, %v2139_v33  ;;  %v2141_v40 = vadd.f32 %v2140_v36, %v4028_v46 }
 0x59d   :  { %v3116_v41 = vpop.eup %3115  ;;  %v2374_v43 = vadd.f32 0.5, %v2324_v9  ;;  %3127 = vtanh.f32 %v2232_v6  ;;  %v2144_v44 = vpop.f32.mrf.mxu0 }
 0x59e   :  { %v2375_v25 = vadd.f32 0.5, %v2325_v16  ;;  %v2326_v34 = vmul.f32 0.5, %v3116_v41  ;;  %3129 = vtanh.f32 %v2233_v39  ;;  %v2234_v15 = vmul.f32 0.5, %v2141_v40 }
 0x59f   :  { %2424 = vst [vmem:[#allocation16 + $0x68] sm:$0xff] %v2374_v43  ;;  %v2145_v45 = vadd.f32 %v2144_v44, %v4024_v17  ;;  %v2146_v52 = vpop.f32.mrf.mxu0 }
 0x5a0   :  { %v3118_v48 = vpop.eup %3117  ;;  %2425 = vst [vmem:[#allocation16 + $0x70] sm:$0xff] %v2375_v25  ;;  %v2376_v0 = vadd.f32 0.5, %v2326_v34  ;;  %3131 = vtanh.f32 %v2234_v15  ;;  %v2147_v24 = vadd.f32 %v2146_v52, %v4028_v46 }
 0x5a1   :  { %v3120_v49 = vpop.eup %3119  ;;  %v2327_v31 = vmul.f32 0.5, %v3118_v48  ;;  %v2235_v57 = vmul.f32 0.5, %v2145_v45  ;;  %v2148_v59 = vpop.f32.mrf.mxu0 }
 0x5a2   :  { %2426 = vst [vmem:[#allocation16 + $0x78] sm:$0xff] %v2376_v0  ;;  %v2328_v60 = vmul.f32 0.5, %v3120_v49  ;;  %v2236_v61 = vmul.f32 0.5, %v2147_v24  ;;  %v2149_v29 = vadd.f32 %v2148_v59, %v4024_v17 }
 0x5a3   :  { %v3122_v63 = vpop.eup %3121  ;;  %v2377_v28 = vadd.f32 0.5, %v2327_v31  ;;  %3133 = vtanh.f32 %v2235_v57  ;;  %v2150_v38 = vpop.f32.mrf.mxu0 }
 0x5a4   :  { %v2378_v51 = vadd.f32 0.5, %v2328_v60  ;;  %v2329_v54 = vmul.f32 0.5, %v3122_v63  ;;  %3135 = vtanh.f32 %v2236_v61  ;;  %v2237_v3 = vmul.f32 0.5, %v2149_v29 }
 0x5a5   :  { %v3124_v4 = vpop.eup %3123  ;;  %2427 = vst [vmem:[#allocation16 + $0x80] sm:$0xff] %v2377_v28  ;;  %v2151_v5 = vadd.f32 %v2150_v38, %v4028_v46  ;;  %v2154_v7 = vpop.f32.mrf.mxu0 }
 0x5a6   :  { %2428 = vst [vmem:[#allocation16 + $0x88] sm:$0xff] %v2378_v51  ;;  %v2379_v37 = vadd.f32 0.5, %v2329_v54  ;;  %v2330_v11 = vmul.f32 0.5, %v3124_v4  ;;  %3137 = vtanh.f32 %v2237_v3  ;;  %v2155_v2 = vadd.f32 %v2154_v7, %v4024_v17 }
 0x5a7   :  { %v3126_v8 = vpop.eup %3125  ;;  %v2238_v13 = vmul.f32 0.5, %v2151_v5  ;;  %v2156_v42 = vpop.f32.mrf.mxu0 }
 0x5a8   :  { %2429 = vst [vmem:[#allocation16 + $0x90] sm:$0xff] %v2379_v37  ;;  %v2380_v14 = vadd.f32 0.5, %v2330_v11  ;;  %v2331_v53 = vmul.f32 0.5, %v3126_v8  ;;  %v2239_v18 = vmul.f32 0.5, %v2155_v2  ;;  %v2157_v19 = vadd.f32 %v2156_v42, %v4028_v46 }
 0x5a9   :  { %3139 = vtanh.f32 %v2238_v13  ;;  %v2158_v47 = vpop.f32.mrf.mxu0 }
 0x5aa   :  { %v3128_v20 = vpop.eup %3127  ;;  %2430 = vst [vmem:[#allocation16 + $0x98] sm:$0xff] %v2380_v14  ;;  %v2381_v55 = vadd.f32 0.5, %v2331_v53  ;;  %3141 = vtanh.f32 %v2239_v18  ;;  %v2240_v21 = vmul.f32 0.5, %v2157_v19  ;;  %v2159_v22 = vadd.f32 %v2158_v47, %v4024_v17 }
 0x5ab   :  { %v3130_v50 = vpop.eup %3129  ;;  %v2332_v23 = vmul.f32 0.5, %v3128_v20  ;;  %v2160_v58 = vpop.f32.mrf.mxu0 }
 0x5ac   :  { %2431 = vst [vmem:[#allocation16 + $0xa0] sm:$0xff] %v2381_v55  ;;  %v2333_v26 = vmul.f32 0.5, %v3130_v50  ;;  %3143 = vtanh.f32 %v2240_v21  ;;  %v2241_v10 = vmul.f32 0.5, %v2159_v22  ;;  %v2161_v56 = vadd.f32 %v2160_v58, %v4028_v46 }
 0x5ad   :  { %v3132_v27 = vpop.eup %3131  ;;  %v2382_v62 = vadd.f32 0.5, %v2332_v23  ;;  %v2164_v1 = vpop.f32.mrf.mxu0 }
 0x5ae   :  { %v2383_v12 = vadd.f32 0.5, %v2333_v26  ;;  %v2334_v30 = vmul.f32 0.5, %v3132_v27  ;;  %3145 = vtanh.f32 %v2241_v10  ;;  %v2242_v32 = vmul.f32 0.5, %v2161_v56 }
 0x5af   :  { %2432 = vst [vmem:[#allocation16 + $0xa8] sm:$0xff] %v2382_v62  ;;  %v2165_v33 = vadd.f32 %v2164_v1, %v4024_v17  ;;  %v2166_v35 = vpop.f32.mrf.mxu0 }
 0x5b0   :  { %v3134_v9 = vpop.eup %3133  ;;  %2433 = vst [vmem:[#allocation16 + $0xb0] sm:$0xff] %v2383_v12  ;;  %v2384_v6 = vadd.f32 0.5, %v2334_v30  ;;  %3147 = vtanh.f32 %v2242_v32  ;;  %v2167_v36 = vadd.f32 %v2166_v35, %v4028_v46 }
 0x5b1   :  { %v3136_v16 = vpop.eup %3135  ;;  %v2335_v39 = vmul.f32 0.5, %v3134_v9  ;;  %v2243_v40 = vmul.f32 0.5, %v2165_v33  ;;  %v2168_v41 = vpop.f32.mrf.mxu0 }
 0x5b2   :  { %2434 = vst [vmem:[#allocation16 + $0xb8] sm:$0xff] %v2384_v6  ;;  %v2336_v43 = vmul.f32 0.5, %v3136_v16  ;;  %v2244_v44 = vmul.f32 0.5, %v2167_v36  ;;  %v2169_v25 = vadd.f32 %v2168_v41, %v4024_v17 }
 0x5b3   :  { %v3138_v34 = vpop.eup %3137  ;;  %v2385_v15 = vadd.f32 0.5, %v2335_v39  ;;  %3149 = vtanh.f32 %v2243_v40  ;;  %v2170_v45 = vpop.f32.mrf.mxu0 }
 0x5b4   :  { %v2386_v52 = vadd.f32 0.5, %v2336_v43  ;;  %v2337_v48 = vmul.f32 0.5, %v3138_v34  ;;  %3151 = vtanh.f32 %v2244_v44  ;;  %v2245_v0 = vmul.f32 0.5, %v2169_v25 }
 0x5b5   :  { %2435 = vst [vmem:[#allocation16 + $0xc0] sm:$0xff] %v2385_v15  ;;  %v2171_v24 = vadd.f32 %v2170_v45, %v4028_v46  ;;  %v2174_v49 = vpop.f32.mrf.mxu0 }
 0x5b6   :  { %v3140_v31 = vpop.eup %3139  ;;  %2436 = vst [vmem:[#allocation16 + $0xc8] sm:$0xff] %v2386_v52  ;;  %v2387_v57 = vadd.f32 0.5, %v2337_v48  ;;  %3153 = vtanh.f32 %v2245_v0  ;;  %v2175_v59 = vadd.f32 %v2174_v49, %v4024_v17 }
 0x5b7   :  { %v3142_v60 = vpop.eup %3141  ;;  %v2338_v61 = vmul.f32 0.5, %v3140_v31  ;;  %v2246_v29 = vmul.f32 0.5, %v2171_v24  ;;  %v2176_v63 = vpop.f32.mrf.mxu0 }
 0x5b8   :  { %2437 = vst [vmem:[#allocation16 + $0xd0] sm:$0xff] %v2387_v57  ;;  %v2339_v28 = vmul.f32 0.5, %v3142_v60  ;;  %v2247_v38 = vmul.f32 0.5, %v2175_v59  ;;  %v2177_v51 = vadd.f32 %v2176_v63, %v4028_v46 }
 0x5b9   :  { %v3144_v54 = vpop.eup %3143  ;;  %v2388_v3 = vadd.f32 0.5, %v2338_v61  ;;  %3155 = vtanh.f32 %v2246_v29  ;;  %v2178_v4 = vpop.f32.mrf.mxu0 }
 0x5ba   :  { %v2389_v5 = vadd.f32 0.5, %v2339_v28  ;;  %v2340_v7 = vmul.f32 0.5, %v3144_v54  ;;  %3157 = vtanh.f32 %v2247_v38  ;;  %v2248_v37 = vmul.f32 0.5, %v2177_v51 }
 0x5bb   :  { %v3146_v11 = vpop.eup %3145  ;;  %2438 = vst [vmem:[#allocation16 + $0xd8] sm:$0xff] %v2388_v3  ;;  %v2179_v2 = vadd.f32 %v2178_v4, %v4024_v17  ;;  %v2180_v8 = vpop.f32.mrf.mxu0 }
 0x5bc   :  { %2439 = vst [vmem:[#allocation16 + $0xe0] sm:$0xff] %v2389_v5  ;;  %v2390_v13 = vadd.f32 0.5, %v2340_v7  ;;  %v2341_v42 = vmul.f32 0.5, %v3146_v11  ;;  %3159 = vtanh.f32 %v2248_v37  ;;  %v2181_v14 = vadd.f32 %v2180_v8, %v4028_v46 }
 0x5bd   :  { %v3148_v53 = vpop.eup %3147  ;;  %v2249_v18 = vmul.f32 0.5, %v2179_v2  ;;  %v2184_v19 = vpop.f32.mrf.mxu0 }
 0x5be   :  { %2440 = vst [vmem:[#allocation16 + $0xe8] sm:$0xff] %v2390_v13  ;;  %v2391_v47 = vadd.f32 0.5, %v2341_v42  ;;  %v2342_v20 = vmul.f32 0.5, %v3148_v53  ;;  %v2250_v55 = vmul.f32 0.5, %v2181_v14  ;;  %v2185_v21 = vadd.f32 %v2184_v19, %v4024_v17 }
 0x5bf   :  { %3161 = vtanh.f32 %v2249_v18  ;;  %v2186_v22 = vpop.f32.mrf.mxu0 }
 0x5c0   :  { %v3150_v50 = vpop.eup %3149  ;;  %2441 = vst [vmem:[#allocation16 + $0xf0] sm:$0xff] %v2391_v47  ;;  %v2392_v23 = vadd.f32 0.5, %v2342_v20  ;;  %3163 = vtanh.f32 %v2250_v55  ;;  %v2251_v58 = vmul.f32 0.5, %v2185_v21  ;;  %v2187_v26 = vadd.f32 %v2186_v22, %v4028_v46 }
 0x5c1   :  { %v3152_v10 = vpop.eup %3151  ;;  %v2343_v56 = vmul.f32 0.5, %v3150_v50  ;;  %v2188_v27 = vpop.f32.mrf.mxu0 }
 0x5c2   :  { %2442 = vst [vmem:[#allocation16 + $0xf8] sm:$0xff] %v2392_v23  ;;  %v2344_v62 = vmul.f32 0.5, %v3152_v10  ;;  %3165 = vtanh.f32 %v2251_v58  ;;  %v2252_v1 = vmul.f32 0.5, %v2187_v26  ;;  %v2189_v12 = vadd.f32 %v2188_v27, %v4024_v17 }
 0x5c3   :  { %v3154_v30 = vpop.eup %3153  ;;  %v2393_v32 = vadd.f32 0.5, %v2343_v56  ;;  %v2190_v33 = vpop.f32.mrf.mxu0 }
 0x5c4   :  { %v2394_v35 = vadd.f32 0.5, %v2344_v62  ;;  %v2345_v9 = vmul.f32 0.5, %v3154_v30  ;;  %3167 = vtanh.f32 %v2252_v1  ;;  %v2253_v6 = vmul.f32 0.5, %v2189_v12 }
 0x5c5   :  { %2443 = vst [vmem:[#allocation16 + $0x100] sm:$0xff] %v2393_v32  ;;  %v2191_v36 = vadd.f32 %v2190_v33, %v4028_v46  ;;  %v2194_v16 = vpop.f32.mrf.mxu0 }
 0x5c6   :  { %v3156_v39 = vpop.eup %3155  ;;  %2444 = vst [vmem:[#allocation16 + $0x108] sm:$0xff] %v2394_v35  ;;  %v2395_v40 = vadd.f32 0.5, %v2345_v9  ;;  %3169 = vtanh.f32 %v2253_v6  ;;  %v2195_v41 = vadd.f32 %v2194_v16, %v4024_v17 }
 0x5c7   :  { %v3158_v43 = vpop.eup %3157  ;;  %v2346_v44 = vmul.f32 0.5, %v3156_v39  ;;  %v2254_v25 = vmul.f32 0.5, %v2191_v36  ;;  %v2196_v34 = vpop.f32.mrf.mxu0 }
 0x5c8   :  { %2445 = vst [vmem:[#allocation16 + $0x110] sm:$0xff] %v2395_v40  ;;  %v2347_v15 = vmul.f32 0.5, %v3158_v43  ;;  %v2255_v45 = vmul.f32 0.5, %v2195_v41  ;;  %v2197_v52 = vadd.f32 %v2196_v34, %v4028_v46 }
 0x5c9   :  { %v3160_v48 = vpop.eup %3159  ;;  %v2396_v0 = vadd.f32 0.5, %v2346_v44  ;;  %3171 = vtanh.f32 %v2254_v25  ;;  %v2198_v24 = vpop.f32.mrf.mxu0 }
 0x5ca   :  { %v2204_v49 = vpop.f32.mrf.mxu1  ;;  %v2397_v31 = vadd.f32 0.5, %v2347_v15  ;;  %v2348_v57 = vmul.f32 0.5, %v3160_v48  ;;  %3173 = vtanh.f32 %v2255_v45  ;;  %v2256_v59 = vmul.f32 0.5, %v2197_v52 }
 0x5cb   :  { %2446 = vst [vmem:[#allocation16 + $0x118] sm:$0xff] %v2396_v0  ;;  %v2199_v60 = vadd.f32 %v2198_v24, %v4024_v17  ;;  %v2205_v61 = vadd.f32 %v2204_v49, %v4024_v17  ;;  %v2200_v29 = vpop.f32.mrf.mxu0 }
 0x5cc   :  { %v2206_v63 = vpop.f32.mrf.mxu1  ;;  %v3162_v28 = vpop.eup %3161  ;;  %2447 = vst [vmem:[#allocation16 + $0x120] sm:$0xff] %v2397_v31  ;;  %v2398_v38 = vadd.f32 0.5, %v2348_v57  ;;  %3175 = vtanh.f32 %v2256_v59  ;;  %v2201_v51 = vadd.f32 %v2200_v29, %v4028_v46 }
 0x5cd   :  { %v2207_v54 = vadd.f32 %v2206_v63, %v4028_v46  ;;  %v3164_v3 = vpop.eup %3163  ;;  %v2349_v4 = vmul.f32 0.5, %v3162_v28  ;;  %v2257_v5 = vmul.f32 0.5, %v2199_v60  ;;  %v2259_v7 = vmul.f32 0.5, %v2205_v61 }
 0x5ce   :  { %v2208_v37 = vpop.f32.mrf.mxu1  ;;  %2448 = vst [vmem:[#allocation16 + $0x128] sm:$0xff] %v2398_v38  ;;  %v2350_v11 = vmul.f32 0.5, %v3164_v3  ;;  %v2258_v2 = vmul.f32 0.5, %v2201_v51 }
 0x5cf   :  { %v2260_v8 = vmul.f32 0.5, %v2207_v54  ;;  %v3166_v17 = vpop.eup %3165  ;;  %v2399_v13 = vadd.f32 0.5, %v2349_v4  ;;  %3177 = vtanh.f32 %v2257_v5 }
 0x5d0   :  { %v2209_v42 = vpop.f32.mrf.mxu1  ;;  %v2400_v14 = vadd.f32 0.5, %v2350_v11  ;;  %v2351_v53 = vmul.f32 0.5, %v3166_v17  ;;  %3179 = vtanh.f32 %v2259_v7 }
 0x5d1   :  { %v3168_v18 = vpop.eup %3167  ;;  %2449 = vst [vmem:[#allocation16 + $0x130] sm:$0xff] %v2399_v13  ;;  %3181 = vtanh.f32 %v2258_v2 }
 0x5d2   :  { %2450 = vst [vmem:[#allocation16 + $0x138] sm:$0xff] %v2400_v14  ;;  %v2401_v46 = vadd.f32 0.5, %v2351_v53  ;;  %v2352_v19 = vmul.f32 0.5, %v3168_v18  ;;  %3183 = vtanh.f32 %v2260_v8 }
 0x5d3   :  { %v3170_v47 = vpop.eup %3169 }
 0x5d4   :  { %2451 = vst [vmem:[#allocation16 + $0x140] sm:$0xff] %v2401_v46  ;;  %v2402_v20 = vadd.f32 0.5, %v2352_v19  ;;  %v2353_v55 = vmul.f32 0.5, %v3170_v47 }
 0x5d6   :  { %v3172_v21 = vpop.eup %3171  ;;  %2452 = vst [vmem:[#allocation16 + $0x148] sm:$0xff] %v2402_v20  ;;  %v2403_v22 = vadd.f32 0.5, %v2353_v55 }
 0x5d7   :  { %v3174_v50 = vpop.eup %3173  ;;  %v2354_v23 = vmul.f32 0.5, %v3172_v21 }
 0x5d8   :  { %2453 = vst [vmem:[#allocation16 + $0x150] sm:$0xff] %v2403_v22  ;;  %v2355_v58 = vmul.f32 0.5, %v3174_v50 }
 0x5d9   :  { %v3176_v26 = vpop.eup %3175  ;;  %v2404_v10 = vadd.f32 0.5, %v2354_v23 }
 0x5da   :  { %v2405_v56 = vadd.f32 0.5, %v2355_v58  ;;  %v2356_v27 = vmul.f32 0.5, %v3176_v26 }
 0x5db   :  { %2454 = vst [vmem:[#allocation16 + $0x158] sm:$0xff] %v2404_v10 }
 0x5dc   :  { %v3178_v62 = vpop.eup %3177  ;;  %2455 = vst [vmem:[#allocation16 + $0x160] sm:$0xff] %v2405_v56  ;;  %v2406_v1 = vadd.f32 0.5, %v2356_v27 }
 0x5dd   :  { %v3180_v12 = vpop.eup %3179  ;;  %v2357_v30 = vmul.f32 0.5, %v3178_v62 }
 0x5de   :  { %v3182_v32 = vpop.eup %3181  ;;  %2456 = vst [vmem:[#allocation16 + $0x168] sm:$0xff] %v2406_v1  ;;  %v2359_v33 = vmul.f32 0.5, %v3180_v12 }
 0x5df   :  { %v3184_v35 = vpop.eup %3183  ;;  %v2407_v9 = vadd.f32 0.5, %v2357_v30  ;;  %v2358_v6 = vmul.f32 0.5, %v3182_v32 }
 0x5e0   :  { %v2409_v36 = vadd.f32 0.5, %v2359_v33  ;;  %v2360_v16 = vmul.f32 0.5, %v3184_v35 }
 0x5e1   :  { %2457 = vst [vmem:[#allocation16 + $0x170] sm:$0xff] %v2407_v9  ;;  %v2408_v39 = vadd.f32 0.5, %v2358_v6 }
 0x5e2   :  { %2459 = vst [vmem:[#allocation16 + $0x180] sm:$0xff] %v2409_v36  ;;  %v2410_v40 = vadd.f32 0.5, %v2360_v16 }
 0x5e3   :  { %2458 = vst [vmem:[#allocation16 + $0x178] sm:$0xff] %v2408_v39 }
 0x5e4   :  { %2460 = vst [vmem:[#allocation16 + $0x188] sm:$0xff] %v2410_v40 }
 0x5e5   :  { %3376 = shalt.err (!%p3373_p7)
}
 0x5e6   :  { %2472 = dma.vmem_to_hbm [thread:$0]  %s2467_s15, 6400, %s4100_s14, [#allocation4], %s3415_s18, %s3415_s18, %s3416_s1  }
 0x5e7   :  { %3395 = dma.done.wait [#allocation4], 6400  }
 0x5e8   :  { %3396 = vsyncadd [#allocation4], 4294960896 }
 0x5e9   :  { %3397 = dma.done.wait [#allocation18], 6400  }
 0x5ea   :  { %3398 = vsyncadd [#allocation18], 4294960896 }
 0x5eb   :  { %2491 = vsyncpa [#allocation3], 1 }
 0x5ec   :  { %2492 = vsyncpa [#allocation6], 1 }
 0x5ed   :  { %2493 = vsyncpa [#allocation9], 1 }
 0x5ee   :  { %2494 = vsyncpa [#allocation12], 1 }
 0x5ef   :  { %2495 = vsyncpa [#allocation15], 1 }
 0x5f0   :  { %2496 = vsyncpa [#allocation4], 1 }
 0x5f1   :  { %2497 = vsyncpa [#allocation18], 1 }

// kernel: tpu_custom_call.1
= control target key start
LH: loop header
LB: loop body
LE: loop exit
PB: predicated region body
PF: predicated region fallthrough
CT: control target
= control target key end

     0   :  { %21 = vsyncpa [#allocation3], 0  ;;  %s4086_s0 = inlined_call_operand.hbm [shape: bf16[200,196], index: 0, kind: input, shape index: {}]   ;;  %s4087_s1 = inlined_call_operand.hbm [shape: f32[200,128], index: 1, kind: input, shape index: {}]   ;;  %s4088_s2 = inlined_call_operand.hbm [shape: bf16[196,128], index: 2, kind: input, shape index: {}]   ;;  %s4089_s3 = inlined_call_operand.vmem [shape: f32[1,128], index: 3, kind: input, shape index: {}]   ;;  %s4090_s4 = inlined_call_operand.hbm [shape: bf16[128,128], index: 4, kind: input, shape index: {}]   ;;  %s4091_s5 = inlined_call_operand.vmem [shape: f32[1,128], index: 5, kind: input, shape index: {}]   ;;  %s4092_s6 = inlined_call_operand.hbm [shape: bf16[128,256], index: 6, kind: input, shape index: {}]   ;;  %s4093_s7 = inlined_call_operand.vmem [shape: f32[1,256], index: 7, kind: input, shape index: {}]   ;;  %s4094_s8 = inlined_call_operand.hbm [shape: bf16[128,128], index: 8, kind: input, shape index: {}]   ;;  %s4095_s9 = inlined_call_operand.vmem [shape: f32[1,128], index: 9, kind: input, shape index: {}]   ;;  %s4096_s10 = inlined_call_operand.hbm [shape: bf16[128,128], index: 10, kind: input, shape index: {}]   ;;  %s4097_s11 = inlined_call_operand.vmem [shape: f32[1,128], index: 11, kind: input, shape index: {}]   ;;  %s4098_s12 = inlined_call_operand.hbm [shape: bf16[128,256], index: 12, kind: input, shape index: {}]   ;;  %s4099_s13 = inlined_call_operand.vmem [shape: f32[1,256], index: 13, kind: input, shape index: {}]   ;;  %s4100_s14 = inlined_call_operand.hbm [shape: f32[200,256], index: 14, kind: output, shape index: {0}]   ;;  %s4101_s15 = inlined_call_operand.hbm [shape: f32[200,256], index: 15, kind: output, shape index: {1}]  }
   0x1   :  { %22 = vsyncpa [#allocation6], 0 }
   0x2   :  { %23 = vsyncpa [#allocation9], 0 }
   0x3   :  { %24 = vsyncpa [#allocation12], 0 }
   0x4   :  { %25 = vsyncpa [#allocation15], 0 }
   0x5   :  { %26 = vsyncpa [#allocation4], 0 }
   0x6   :  { %27 = vsyncpa [#allocation18], 0  ;;  %s3399_s18 = smov [#allocation5]  }
   0x7   :  { %s45_s19 = sshll.u32 %s3399_s18, 4  ;;  %s46_s19 = int_to_ptr.vmem [resolvable:$true] %s45_s19 }
   0x8   :  { %s3193_s20 = scalar_lea.vmem %s46_s19, 3200  ;;  %p3198_p1 = scmp.lt.s32.totalorder %s46_s19, %s46_s19 }
   0x9   :  { %p3194_p0 = scmp.ne.s32.totalorder %s46_s19, %s3193_s20  ;;  %p3199_p2 = scmp.lt.s32.totalorder %s3193_s20, %s3193_s20 }
   0xb   :  { %p3200_p3 = por %p3199_p2, %p3198_p1 }
   0xd   :  { %p3201_p4 = pnand %p3200_p3, %p3194_p0 }
   0xf   :  { %3204 = shalt.err (!%p3201_p4)
}
  0x10   :  { %s3400_s21 = smov 128   ;;  %s3401_s22 = smov 8  }
  0x11   :  { %51 = dma.hbm_to_vmem [thread:$0]  %s4087_s1, 3200, %s46_s19, [#allocation6], %s3400_s21, %s3400_s21, %s3401_s22  }
  0x12   :  { %s3402_s25 = smov [#allocation8]   ;;  %s3403_s27 = smov [#allocation11]  }
  0x13   :  { %s71_s26 = sshll.u32 %s3402_s25, 4  ;;  %s99_s28 = sshll.u32 %s3403_s27, 4  ;;  %s72_s26 = int_to_ptr.vmem [resolvable:$true] %s71_s26  ;;  %s100_s28 = int_to_ptr.vmem [resolvable:$true] %s99_s28 }
  0x14   :  { %s3213_s29 = scalar_lea.vmem %s72_s26, 1024  ;;  %p3218_p6 = scmp.lt.s32.totalorder %s72_s26, %s72_s26 }
  0x15   :  { %p3214_p5 = scmp.ne.s32.totalorder %s72_s26, %s3213_s29  ;;  %p3219_p7 = scmp.lt.s32.totalorder %s3213_s29, %s3213_s29 }
  0x17   :  { %p3220_p8 = por %p3219_p7, %p3218_p6 }
  0x19   :  { %p3221_p9 = pnand %p3220_p8, %p3214_p5 }
  0x1b   :  { %3224 = shalt.err (!%p3221_p9)
}
  0x1c   :  { %s3404_s30 = smov 64   ;;  %s3405_s16 = smov 4  }
  0x1d   :  { %77 = dma.hbm_to_vmem [thread:$0]  %s4090_s4, 1024, %s72_s26, [#allocation9], %s3404_s30, %s3404_s30, %s3405_s16  }
  0x1e   :  { %s3233_s1 = scalar_lea.vmem %s100_s28, 1024  ;;  %p3238_p11 = scmp.lt.s32.totalorder %s100_s28, %s100_s28 }
  0x1f   :  { %p3234_p10 = scmp.ne.s32.totalorder %s100_s28, %s3233_s1  ;;  %p3239_p12 = scmp.lt.s32.totalorder %s3233_s1, %s3233_s1 }
  0x21   :  { %p3240_p13 = por %p3239_p12, %p3238_p11 }
  0x23   :  { %p3241_p0 = pnand %p3240_p13, %p3234_p10 }
  0x25   :  { %3244 = shalt.err (!%p3241_p0)
}
  0x26   :  { %105 = dma.hbm_to_vmem [thread:$0]  %s4094_s8, 1024, %s100_s28, [#allocation12], %s3404_s30, %s3404_s30, %s3405_s16  }
  0x27   :  { %s3406_s23 = smov [#allocation2]   ;;  %s3407_s25 = smov [#allocation7]  }
  0x28   :  { %s33_s24 = sshll.u32 %s3406_s23, 4  ;;  %s57_s4 = sshll.u32 %s3407_s25, 4  ;;  %s34_s24 = int_to_ptr.vmem [resolvable:$true] %s33_s24  ;;  %s58_s4 = int_to_ptr.vmem [resolvable:$true] %s57_s4 }
  0x29   :  { %s3253_s26 = scalar_lea.vmem %s34_s24, 3200  ;;  %p3258_p2 = scmp.lt.s32.totalorder %s34_s24, %s34_s24 }
  0x2a   :  { %p3254_p1 = scmp.ne.s32.totalorder %s34_s24, %s3253_s26  ;;  %p3259_p3 = scmp.lt.s32.totalorder %s3253_s26, %s3253_s26 }
  0x2c   :  { %p3260_p4 = por %p3259_p3, %p3258_p2 }
  0x2e   :  { %p3261_p5 = pnand %p3260_p4, %p3254_p1 }
  0x30   :  { %3264 = shalt.err (!%p3261_p5)
}
  0x31   :  { %39 = dma.hbm_to_vmem [thread:$0]  %s4086_s0, 3200, %s34_s24, [#allocation3], %s3400_s21, %s3400_s21, %s3401_s22  }
  0x32   :  { %s3273_s8 = scalar_lea.vmem %s58_s4, 1600  ;;  %p3278_p7 = scmp.lt.s32.totalorder %s58_s4, %s58_s4 }
  0x33   :  { %p3274_p6 = scmp.ne.s32.totalorder %s58_s4, %s3273_s8  ;;  %p3279_p8 = scmp.lt.s32.totalorder %s3273_s8, %s3273_s8 }
  0x35   :  { %p3280_p9 = por %p3279_p8, %p3278_p7 }
  0x37   :  { %p3281_p10 = pnand %p3280_p9, %p3274_p6 }
  0x39   :  { %3284 = shalt.err (!%p3281_p10)
}
  0x3a   :  { %63 = dma.hbm_to_vmem [thread:$0]  %s4088_s2, 1600, %s58_s4, [#allocation6], %s3404_s30, %s3404_s30, %s3405_s16  }
  0x3b   :  { %s3408_s18 = smov [#allocation10]   ;;  %s3409_s19 = smov [#allocation13]  }
  0x3c   :  { %s85_s1 = sshll.u32 %s3408_s18, 4  ;;  %s113_s0 = sshll.u32 %s3409_s19, 4  ;;  %s86_s1 = int_to_ptr.vmem [resolvable:$true] %s85_s1  ;;  %s114_s0 = int_to_ptr.vmem [resolvable:$true] %s113_s0 }
  0x3d   :  { %s3293_s20 = scalar_lea.vmem %s86_s1, 2048  ;;  %p3298_p12 = scmp.lt.s32.totalorder %s86_s1, %s86_s1 }
  0x3e   :  { %p3294_p11 = scmp.ne.s32.totalorder %s86_s1, %s3293_s20  ;;  %p3299_p13 = scmp.lt.s32.totalorder %s3293_s20, %s3293_s20 }
  0x40   :  { %p3300_p0 = por %p3299_p13, %p3298_p12 }
  0x42   :  { %p3301_p1 = pnand %p3300_p0, %p3294_p11 }
  0x44   :  { %3304 = shalt.err (!%p3301_p1)
}
  0x45   :  { %91 = dma.hbm_to_vmem [thread:$0]  %s4092_s6, 2048, %s86_s1, [#allocation9], %s3400_s21, %s3400_s21, %s3401_s22  }
  0x46   :  { %s3313_s2 = scalar_lea.vmem %s114_s0, 1024  ;;  %p3318_p3 = scmp.lt.s32.totalorder %s114_s0, %s114_s0 }
  0x47   :  { %p3314_p2 = scmp.ne.s32.totalorder %s114_s0, %s3313_s2  ;;  %p3319_p4 = scmp.lt.s32.totalorder %s3313_s2, %s3313_s2 }
  0x49   :  { %p3320_p5 = por %p3319_p4, %p3318_p3 }
  0x4b   :  { %p3321_p6 = pnand %p3320_p5, %p3314_p2 }
  0x4d   :  { %3324 = shalt.err (!%p3321_p6)
}
  0x4e   :  { %119 = dma.hbm_to_vmem [thread:$0]  %s4096_s10, 1024, %s114_s0, [#allocation12], %s3404_s30, %s3404_s30, %s3405_s16  }
  0x4f   :  { %s3410_s26 = smov [#allocation14]  }
  0x50   :  { %s127_s27 = sshll.u32 %s3410_s26, 4  ;;  %s128_s27 = int_to_ptr.vmem [resolvable:$true] %s127_s27 }
  0x51   :  { %s3333_s29 = scalar_lea.vmem %s128_s27, 2048  ;;  %p3338_p8 = scmp.lt.s32.totalorder %s128_s27, %s128_s27 }
  0x52   :  { %p3334_p7 = scmp.ne.s32.totalorder %s128_s27, %s3333_s29  ;;  %p3339_p9 = scmp.lt.s32.totalorder %s3333_s29, %s3333_s29 }
  0x54   :  { %p3340_p10 = por %p3339_p9, %p3338_p8 }
  0x56   :  { %p3341_p11 = pnand %p3340_p10, %p3334_p7 }
  0x58   :  { %3344 = shalt.err (!%p3341_p11)
}
  0x59   :  { %133 = dma.hbm_to_vmem [thread:$0]  %s4098_s12, 2048, %s128_s27, [#allocation15], %s3400_s21, %s3400_s21, %s3401_s22  }
  0x5a   :  { %3385 = dma.done.wait [#allocation3], 3200  }
  0x5b   :  { %3386 = vsyncadd [#allocation3], 4294964096 }
  0x5c   :  { %3387 = dma.done.wait [#allocation6], 4800  }
  0x5d   :  { %3388 = vsyncadd [#allocation6], 4294962496 }
  0x5e   :  { %3389 = dma.done.wait [#allocation9], 3072  }
  0x5f   :  { %3390 = vsyncadd [#allocation9], 4294964224 }
  0x60   :  { %3391 = dma.done.wait [#allocation12], 2048  }
  0x61   :  { %3392 = vsyncadd [#allocation12], 4294965248 }
  0x62   :  { %3393 = dma.done.wait [#allocation15], 2048  }
  0x63   :  { %3394 = vsyncadd [#allocation15], 4294965248  ;;  %v3411_v0 = vmov 0   ;;  %v2912_v1 = vld [vmem:[#allocation7 + $0x38] sm:$0xff]   ;;  %v2913_v2 = vld [vmem:[#allocation7 + $0x30] sm:$0xff]   ;;  %vm407_vm0 = vcmask 556032  }
  0x64   :  { %451 = vmatprep.subr.bf16.mxu0 %v3411_v0  ;;  %v2914_v3 = vld [vmem:[#allocation7 + $0x28] sm:$0xff]   ;;  %v2915_v4 = vld [vmem:[#allocation7 + $0x20] sm:$0xff]   ;;  %v2927_v5 = vld [vmem:[#allocation2 + $0x4] ss:$8 sps:$4 sm:$0xff]   ;;  %v3412_v9 = vmov 0.0   ;;  %vm447_vm1 = vcmask 1041408  }
  0x65   :  { %452 = vmatpush1.bf16.msra.mxu0 %v2912_v1  ;;  %v2916_v6 = vld [vmem:[#allocation7 + $0x18] sm:$0xff]   ;;  %2538 = vmatprep.mubr.msk.bf16.mxu0 %vm407_vm0, %v2927_v5  ;;  %v2917_v7 = vld [vmem:[#allocation7 + $0x10] sm:$0xff]   ;;  %v2918_v8 = vld [vmem:[#allocation7 + $0x8] sm:$0xff]   ;;  %vm3413_vm2 = vmmov 0  }
  0x66   :  { %453 = vmatprep.subr.bf16.mxu0 %v3411_v0  ;;  %2673 = vmatprep.subr.bf16.mxu1 %v3412_v9  ;;  %v2919_v10 = vld [vmem:[#allocation7] sm:$0xff]   ;;  %v2964_v14 = vld [vmem:[#allocation8 + $0x30] sm:$0xff]   ;;  %v2965_v16 = vld [vmem:[#allocation8 + $0x28] sm:$0xff]  }
  0x67   :  { %v2920_v11 = vld [vmem:[#allocation7 + $0x60] ss:$0 sps:$4 sm:$0x33]   ;;  %v2921_v15 = vld [vmem:[#allocation7 + $0x58] sm:$0xff]   ;;  %v2922_v17 = vld [vmem:[#allocation7 + $0x50] sm:$0xff]   ;;  %2689 = vmatprep.mubr.msk.bf16.mxu1 %vm3413_vm2, %v3412_v9 }
  0x68   :  { %v2963_v12 = vld [vmem:[#allocation8 + $0x38] sm:$0xff]   ;;  %v449_v13 = vsel %vm447_vm1, %v2920_v11, 0  ;;  %v2966_v18 = vld [vmem:[#allocation8 + $0x20] sm:$0xff]   ;;  %v2925_v22 = vld [vmem:[#allocation2] ss:$8 sps:$4 sm:$0xff]  }
  0x69   :  { %454 = vmatpush1.bf16.msra.mxu0 %v2913_v2  ;;  %2674 = vmatpush3.bf16.msra.mxu1 %v2963_v12  ;;  %v2923_v19 = vld [vmem:[#allocation7 + $0x48] sm:$0xff]   ;;  %v2967_v20 = vld [vmem:[#allocation8 + $0x18] sm:$0xff]   ;;  %v2933_v26 = vld [vmem:[#allocation2 + $0x20] ss:$8 sps:$4 sm:$0xff]  }
  0x6a   :  { %455 = vmatprep.subr.bf16.mxu0 %v3411_v0  ;;  %2675 = vmatprep.subr.bf16.mxu1 %v3412_v9  ;;  %v2924_v21 = vld [vmem:[#allocation7 + $0x40] sm:$0xff]   ;;  %v2931_v25 = vld [vmem:[#allocation2 + $0x24] ss:$8 sps:$4 sm:$0xff]   ;;  %v2939_v30 = vld [vmem:[#allocation2 + $0x40] ss:$8 sps:$4 sm:$0xff]  }
  0x6b   :  { %v2928_v23 = vld [vmem:[#allocation2 + $0x14] ss:$8 sps:$4 sm:$0xff]   ;;  %v2930_v24 = vld [vmem:[#allocation2 + $0x10] ss:$8 sps:$4 sm:$0xff]   ;;  %v2937_v29 = vld [vmem:[#allocation2 + $0x44] ss:$8 sps:$4 sm:$0xff]  }
  0x6c   :  { %v2934_v27 = vld [vmem:[#allocation2 + $0x34] ss:$8 sps:$4 sm:$0xff]   ;;  %v2936_v28 = vld [vmem:[#allocation2 + $0x30] ss:$8 sps:$4 sm:$0xff]   ;;  %v2943_v33 = vld [vmem:[#allocation2 + $0x64] ss:$8 sps:$4 sm:$0xff]  }
  0x6d   :  { %456 = vmatpush1.bf16.msra.mxu0 %v2914_v3  ;;  %2676 = vmatpush3.bf16.msra.mxu1 %v2964_v14  ;;  %v2940_v31 = vld [vmem:[#allocation2 + $0x54] ss:$8 sps:$4 sm:$0xff]   ;;  %v2942_v32 = vld [vmem:[#allocation2 + $0x50] ss:$8 sps:$4 sm:$0xff]   ;;  %v2945_v34 = vld [vmem:[#allocation2 + $0x60] ss:$8 sps:$4 sm:$0xff]  }
  0x6e   :  { %457 = vmatprep.subr.bf16.mxu0 %v3411_v0  ;;  %2677 = vmatprep.subr.bf16.mxu1 %v3412_v9  ;;  %v2946_v35 = vld [vmem:[#allocation2 + $0x74] ss:$8 sps:$4 sm:$0xff]   ;;  %v2948_v36 = vld [vmem:[#allocation2 + $0x70] ss:$8 sps:$4 sm:$0xff]   ;;  %v2949_v37 = vld [vmem:[#allocation2 + $0x84] ss:$8 sps:$4 sm:$0xff]  }
  0x6f   :  { %v2951_v38 = vld [vmem:[#allocation2 + $0x80] ss:$8 sps:$4 sm:$0xff]   ;;  %v2952_v39 = vld [vmem:[#allocation2 + $0x94] ss:$8 sps:$4 sm:$0xff]   ;;  %v2954_v41 = vld [vmem:[#allocation2 + $0x90] ss:$8 sps:$4 sm:$0xff]  }
  0x70   :  { %v2968_v40 = vld [vmem:[#allocation8 + $0x10] sm:$0xff]   ;;  %v2969_v42 = vld [vmem:[#allocation8 + $0x8] sm:$0xff]   ;;  %v2970_v44 = vld [vmem:[#allocation8] sm:$0xff]  }
  0x71   :  { %458 = vmatpush1.bf16.msra.mxu0 %v2915_v4  ;;  %2678 = vmatpush3.bf16.msra.mxu1 %v2965_v16  ;;  %v2955_v43 = vld [vmem:[#allocation2 + $0xa4] ss:$8 sps:$4 sm:$0xff]   ;;  %v2957_v45 = vld [vmem:[#allocation2 + $0xa0] ss:$8 sps:$4 sm:$0xff]   ;;  %v2958_v46 = vld [vmem:[#allocation2 + $0xb4] ss:$8 sps:$4 sm:$0xff]  }
  0x72   :  { %459 = vmatprep.subr.bf16.mxu0 %v3411_v0  ;;  %2679 = vmatprep.subr.bf16.mxu1 %v3412_v9  ;;  %v185_v47 = vld [vmem:[#allocation2 + $0xc0] sm:$0xff]  ;;  %v2960_v48 = vld [vmem:[#allocation2 + $0xb0] ss:$8 sps:$4 sm:$0xff]   ;;  %v2974_v11 = vld [vmem:[#allocation10 + $0x60] ss:$8 sps:$4 sm:$0xff]  }
  0x73   :  { %v2524_v49 = vcombine.high %v185_v47, %v185_v47  ;;  %v2523_v50 = vcombine.low %v185_v47, %v185_v47  ;;  %v2973_v51 = vld [vmem:[#allocation10 + $0x74] ss:$8 sps:$4 sm:$0xff]   ;;  %v3588_v52 = vld [vmem:[%s4089_s3] ss:$0 sm:$0xff]  ;;  %v2971_v3 = vld [vmem:[#allocation10 + $0x70] ss:$8 sps:$4 sm:$0xff]  }
  0x74   :  { %v2976_v5 = vld [vmem:[#allocation10 + $0x64] ss:$8 sps:$4 sm:$0xff]  }
  0x75   :  { %460 = vmatpush1.bf16.msra.mxu0 %v2916_v6  ;;  %2680 = vmatpush3.bf16.msra.mxu1 %v2966_v18 }
  0x76   :  { %461 = vmatprep.subr.bf16.mxu0 %v3411_v0  ;;  %2681 = vmatprep.subr.bf16.mxu1 %v3412_v9 }
  0x79   :  { %462 = vmatpush1.bf16.msra.mxu0 %v2917_v7  ;;  %2682 = vmatpush3.bf16.msra.mxu1 %v2967_v20 }
  0x7a   :  { %463 = vmatprep.subr.bf16.mxu0 %v3411_v0  ;;  %2683 = vmatprep.subr.bf16.mxu1 %v3412_v9 }
  0x7d   :  { %464 = vmatpush1.bf16.msra.mxu0 %v2918_v8  ;;  %2684 = vmatpush3.bf16.msra.mxu1 %v2968_v40 }
  0x7e   :  { %465 = vmatprep.subr.bf16.mxu0 %v3411_v0  ;;  %2685 = vmatprep.subr.bf16.mxu1 %v3412_v9 }
  0x81   :  { %466 = vmatpush1.bf16.msra.mxu0 %v2919_v10  ;;  %2686 = vmatpush3.bf16.msra.mxu1 %v2969_v42 }
  0x82   :  { %473 = vmatprep.subr.bf16.mxu0 %v3411_v0  ;;  %2687 = vmatprep.subr.bf16.mxu1 %v3412_v9 }
  0x85   :  { %474 = vmatpush2.bf16.msra.mxu0 %v449_v13  ;;  %2688 = vmatpush3.bf16.msra.mxu1 %v2970_v44  ;;  %v2979_v13 = vld [vmem:[#allocation10 + $0x54] ss:$8 sps:$4 sm:$0xff]  }
  0x86   :  { %475 = vmatprep.subr.bf16.mxu0 %v3411_v0  ;;  %1028 = vmatprep.subr.bf16.mxu1 %v2973_v51  ;;  %v2994_v51 = vld [vmem:[#allocation10 + $0x4] ss:$8 sps:$4 sm:$0xff]  }
  0x89   :  { %476 = vmatpush2.bf16.msra.mxu0 %v2921_v15 }
  0x8a   :  { %477 = vmatprep.subr.bf16.mxu0 %v3411_v0 }
  0x8d   :  { %478 = vmatpush2.bf16.msra.mxu0 %v2922_v17 }
  0x8e   :  { %479 = vmatprep.subr.bf16.mxu0 %v3411_v0 }
  0x91   :  { %480 = vmatpush2.bf16.msra.mxu0 %v2923_v19  ;;  %v2977_v19 = vld [vmem:[#allocation10 + $0x50] ss:$8 sps:$4 sm:$0xff]  }
  0x92   :  { %481 = vmatprep.subr.bf16.mxu0 %v3411_v0 }
  0x95   :  { %482 = vmatpush2.bf16.msra.mxu0 %v2924_v21  ;;  %v2982_v21 = vld [vmem:[#allocation10 + $0x44] ss:$8 sps:$4 sm:$0xff]  }
  0x96   :  { %2741 = vmatprep.subr.bf16.mxu0 %v3412_v9 }
  0x98   :  { %484 = vmatmul.mubr.bf16.vlgmr.msra.gmra.mxu0 %v2925_v22 }
  0x99   :  { %2539 = vmatprep.mubr.msk.bf16.mxu0 %vm407_vm0, %v2928_v23 }
  0xa0   :  { %492 = vmatmul.mubr.bf16.gmra.mxu0 %v2930_v24 }
  0xa1   :  { %2540 = vmatprep.mubr.msk.bf16.mxu0 %vm407_vm0, %v2931_v25 }
  0xa8   :  { %500 = vmatmul.mubr.bf16.gmra.mxu0 %v2933_v26  ;;  %v2980_v26 = vld [vmem:[#allocation10 + $0x40] ss:$8 sps:$4 sm:$0xff]  }
  0xa9   :  { %2541 = vmatprep.mubr.msk.bf16.mxu0 %vm407_vm0, %v2934_v27 }
  0xb0   :  { %508 = vmatmul.mubr.bf16.gmra.mxu0 %v2936_v28  ;;  %v2985_v28 = vld [vmem:[#allocation10 + $0x34] ss:$8 sps:$4 sm:$0xff]  }
  0xb1   :  { %2542 = vmatprep.mubr.msk.bf16.mxu0 %vm407_vm0, %v2937_v29 }
  0xb8   :  { %516 = vmatmul.mubr.bf16.gmra.mxu0 %v2939_v30 }
  0xb9   :  { %2543 = vmatprep.mubr.msk.bf16.mxu0 %vm407_vm0, %v2940_v31 }
  0xc0   :  { %524 = vmatmul.mubr.bf16.gmra.mxu0 %v2942_v32 }
  0xc1   :  { %2544 = vmatprep.mubr.msk.bf16.mxu0 %vm407_vm0, %v2943_v33 }
  0xc8   :  { %532 = vmatmul.mubr.bf16.gmra.mxu0 %v2945_v34  ;;  %v2983_v34 = vld [vmem:[#allocation10 + $0x30] ss:$8 sps:$4 sm:$0xff]  }
  0xc9   :  { %2545 = vmatprep.mubr.msk.bf16.mxu0 %vm407_vm0, %v2946_v35 }
  0xd0   :  { %540 = vmatmul.mubr.bf16.gmra.mxu0 %v2948_v36  ;;  %v2988_v36 = vld [vmem:[#allocation10 + $0x24] ss:$8 sps:$4 sm:$0xff]  }
  0xd1   :  { %2546 = vmatprep.mubr.msk.bf16.mxu0 %vm407_vm0, %v2949_v37 }
  0xd8   :  { %548 = vmatmul.mubr.bf16.gmra.mxu0 %v2951_v38 }
  0xd9   :  { %2547 = vmatprep.mubr.msk.bf16.mxu0 %vm407_vm0, %v2952_v39 }
  0xe0   :  { %556 = vmatmul.mubr.bf16.gmra.mxu0 %v2954_v41  ;;  %v2986_v41 = vld [vmem:[#allocation10 + $0x20] ss:$8 sps:$4 sm:$0xff]  }
  0xe1   :  { %2548 = vmatprep.mubr.msk.bf16.mxu0 %vm407_vm0, %v2955_v43  ;;  %v2991_v43 = vld [vmem:[#allocation10 + $0x14] ss:$8 sps:$4 sm:$0xff]  }
  0xe8   :  { %564 = vmatmul.mubr.bf16.gmra.mxu0 %v2957_v45 }
  0xe9   :  { %2549 = vmatprep.mubr.msk.bf16.mxu0 %vm407_vm0, %v2958_v46 }
  0xf0   :  { %572 = vmatmul.mubr.bf16.gmra.mxu0 %v2960_v48 }
  0xf1   :  { %2550 = vmatprep.mubr.msk.bf16.mxu0 %vm407_vm0, %v2524_v49  ;;  %v2989_v49 = vld [vmem:[#allocation10 + $0x10] ss:$8 sps:$4 sm:$0xff]  }
  0xf8   :  { %580 = vmatmul.mubr.bf16.gmra.mxu0 %v2523_v50 }
  0xf9   :  { %2757 = vmatprep.mubr.msk.bf16.mxu0 %vm3413_vm2, %v3412_v9 }
 0x158   :  { %v485_v53 = vpop.f32.mrf.mxu0 }
 0x159   :  { %v486_v54 = vadd.f32 %v3588_v52, %v485_v53 }
 0x15a   :  { %v487_v55 = vpop.f32.mrf.mxu0 }
 0x15b   :  { %v587_v57 = vmul.f32 0.2, %v486_v54 }
 0x15c   :  { %v488_v56 = vpop.f32.mrf.mxu0 }
 0x15d   :  { %v489_v58 = vadd.f32 %v3588_v52, %v488_v56  ;;  %v612_v62 = vmax.f32 %v486_v54, %v587_v57  ;;  %v2992_v57 = vld [vmem:[#allocation10] ss:$8 sps:$4 sm:$0xff]  }
 0x15e   :  { %v490_v59 = vpop.f32.mrf.mxu0 }
 0x15f   :  { %v588_v60 = vmul.f32 0.2, %v489_v58 }
 0x160   :  { %v493_v61 = vpop.f32.mrf.mxu0 }
 0x161   :  { %v613_v63 = vmax.f32 %v489_v58, %v588_v60  ;;  %v494_v1 = vadd.f32 %v3588_v52, %v493_v61 }
 0x162   :  { %v495_v2 = vpop.f32.mrf.mxu0 }
 0x163   :  { %v637_v4 = vpack.c.bf16 %v613_v63, %v612_v62  ;;  %v589_v7 = vmul.f32 0.2, %v494_v1 }
 0x164   :  { %v496_v6 = vpop.f32.mrf.mxu0 }
 0x165   :  { %v497_v8 = vadd.f32 %v3588_v52, %v496_v6  ;;  %2690 = vmatmul.mubr.bf16.vlgmr.msra.gmra.mxu1 %v637_v4  ;;  %v614_v15 = vmax.f32 %v494_v1, %v589_v7 }
 0x166   :  { %v498_v10 = vpop.f32.mrf.mxu0  ;;  %2693 = vmatprep.mubr.msk.bf16.mxu1 %vm3413_vm2, %v3412_v9  ;;  %1029 = vmatpush1.bf16.msra.mxu1 %v2971_v3 }
 0x167   :  { %v590_v12 = vmul.f32 0.2, %v497_v8  ;;  %1030 = vmatprep.subr.bf16.mxu1 %v2976_v5 }
 0x168   :  { %v501_v14 = vpop.f32.mrf.mxu0 }
 0x169   :  { %v615_v16 = vmax.f32 %v497_v8, %v590_v12  ;;  %v502_v17 = vadd.f32 %v3588_v52, %v501_v14 }
 0x16a   :  { %v503_v18 = vpop.f32.mrf.mxu0  ;;  %1031 = vmatpush1.bf16.msra.mxu1 %v2974_v11 }
 0x16b   :  { %v638_v20 = vpack.c.bf16 %v615_v16, %v614_v15  ;;  %1032 = vmatprep.subr.bf16.mxu1 %v2979_v13  ;;  %v591_v23 = vmul.f32 0.2, %v502_v17 }
 0x16c   :  { %v504_v22 = vpop.f32.mrf.mxu0 }
 0x16d   :  { %v505_v24 = vadd.f32 %v3588_v52, %v504_v22  ;;  %2694 = vmatmul.mubr.bf16.gmra.mxu1 %v638_v20  ;;  %v616_v30 = vmax.f32 %v502_v17, %v591_v23 }
 0x16e   :  { %v506_v25 = vpop.f32.mrf.mxu0  ;;  %2697 = vmatprep.mubr.msk.bf16.mxu1 %vm3413_vm2, %v3412_v9  ;;  %1033 = vmatpush1.bf16.msra.mxu1 %v2977_v19 }
 0x16f   :  { %v592_v27 = vmul.f32 0.2, %v505_v24  ;;  %1034 = vmatprep.subr.bf16.mxu1 %v2982_v21 }
 0x170   :  { %v509_v29 = vpop.f32.mrf.mxu0 }
 0x171   :  { %v617_v31 = vmax.f32 %v505_v24, %v592_v27  ;;  %v510_v32 = vadd.f32 %v3588_v52, %v509_v29 }
 0x172   :  { %v511_v33 = vpop.f32.mrf.mxu0  ;;  %1035 = vmatpush1.bf16.msra.mxu1 %v2980_v26 }
 0x173   :  { %v639_v35 = vpack.c.bf16 %v617_v31, %v616_v30  ;;  %1036 = vmatprep.subr.bf16.mxu1 %v2985_v28  ;;  %v593_v38 = vmul.f32 0.2, %v510_v32 }
 0x174   :  { %v512_v37 = vpop.f32.mrf.mxu0 }
 0x175   :  { %v513_v39 = vadd.f32 %v3588_v52, %v512_v37  ;;  %2698 = vmatmul.mubr.bf16.gmra.mxu1 %v639_v35  ;;  %v618_v45 = vmax.f32 %v510_v32, %v593_v38 }
 0x176   :  { %v514_v40 = vpop.f32.mrf.mxu0  ;;  %2701 = vmatprep.mubr.msk.bf16.mxu1 %vm3413_vm2, %v3412_v9  ;;  %1037 = vmatpush1.bf16.msra.mxu1 %v2983_v34 }
 0x177   :  { %v594_v42 = vmul.f32 0.2, %v513_v39  ;;  %1038 = vmatprep.subr.bf16.mxu1 %v2988_v36 }
 0x178   :  { %v517_v44 = vpop.f32.mrf.mxu0 }
 0x179   :  { %v619_v46 = vmax.f32 %v513_v39, %v594_v42  ;;  %v518_v47 = vadd.f32 %v3588_v52, %v517_v44 }
 0x17a   :  { %v519_v48 = vpop.f32.mrf.mxu0  ;;  %1039 = vmatpush1.bf16.msra.mxu1 %v2986_v41 }
 0x17b   :  { %v640_v50 = vpack.c.bf16 %v619_v46, %v618_v45  ;;  %1040 = vmatprep.subr.bf16.mxu1 %v2991_v43  ;;  %v595_v54 = vmul.f32 0.2, %v518_v47 }
 0x17c   :  { %v520_v53 = vpop.f32.mrf.mxu0 }
 0x17d   :  { %v521_v55 = vadd.f32 %v3588_v52, %v520_v53  ;;  %2702 = vmatmul.mubr.bf16.gmra.mxu1 %v640_v50  ;;  %v620_v60 = vmax.f32 %v518_v47, %v595_v54 }
 0x17e   :  { %v522_v56 = vpop.f32.mrf.mxu0  ;;  %2705 = vmatprep.mubr.msk.bf16.mxu1 %vm3413_vm2, %v3412_v9  ;;  %1041 = vmatpush1.bf16.msra.mxu1 %v2989_v49 }
 0x17f   :  { %v596_v58 = vmul.f32 0.2, %v521_v55  ;;  %1042 = vmatprep.subr.bf16.mxu1 %v2994_v51 }
 0x180   :  { %v525_v59 = vpop.f32.mrf.mxu0 }
 0x181   :  { %v621_v61 = vmax.f32 %v521_v55, %v596_v58  ;;  %v526_v62 = vadd.f32 %v3588_v52, %v525_v59 }
 0x182   :  { %v527_v63 = vpop.f32.mrf.mxu0  ;;  %1043 = vmatpush1.bf16.msra.mxu1 %v2992_v57 }
 0x183   :  { %v641_v1 = vpack.c.bf16 %v621_v61, %v620_v60  ;;  %2809 = vmatprep.subr.bf16.mxu1 %v3412_v9  ;;  %v597_v3 = vmul.f32 0.2, %v526_v62 }
 0x184   :  { %v528_v2 = vpop.f32.mrf.mxu0 }
 0x185   :  { %v529_v4 = vadd.f32 %v3588_v52, %v528_v2  ;;  %2706 = vmatmul.mubr.bf16.gmra.mxu1 %v641_v1  ;;  %v622_v8 = vmax.f32 %v526_v62, %v597_v3 }
 0x186   :  { %v530_v5 = vpop.f32.mrf.mxu0  ;;  %2709 = vmatprep.mubr.msk.bf16.mxu1 %vm3413_vm2, %v3412_v9 }
 0x187   :  { %v598_v6 = vmul.f32 0.2, %v529_v4 }
 0x188   :  { %v533_v7 = vpop.f32.mrf.mxu0 }
 0x189   :  { %v623_v10 = vmax.f32 %v529_v4, %v598_v6  ;;  %v534_v11 = vadd.f32 %v3588_v52, %v533_v7 }
 0x18a   :  { %v535_v12 = vpop.f32.mrf.mxu0 }
 0x18b   :  { %v642_v13 = vpack.c.bf16 %v623_v10, %v622_v8  ;;  %v599_v15 = vmul.f32 0.2, %v534_v11 }
 0x18c   :  { %v536_v14 = vpop.f32.mrf.mxu0 }
 0x18d   :  { %v537_v16 = vadd.f32 %v3588_v52, %v536_v14  ;;  %2710 = vmatmul.mubr.bf16.gmra.mxu1 %v642_v13  ;;  %v624_v20 = vmax.f32 %v534_v11, %v599_v15 }
 0x18e   :  { %v538_v17 = vpop.f32.mrf.mxu0  ;;  %2713 = vmatprep.mubr.msk.bf16.mxu1 %vm3413_vm2, %v3412_v9 }
 0x18f   :  { %v600_v18 = vmul.f32 0.2, %v537_v16 }
 0x190   :  { %v541_v19 = vpop.f32.mrf.mxu0 }
 0x191   :  { %v625_v21 = vmax.f32 %v537_v16, %v600_v18  ;;  %v542_v22 = vadd.f32 %v3588_v52, %v541_v19 }
 0x192   :  { %v543_v23 = vpop.f32.mrf.mxu0 }
 0x193   :  { %v643_v24 = vpack.c.bf16 %v625_v21, %v624_v20  ;;  %v601_v26 = vmul.f32 0.2, %v542_v22 }
 0x194   :  { %v544_v25 = vpop.f32.mrf.mxu0 }
 0x195   :  { %v545_v27 = vadd.f32 %v3588_v52, %v544_v25  ;;  %2714 = vmatmul.mubr.bf16.gmra.mxu1 %v643_v24  ;;  %v626_v31 = vmax.f32 %v542_v22, %v601_v26  ;;  %v2995_v24 = vld [vmem:[#allocation11 + $0x38] sm:$0xff]   ;;  %v2996_v25 = vld [vmem:[#allocation11 + $0x30] sm:$0xff]   ;;  %v2998_v26 = vld [vmem:[#allocation11 + $0x20] sm:$0xff]  }
 0x196   :  { %v546_v28 = vpop.f32.mrf.mxu0  ;;  %2717 = vmatprep.mubr.msk.bf16.mxu1 %vm3413_vm2, %v3412_v9  ;;  %2742 = vmatpush3.bf16.msra.mxu0 %v2995_v24 }
 0x197   :  { %v602_v29 = vmul.f32 0.2, %v545_v27  ;;  %2743 = vmatprep.subr.bf16.mxu0 %v3412_v9  ;;  %v3648_v28 = vld [vmem:[%s4091_s5] ss:$0 sm:$0xff] }
 0x198   :  { %v549_v30 = vpop.f32.mrf.mxu0 }
 0x199   :  { %v627_v32 = vmax.f32 %v545_v27, %v602_v29  ;;  %v550_v33 = vadd.f32 %v3588_v52, %v549_v30  ;;  %v2999_v27 = vld [vmem:[#allocation11 + $0x18] sm:$0xff]   ;;  %v3000_v29 = vld [vmem:[#allocation11 + $0x10] sm:$0xff]  }
 0x19a   :  { %v551_v34 = vpop.f32.mrf.mxu0  ;;  %2744 = vmatpush3.bf16.msra.mxu0 %v2996_v25 }
 0x19b   :  { %v644_v35 = vpack.c.bf16 %v627_v32, %v626_v31  ;;  %v603_v37 = vmul.f32 0.2, %v550_v33  ;;  %2745 = vmatprep.subr.bf16.mxu0 %v3412_v9 }
 0x19c   :  { %v552_v36 = vpop.f32.mrf.mxu0 }
 0x19d   :  { %v553_v38 = vadd.f32 %v3588_v52, %v552_v36  ;;  %2718 = vmatmul.mubr.bf16.gmra.mxu1 %v644_v35  ;;  %v628_v42 = vmax.f32 %v550_v33, %v603_v37 }
 0x19e   :  { %v554_v39 = vpop.f32.mrf.mxu0  ;;  %2721 = vmatprep.mubr.msk.bf16.mxu1 %vm3413_vm2, %v3412_v9 }
 0x19f   :  { %v604_v40 = vmul.f32 0.2, %v553_v38 }
 0x1a0   :  { %v557_v41 = vpop.f32.mrf.mxu0 }
 0x1a1   :  { %v629_v43 = vmax.f32 %v553_v38, %v604_v40  ;;  %v558_v44 = vadd.f32 %v3588_v52, %v557_v41 }
 0x1a2   :  { %v559_v45 = vpop.f32.mrf.mxu0 }
 0x1a3   :  { %v645_v46 = vpack.c.bf16 %v629_v43, %v628_v42  ;;  %v605_v48 = vmul.f32 0.2, %v558_v44 }
 0x1a4   :  { %v560_v47 = vpop.f32.mrf.mxu0 }
 0x1a5   :  { %v561_v49 = vadd.f32 %v3588_v52, %v560_v47  ;;  %2722 = vmatmul.mubr.bf16.gmra.mxu1 %v645_v46  ;;  %v630_v54 = vmax.f32 %v558_v44, %v605_v48 }
 0x1a6   :  { %v562_v50 = vpop.f32.mrf.mxu0  ;;  %2725 = vmatprep.mubr.msk.bf16.mxu1 %vm3413_vm2, %v3412_v9 }
 0x1a7   :  { %v606_v51 = vmul.f32 0.2, %v561_v49 }
 0x1a8   :  { %v565_v53 = vpop.f32.mrf.mxu0 }
 0x1a9   :  { %v631_v55 = vmax.f32 %v561_v49, %v606_v51  ;;  %v566_v56 = vadd.f32 %v3588_v52, %v565_v53 }
 0x1aa   :  { %v567_v57 = vpop.f32.mrf.mxu0 }
 0x1ab   :  { %v646_v58 = vpack.c.bf16 %v631_v55, %v630_v54  ;;  %v607_v60 = vmul.f32 0.2, %v566_v56 }
 0x1ac   :  { %v568_v59 = vpop.f32.mrf.mxu0 }
 0x1ad   :  { %v569_v61 = vadd.f32 %v3588_v52, %v568_v59  ;;  %2726 = vmatmul.mubr.bf16.gmra.mxu1 %v646_v58  ;;  %v632_v2 = vmax.f32 %v566_v56, %v607_v60 }
 0x1ae   :  { %v570_v62 = vpop.f32.mrf.mxu0  ;;  %2729 = vmatprep.mubr.msk.bf16.mxu1 %vm3413_vm2, %v3412_v9 }
 0x1af   :  { %v608_v63 = vmul.f32 0.2, %v569_v61 }
 0x1b0   :  { %v573_v1 = vpop.f32.mrf.mxu0 }
 0x1b1   :  { %v633_v3 = vmax.f32 %v569_v61, %v608_v63  ;;  %v574_v4 = vadd.f32 %v3588_v52, %v573_v1 }
 0x1b2   :  { %v575_v5 = vpop.f32.mrf.mxu0 }
 0x1b3   :  { %v647_v6 = vpack.c.bf16 %v633_v3, %v632_v2  ;;  %v609_v8 = vmul.f32 0.2, %v574_v4 }
 0x1b4   :  { %v576_v7 = vpop.f32.mrf.mxu0 }
 0x1b5   :  { %v577_v10 = vadd.f32 %v3588_v52, %v576_v7  ;;  %2730 = vmatmul.mubr.bf16.gmra.mxu1 %v647_v6  ;;  %v634_v14 = vmax.f32 %v574_v4, %v609_v8 }
 0x1b6   :  { %v578_v11 = vpop.f32.mrf.mxu0  ;;  %2733 = vmatprep.mubr.msk.bf16.mxu1 %vm3413_vm2, %v3412_v9 }
 0x1b7   :  { %v610_v12 = vmul.f32 0.2, %v577_v10 }
 0x1b8   :  { %v581_v13 = vpop.f32.mrf.mxu0 }
 0x1b9   :  { %v635_v15 = vmax.f32 %v577_v10, %v610_v12  ;;  %v582_v16 = vadd.f32 %v3588_v52, %v581_v13  ;;  %v2997_v52 = vld [vmem:[#allocation11 + $0x28] sm:$0xff]  }
 0x1ba   :  { %v583_v17 = vpop.f32.mrf.mxu0  ;;  %2746 = vmatpush3.bf16.msra.mxu0 %v2997_v52 }
 0x1bb   :  { %v648_v18 = vpack.c.bf16 %v635_v15, %v634_v14  ;;  %v611_v19 = vmul.f32 0.2, %v582_v16  ;;  %2747 = vmatprep.subr.bf16.mxu0 %v3412_v9 }
 0x1bc   :  { %v584_v20 = vpop.f32.mrf.mxu0 }
 0x1bd   :  { %2734 = vmatmul.mubr.bf16.gmra.mxu1 %v648_v18  ;;  %v636_v21 = vmax.f32 %v582_v16, %v611_v19 }
 0x1be   :  { %v585_v22 = vpop.f32.mrf.mxu0  ;;  %2737 = vmatprep.mubr.msk.bf16.mxu1 %vm3413_vm2, %v3412_v9  ;;  %2748 = vmatpush3.bf16.msra.mxu0 %v2998_v26 }
 0x1bf   :  { %v649_v23 = vpack.c.bf16 %v636_v21, %v636_v21  ;;  %2749 = vmatprep.subr.bf16.mxu0 %v3412_v9 }
 0x1c2   :  { %2750 = vmatpush3.bf16.msra.mxu0 %v2999_v27 }
 0x1c3   :  { %2751 = vmatprep.subr.bf16.mxu0 %v3412_v9 }
 0x1c5   :  { %2738 = vmatmul.mubr.bf16.gmra.mxu1 %v649_v23 }
 0x1c6   :  { %1060 = vmatprep.mubr.bf16.mxu1 %v3411_v0  ;;  %2752 = vmatpush3.bf16.msra.mxu0 %v3000_v29 }
 0x1c7   :  { %2753 = vmatprep.subr.bf16.mxu0 %v3412_v9 }
 0x225   :  { %v755_v30 = vpop.f32.mrf.mxu1 }
 0x226   :  { %v756_v31 = vadd.f32 %v3648_v28, %v755_v30 }
 0x227   :  { %v2691_v32 = vpop.f32.mrf.mxu1 }
 0x228   :  { %v857_v34 = vmul.f32 0.2, %v756_v31 }
 0x229   :  { %v758_v33 = vpop.f32.mrf.mxu1 }
 0x22a   :  { %v759_v35 = vadd.f32 %v3648_v28, %v758_v33  ;;  %v882_v39 = vmax.f32 %v756_v31, %v857_v34 }
 0x22b   :  { %v2692_v36 = vpop.f32.mrf.mxu1 }
 0x22c   :  { %v858_v37 = vmul.f32 0.2, %v759_v35 }
 0x22d   :  { %v763_v38 = vpop.f32.mrf.mxu1 }
 0x22e   :  { %v883_v40 = vmax.f32 %v759_v35, %v858_v37  ;;  %v764_v41 = vadd.f32 %v3648_v28, %v763_v38 }
 0x22f   :  { %v2695_v42 = vpop.f32.mrf.mxu1 }
 0x230   :  { %v907_v43 = vpack.c.bf16 %v883_v40, %v882_v39  ;;  %v859_v45 = vmul.f32 0.2, %v764_v41 }
 0x231   :  { %v766_v44 = vpop.f32.mrf.mxu1 }
 0x232   :  { %v767_v46 = vadd.f32 %v3648_v28, %v766_v44  ;;  %1061 = vmatmul.mubr.bf16.vlgmr.msra.gmra.mxu1 %v907_v43  ;;  %v884_v50 = vmax.f32 %v764_v41, %v859_v45 }
 0x233   :  { %v2696_v47 = vpop.f32.mrf.mxu1  ;;  %1070 = vmatprep.mubr.bf16.mxu1 %v3411_v0 }
 0x234   :  { %v860_v48 = vmul.f32 0.2, %v767_v46 }
 0x235   :  { %v771_v49 = vpop.f32.mrf.mxu1 }
 0x236   :  { %v885_v51 = vmax.f32 %v767_v46, %v860_v48  ;;  %v772_v53 = vadd.f32 %v3648_v28, %v771_v49 }
 0x237   :  { %v2699_v54 = vpop.f32.mrf.mxu1 }
 0x238   :  { %v908_v55 = vpack.c.bf16 %v885_v51, %v884_v50  ;;  %v861_v57 = vmul.f32 0.2, %v772_v53 }
 0x239   :  { %v774_v56 = vpop.f32.mrf.mxu1 }
 0x23a   :  { %v775_v58 = vadd.f32 %v3648_v28, %v774_v56  ;;  %1071 = vmatmul.mubr.bf16.gmra.mxu1 %v908_v55  ;;  %v886_v62 = vmax.f32 %v772_v53, %v861_v57 }
 0x23b   :  { %v2700_v59 = vpop.f32.mrf.mxu1  ;;  %1080 = vmatprep.mubr.bf16.mxu1 %v3411_v0 }
 0x23c   :  { %v862_v60 = vmul.f32 0.2, %v775_v58 }
 0x23d   :  { %v779_v61 = vpop.f32.mrf.mxu1 }
 0x23e   :  { %v887_v63 = vmax.f32 %v775_v58, %v862_v60  ;;  %v780_v1 = vadd.f32 %v3648_v28, %v779_v61 }
 0x23f   :  { %v2703_v2 = vpop.f32.mrf.mxu1 }
 0x240   :  { %v909_v3 = vpack.c.bf16 %v887_v63, %v886_v62  ;;  %v863_v5 = vmul.f32 0.2, %v780_v1 }
 0x241   :  { %v782_v4 = vpop.f32.mrf.mxu1 }
 0x242   :  { %v783_v6 = vadd.f32 %v3648_v28, %v782_v4  ;;  %1081 = vmatmul.mubr.bf16.gmra.mxu1 %v909_v3  ;;  %v888_v11 = vmax.f32 %v780_v1, %v863_v5 }
 0x243   :  { %v2704_v7 = vpop.f32.mrf.mxu1  ;;  %1090 = vmatprep.mubr.bf16.mxu1 %v3411_v0 }
 0x244   :  { %v864_v8 = vmul.f32 0.2, %v783_v6 }
 0x245   :  { %v787_v10 = vpop.f32.mrf.mxu1 }
 0x246   :  { %v889_v12 = vmax.f32 %v783_v6, %v864_v8  ;;  %v788_v13 = vadd.f32 %v3648_v28, %v787_v10 }
 0x247   :  { %v2707_v14 = vpop.f32.mrf.mxu1 }
 0x248   :  { %v910_v15 = vpack.c.bf16 %v889_v12, %v888_v11  ;;  %v865_v17 = vmul.f32 0.2, %v788_v13 }
 0x249   :  { %v790_v16 = vpop.f32.mrf.mxu1 }
 0x24a   :  { %v791_v18 = vadd.f32 %v3648_v28, %v790_v16  ;;  %1091 = vmatmul.mubr.bf16.gmra.mxu1 %v910_v15  ;;  %v890_v22 = vmax.f32 %v788_v13, %v865_v17 }
 0x24b   :  { %v2708_v19 = vpop.f32.mrf.mxu1  ;;  %1100 = vmatprep.mubr.bf16.mxu1 %v3411_v0 }
 0x24c   :  { %v866_v20 = vmul.f32 0.2, %v791_v18 }
 0x24d   :  { %v795_v21 = vpop.f32.mrf.mxu1 }
 0x24e   :  { %v891_v23 = vmax.f32 %v791_v18, %v866_v20  ;;  %v796_v24 = vadd.f32 %v3648_v28, %v795_v21 }
 0x24f   :  { %v2711_v25 = vpop.f32.mrf.mxu1 }
 0x250   :  { %v911_v52 = vpack.c.bf16 %v891_v23, %v890_v22  ;;  %v867_v27 = vmul.f32 0.2, %v796_v24 }
 0x251   :  { %v798_v26 = vpop.f32.mrf.mxu1 }
 0x252   :  { %v799_v29 = vadd.f32 %v3648_v28, %v798_v26  ;;  %1101 = vmatmul.mubr.bf16.gmra.mxu1 %v911_v52  ;;  %v892_v33 = vmax.f32 %v796_v24, %v867_v27 }
 0x253   :  { %v2712_v30 = vpop.f32.mrf.mxu1  ;;  %1110 = vmatprep.mubr.bf16.mxu1 %v3411_v0 }
 0x254   :  { %v868_v31 = vmul.f32 0.2, %v799_v29 }
 0x255   :  { %v803_v32 = vpop.f32.mrf.mxu1 }
 0x256   :  { %v893_v34 = vmax.f32 %v799_v29, %v868_v31  ;;  %v804_v35 = vadd.f32 %v3648_v28, %v803_v32  ;;  %v3001_v31 = vld [vmem:[#allocation11 + $0x8] sm:$0xff]  }
 0x257   :  { %v2715_v36 = vpop.f32.mrf.mxu1  ;;  %2754 = vmatpush3.bf16.msra.mxu0 %v3001_v31 }
 0x258   :  { %v912_v37 = vpack.c.bf16 %v893_v34, %v892_v33  ;;  %v869_v39 = vmul.f32 0.2, %v804_v35  ;;  %2755 = vmatprep.subr.bf16.mxu0 %v3412_v9 }
 0x259   :  { %v806_v38 = vpop.f32.mrf.mxu1 }
 0x25a   :  { %v807_v40 = vadd.f32 %v3648_v28, %v806_v38  ;;  %1111 = vmatmul.mubr.bf16.gmra.mxu1 %v912_v37  ;;  %v894_v44 = vmax.f32 %v804_v35, %v869_v39 }
 0x25b   :  { %v2716_v41 = vpop.f32.mrf.mxu1  ;;  %1120 = vmatprep.mubr.bf16.mxu1 %v3411_v0 }
 0x25c   :  { %v870_v42 = vmul.f32 0.2, %v807_v40 }
 0x25d   :  { %v811_v43 = vpop.f32.mrf.mxu1 }
 0x25e   :  { %v895_v45 = vmax.f32 %v807_v40, %v870_v42  ;;  %v812_v46 = vadd.f32 %v3648_v28, %v811_v43 }
 0x25f   :  { %v2719_v47 = vpop.f32.mrf.mxu1 }
 0x260   :  { %v913_v48 = vpack.c.bf16 %v895_v45, %v894_v44  ;;  %v871_v50 = vmul.f32 0.2, %v812_v46 }
 0x261   :  { %v814_v49 = vpop.f32.mrf.mxu1 }
 0x262   :  { %v815_v51 = vadd.f32 %v3648_v28, %v814_v49  ;;  %1121 = vmatmul.mubr.bf16.gmra.mxu1 %v913_v48  ;;  %v896_v56 = vmax.f32 %v812_v46, %v871_v50  ;;  %v3002_v48 = vld [vmem:[#allocation11] sm:$0xff]   ;;  %v938_v50 = vlaneseq }
 0x263   :  { %v2720_v53 = vpop.f32.mrf.mxu1  ;;  %1130 = vmatprep.mubr.bf16.mxu1 %v3411_v0  ;;  %2756 = vmatpush3.bf16.msra.mxu0 %v3002_v48 }
 0x264   :  { %v872_v54 = vmul.f32 0.2, %v815_v51  ;;  %v936_v53 = vld [vmem:[%s4093_s7] sm:$0x3] }
 0x265   :  { %v819_v55 = vpop.f32.mrf.mxu1 }
 0x266   :  { %v897_v57 = vmax.f32 %v815_v51, %v872_v54  ;;  %v820_v58 = vadd.f32 %v3648_v28, %v819_v55  ;;  %v3692_v51 = vshrl.u32 %v938_v50, 7 }
 0x267   :  { %v2723_v59 = vpop.f32.mrf.mxu1 }
 0x268   :  { %v914_v60 = vpack.c.bf16 %v897_v57, %v896_v56  ;;  %v873_v62 = vmul.f32 0.2, %v820_v58  ;;  %v944_v54 = vsub.s32 1, %v3692_v51  ;;  %v3003_v59 = vld [vmem:[#allocation13 + $0x38] sm:$0xff]  }
 0x269   :  { %v822_v61 = vpop.f32.mrf.mxu1  ;;  %2810 = vmatpush3.bf16.msra.mxu1 %v3003_v59  ;;  %v1316_v59 = vld [vmem:[#allocation5 + $0x10] sm:$0xff] }
 0x26a   :  { %v823_v63 = vadd.f32 %v3648_v28, %v822_v61  ;;  %1131 = vmatmul.mubr.bf16.gmra.mxu1 %v914_v60  ;;  %v898_v4 = vmax.f32 %v820_v58, %v873_v62  ;;  %v3705_v56 = vrot.slane %v936_v53, %v944_v54  ;;  %v3004_v62 = vld [vmem:[#allocation13 + $0x30] sm:$0xff]   ;;  %2811 = vmatprep.subr.bf16.mxu1 %v3412_v9 }
 0x26b   :  { %v2724_v1 = vpop.f32.mrf.mxu1  ;;  %1140 = vmatprep.mubr.bf16.mxu1 %v3411_v0 }
 0x26c   :  { %v874_v2 = vmul.f32 0.2, %v823_v63 }
 0x26d   :  { %v827_v3 = vpop.f32.mrf.mxu1  ;;  %2812 = vmatpush3.bf16.msra.mxu1 %v3004_v62 }
 0x26e   :  { %v899_v5 = vmax.f32 %v823_v63, %v874_v2  ;;  %v828_v6 = vadd.f32 %v3648_v28, %v827_v3  ;;  %2813 = vmatprep.subr.bf16.mxu1 %v3412_v9 }
 0x26f   :  { %v2727_v7 = vpop.f32.mrf.mxu1 }
 0x270   :  { %v915_v8 = vpack.c.bf16 %v899_v5, %v898_v4  ;;  %v875_v11 = vmul.f32 0.2, %v828_v6 }
 0x271   :  { %v830_v10 = vpop.f32.mrf.mxu1 }
 0x272   :  { %v831_v12 = vadd.f32 %v3648_v28, %v830_v10  ;;  %1141 = vmatmul.mubr.bf16.gmra.mxu1 %v915_v8  ;;  %v900_v16 = vmax.f32 %v828_v6, %v875_v11  ;;  %v3005_v6 = vld [vmem:[#allocation13 + $0x28] sm:$0xff]  }
 0x273   :  { %v2728_v13 = vpop.f32.mrf.mxu1  ;;  %1150 = vmatprep.mubr.bf16.mxu1 %v3411_v0  ;;  %2814 = vmatpush3.bf16.msra.mxu1 %v3005_v6 }
 0x274   :  { %v876_v14 = vmul.f32 0.2, %v831_v12  ;;  %2815 = vmatprep.subr.bf16.mxu1 %v3412_v9 }
 0x275   :  { %v835_v15 = vpop.f32.mrf.mxu1 }
 0x276   :  { %v901_v17 = vmax.f32 %v831_v12, %v876_v14  ;;  %v836_v18 = vadd.f32 %v3648_v28, %v835_v15  ;;  %v3006_v14 = vld [vmem:[#allocation13 + $0x20] sm:$0xff]  }
 0x277   :  { %v2731_v19 = vpop.f32.mrf.mxu1  ;;  %2816 = vmatpush3.bf16.msra.mxu1 %v3006_v14 }
 0x278   :  { %v916_v20 = vpack.c.bf16 %v901_v17, %v900_v16  ;;  %v877_v22 = vmul.f32 0.2, %v836_v18  ;;  %2817 = vmatprep.subr.bf16.mxu1 %v3412_v9 }
 0x279   :  { %v838_v21 = vpop.f32.mrf.mxu1 }
 0x27a   :  { %v839_v23 = vadd.f32 %v3648_v28, %v838_v21  ;;  %1151 = vmatmul.mubr.bf16.gmra.mxu1 %v916_v20  ;;  %v902_v26 = vmax.f32 %v836_v18, %v877_v22  ;;  %v3007_v21 = vld [vmem:[#allocation13 + $0x18] sm:$0xff]  }
 0x27b   :  { %v2732_v24 = vpop.f32.mrf.mxu1  ;;  %1160 = vmatprep.mubr.bf16.mxu1 %v3411_v0  ;;  %2818 = vmatpush3.bf16.msra.mxu1 %v3007_v21 }
 0x27c   :  { %v878_v25 = vmul.f32 0.2, %v839_v23  ;;  %2819 = vmatprep.subr.bf16.mxu1 %v3412_v9 }
 0x27d   :  { %v843_v52 = vpop.f32.mrf.mxu1 }
 0x27e   :  { %v903_v27 = vmax.f32 %v839_v23, %v878_v25  ;;  %v844_v29 = vadd.f32 %v3648_v28, %v843_v52 }
 0x27f   :  { %v2735_v30 = vpop.f32.mrf.mxu1 }
 0x280   :  { %v917_v32 = vpack.c.bf16 %v903_v27, %v902_v26  ;;  %v879_v34 = vmul.f32 0.2, %v844_v29  ;;  %v3008_v27 = vld [vmem:[#allocation13 + $0x10] sm:$0xff]  }
 0x281   :  { %v846_v33 = vpop.f32.mrf.mxu1  ;;  %2820 = vmatpush3.bf16.msra.mxu1 %v3008_v27 }
 0x282   :  { %v847_v35 = vadd.f32 %v3648_v28, %v846_v33  ;;  %1161 = vmatmul.mubr.bf16.gmra.mxu1 %v917_v32  ;;  %v904_v39 = vmax.f32 %v844_v29, %v879_v34  ;;  %v1314_v32 = vld [vmem:[#allocation5] sm:$0xff]  ;;  %2821 = vmatprep.subr.bf16.mxu1 %v3412_v9 }
 0x283   :  { %v2736_v36 = vpop.f32.mrf.mxu1  ;;  %1170 = vmatprep.mubr.bf16.mxu1 %v3411_v0 }
 0x284   :  { %v880_v37 = vmul.f32 0.2, %v847_v35 }
 0x285   :  { %v851_v38 = vpop.f32.mrf.mxu1 }
 0x286   :  { %v905_v40 = vmax.f32 %v847_v35, %v880_v37  ;;  %v852_v41 = vadd.f32 %v3648_v28, %v851_v38  ;;  %v940_v28 = vsub.s32 0, %v3692_v51  ;;  %v3009_v37 = vld [vmem:[#allocation13 + $0x8] sm:$0xff]  }
 0x287   :  { %v2739_v42 = vpop.f32.mrf.mxu1  ;;  %2822 = vmatpush3.bf16.msra.mxu1 %v3009_v37 }
 0x288   :  { %v881_v43 = vmul.f32 0.2, %v852_v41  ;;  %v918_v44 = vpack.c.bf16 %v905_v40, %v904_v39  ;;  %v3701_v55 = vrot.slane %v936_v53, %v940_v28  ;;  %v1315_v39 = vld [vmem:[#allocation5 + $0x8] sm:$0xff]  ;;  %2823 = vmatprep.subr.bf16.mxu1 %v3412_v9 }
 0x289   :  { %v854_v45 = vpop.f32.mrf.mxu1 }
 0x28a   :  { %v906_v46 = vmax.f32 %v852_v41, %v881_v43  ;;  %1171 = vmatmul.mubr.bf16.gmra.mxu1 %v918_v44 }
 0x28b   :  { %v2740_v47 = vpop.f32.mrf.mxu1  ;;  %1180 = vmatprep.mubr.bf16.mxu1 %v3411_v0 }
 0x28c   :  { %v919_v49 = vpack.c.bf16 %v906_v46, %v906_v46 }
 0x292   :  { %1181 = vmatmul.mubr.bf16.gmra.mxu1 %v919_v49 }
 0x293   :  { %2825 = vmatprep.mubr.msk.bf16.mxu1 %vm3413_vm2, %v3412_v9 }
 0x2f2   :  { %v1062_v57 = vpop.f32.mrf.mxu1 }
 0x2f3   :  { %v3708_v58 = vadd.f32 %v1062_v57, %v3701_v55 }
 0x2f4   :  { %v1064_v60 = vpop.f32.mrf.mxu1 }
 0x2f5   :  { %1189 = vst [vmem:[#allocation17] sm:$0xff] %v3708_v58  ;;  %v1065_v61 = vadd.f32 %v1064_v60, %v3705_v56 }
 0x2f6   :  { %v1066_v63 = vpop.f32.mrf.mxu1 }
 0x2f7   :  { %1190 = vst [vmem:[#allocation17 + $0x8] sm:$0xff] %v1065_v61  ;;  %v1239_v1 = vmul.f32 0.5, %v1065_v61  ;;  %v3714_v2 = vadd.f32 %v1066_v63, %v3701_v55 }
 0x2f8   :  { %v1068_v3 = vpop.f32.mrf.mxu1 }
 0x2f9   :  { %v1264_v4 = vmul.f32 1.442695, %v1239_v1  ;;  %1191 = vst [vmem:[#allocation17 + $0x10] sm:$0xff] %v3714_v2  ;;  %v1069_v5 = vadd.f32 %v1068_v3, %v3705_v56  ;;  %v1317_v3 = vld [vmem:[#allocation5 + $0x18] sm:$0xff] }
 0x2fa   :  { %v1072_v7 = vpop.f32.mrf.mxu1 }
 0x2fb   :  { %3035 = vpow2.f32 %v1264_v4  ;;  %1192 = vst [vmem:[#allocation17 + $0x18] sm:$0xff] %v1069_v5  ;;  %v1240_v8 = vmul.f32 0.5, %v1069_v5  ;;  %v3720_v10 = vadd.f32 %v1072_v7, %v3701_v55 }
 0x2fc   :  { %v1074_v11 = vpop.f32.mrf.mxu1 }
 0x2fd   :  { %v1266_v12 = vmul.f32 1.442695, %v1240_v8  ;;  %1193 = vst [vmem:[#allocation17 + $0x20] sm:$0xff] %v3720_v10  ;;  %v1075_v13 = vadd.f32 %v1074_v11, %v3705_v56 }
 0x2fe   :  { %v1076_v15 = vpop.f32.mrf.mxu1 }
 0x2ff   :  { %3037 = vpow2.f32 %v1266_v12  ;;  %1194 = vst [vmem:[#allocation17 + $0x28] sm:$0xff] %v1075_v13  ;;  %v1241_v16 = vmul.f32 0.5, %v1075_v13  ;;  %v3726_v17 = vadd.f32 %v1076_v15, %v3701_v55 }
 0x300   :  { %v1078_v18 = vpop.f32.mrf.mxu1 }
 0x301   :  { %v1268_v19 = vmul.f32 1.442695, %v1241_v16  ;;  %1195 = vst [vmem:[#allocation17 + $0x30] sm:$0xff] %v3726_v17  ;;  %v1079_v20 = vadd.f32 %v1078_v18, %v3705_v56 }
 0x302   :  { %v1082_v22 = vpop.f32.mrf.mxu1 }
 0x303   :  { %3039 = vpow2.f32 %v1268_v19  ;;  %1196 = vst [vmem:[#allocation17 + $0x38] sm:$0xff] %v1079_v20  ;;  %v1242_v23 = vmul.f32 0.5, %v1079_v20  ;;  %v3732_v24 = vadd.f32 %v1082_v22, %v3701_v55  ;;  %v1318_v19 = vld [vmem:[#allocation5 + $0x20] sm:$0xff] }
 0x304   :  { %v1084_v25 = vpop.f32.mrf.mxu1 }
 0x305   :  { %v1270_v52 = vmul.f32 1.442695, %v1242_v23  ;;  %1197 = vst [vmem:[#allocation17 + $0x40] sm:$0xff] %v3732_v24  ;;  %v1085_v26 = vadd.f32 %v1084_v25, %v3705_v56 }
 0x306   :  { %v1086_v29 = vpop.f32.mrf.mxu1 }
 0x307   :  { %3041 = vpow2.f32 %v1270_v52  ;;  %1198 = vst [vmem:[#allocation17 + $0x48] sm:$0xff] %v1085_v26  ;;  %v1243_v30 = vmul.f32 0.5, %v1085_v26  ;;  %v3738_v31 = vadd.f32 %v1086_v29, %v3701_v55  ;;  %v1319_v26 = vld [vmem:[#allocation5 + $0x28] sm:$0xff] }
 0x308   :  { %v3036_v33 = vpop.eup %3035  ;;  %v1088_v34 = vpop.f32.mrf.mxu1 }
 0x309   :  { %v1272_v35 = vmul.f32 1.442695, %v1243_v30  ;;  %1199 = vst [vmem:[#allocation17 + $0x50] sm:$0xff] %v3738_v31  ;;  %v1089_v36 = vadd.f32 %v1088_v34, %v3705_v56  ;;  %v1339_v40 = vmul.f32 %v3036_v33, %v1314_v32 }
 0x30a   :  { %v1092_v38 = vpop.f32.mrf.mxu1 }
 0x30b   :  { %3043 = vpow2.f32 %v1272_v35  ;;  %1200 = vst [vmem:[#allocation17 + $0x58] sm:$0xff] %v1089_v36  ;;  %v1244_v41 = vmul.f32 0.5, %v1089_v36  ;;  %v3744_v42 = vadd.f32 %v1092_v38, %v3701_v55  ;;  %v1364_v49 = vadd.f32 %v1339_v40, %v3708_v58  ;;  %v1320_v40 = vld [vmem:[#allocation5 + $0x30] sm:$0xff] }
 0x30c   :  { %v3038_v43 = vpop.eup %3037  ;;  %v1094_v44 = vpop.f32.mrf.mxu1 }
 0x30d   :  { %v1274_v45 = vmul.f32 1.442695, %v1244_v41  ;;  %1201 = vst [vmem:[#allocation17 + $0x60] sm:$0xff] %v3744_v42  ;;  %v1095_v46 = vadd.f32 %v1094_v44, %v3705_v56  ;;  %v1340_v47 = vmul.f32 %v3038_v43, %v1315_v39 }
 0x30e   :  { %v1096_v48 = vpop.f32.mrf.mxu1 }
 0x30f   :  { %3045 = vpow2.f32 %v1274_v45  ;;  %1202 = vst [vmem:[#allocation17 + $0x68] sm:$0xff] %v1095_v46  ;;  %v1245_v50 = vmul.f32 0.5, %v1095_v46  ;;  %v3751_v53 = vadd.f32 %v1096_v48, %v3701_v55  ;;  %v1365_v57 = vadd.f32 %v1340_v47, %v3714_v2  ;;  %v1321_v48 = vld [vmem:[#allocation5 + $0x38] sm:$0xff] }
 0x310   :  { %v3040_v60 = vpop.eup %3039  ;;  %v1098_v61 = vpop.f32.mrf.mxu1 }
 0x311   :  { %v1276_v62 = vmul.f32 1.442695, %v1245_v50  ;;  %1203 = vst [vmem:[#allocation17 + $0x70] sm:$0xff] %v3751_v53  ;;  %v1099_v63 = vadd.f32 %v1098_v61, %v3705_v56  ;;  %v1389_v1 = vpack.c.bf16 %v1365_v57, %v1364_v49  ;;  %v1341_v4 = vmul.f32 %v3040_v60, %v1316_v59 }
 0x312   :  { %v1102_v58 = vpop.f32.mrf.mxu1 }
 0x313   :  { %3047 = vpow2.f32 %v1276_v62  ;;  %1204 = vst [vmem:[#allocation17 + $0x78] sm:$0xff] %v1099_v63  ;;  %v1246_v5 = vmul.f32 0.5, %v1099_v63  ;;  %v3757_v6 = vadd.f32 %v1102_v58, %v3701_v55  ;;  %2758 = vmatmul.mubr.bf16.vlgmr.msra.gmra.mxu0 %v1389_v1  ;;  %v1366_v14 = vadd.f32 %v1341_v4, %v3720_v10  ;;  %v1322_v4 = vld [vmem:[#allocation5 + $0x40] sm:$0xff] }
 0x314   :  { %v3042_v2 = vpop.eup %3041  ;;  %v1104_v7 = vpop.f32.mrf.mxu1  ;;  %2761 = vmatprep.mubr.msk.bf16.mxu0 %vm3413_vm2, %v3412_v9 }
 0x315   :  { %v1278_v8 = vmul.f32 1.442695, %v1246_v5  ;;  %1205 = vst [vmem:[#allocation17 + $0x80] sm:$0xff] %v3757_v6  ;;  %v1105_v11 = vadd.f32 %v1104_v7, %v3705_v56  ;;  %v1342_v12 = vmul.f32 %v3042_v2, %v1317_v3 }
 0x316   :  { %v1106_v13 = vpop.f32.mrf.mxu1 }
 0x317   :  { %3049 = vpow2.f32 %v1278_v8  ;;  %1206 = vst [vmem:[#allocation17 + $0x88] sm:$0xff] %v1105_v11  ;;  %v1247_v15 = vmul.f32 0.5, %v1105_v11  ;;  %v3765_v16 = vadd.f32 %v1106_v13, %v3701_v55  ;;  %v1367_v18 = vadd.f32 %v1342_v12, %v3726_v17  ;;  %v1323_v13 = vld [vmem:[#allocation5 + $0x48] sm:$0xff] }
 0x318   :  { %v3044_v20 = vpop.eup %3043  ;;  %v1108_v21 = vpop.f32.mrf.mxu1 }
 0x319   :  { %v1280_v22 = vmul.f32 1.442695, %v1247_v15  ;;  %1207 = vst [vmem:[#allocation17 + $0x90] sm:$0xff] %v3765_v16  ;;  %v1109_v23 = vadd.f32 %v1108_v21, %v3705_v56  ;;  %v1390_v25 = vpack.c.bf16 %v1367_v18, %v1366_v14  ;;  %v1343_v10 = vmul.f32 %v3044_v20, %v1318_v19 }
 0x31a   :  { %v1112_v52 = vpop.f32.mrf.mxu1 }
 0x31b   :  { %3051 = vpow2.f32 %v1280_v22  ;;  %1208 = vst [vmem:[#allocation17 + $0x98] sm:$0xff] %v1109_v23  ;;  %v1248_v27 = vmul.f32 0.5, %v1109_v23  ;;  %v3771_v29 = vadd.f32 %v1112_v52, %v3701_v55  ;;  %2762 = vmatmul.mubr.bf16.gmra.mxu0 %v1390_v25  ;;  %v1368_v36 = vadd.f32 %v1343_v10, %v3732_v24  ;;  %v1324_v10 = vld [vmem:[#allocation5 + $0x50] sm:$0xff] }
 0x31c   :  { %v3046_v17 = vpop.eup %3045  ;;  %v1114_v30 = vpop.f32.mrf.mxu1  ;;  %2765 = vmatprep.mubr.msk.bf16.mxu0 %vm3413_vm2, %v3412_v9 }
 0x31d   :  { %v1282_v32 = vmul.f32 1.442695, %v1248_v27  ;;  %1209 = vst [vmem:[#allocation17 + $0xa0] sm:$0xff] %v3771_v29  ;;  %v1115_v33 = vadd.f32 %v1114_v30, %v3705_v56  ;;  %v1344_v34 = vmul.f32 %v3046_v17, %v1319_v26 }
 0x31e   :  { %v1116_v35 = vpop.f32.mrf.mxu1 }
 0x31f   :  { %3053 = vpow2.f32 %v1282_v32  ;;  %1210 = vst [vmem:[#allocation17 + $0xa8] sm:$0xff] %v1115_v33  ;;  %v1249_v37 = vmul.f32 0.5, %v1115_v33  ;;  %v3779_v38 = vadd.f32 %v1116_v35, %v3701_v55  ;;  %v1369_v39 = vadd.f32 %v1344_v34, %v3738_v31  ;;  %v1325_v35 = vld [vmem:[#allocation5 + $0x58] sm:$0xff] }
 0x320   :  { %v3048_v41 = vpop.eup %3047  ;;  %v1118_v43 = vpop.f32.mrf.mxu1 }
 0x321   :  { %v1284_v44 = vmul.f32 1.442695, %v1249_v37  ;;  %1211 = vst [vmem:[#allocation17 + $0xb0] sm:$0xff] %v3779_v38  ;;  %v1119_v45 = vadd.f32 %v1118_v43, %v3705_v56  ;;  %v1391_v46 = vpack.c.bf16 %v1369_v39, %v1368_v36  ;;  %v1345_v24 = vmul.f32 %v3048_v41, %v1320_v40 }
 0x322   :  { %v1122_v47 = vpop.f32.mrf.mxu1 }
 0x323   :  { %3055 = vpow2.f32 %v1284_v44  ;;  %1212 = vst [vmem:[#allocation17 + $0xb8] sm:$0xff] %v1119_v45  ;;  %v1250_v49 = vmul.f32 0.5, %v1119_v45  ;;  %v3785_v50 = vadd.f32 %v1122_v47, %v3701_v55  ;;  %2766 = vmatmul.mubr.bf16.gmra.mxu0 %v1391_v46  ;;  %v1370_v63 = vadd.f32 %v1345_v24, %v3744_v42  ;;  %v1326_v24 = vld [vmem:[#allocation5 + $0x60] sm:$0xff] }
 0x324   :  { %v3050_v31 = vpop.eup %3049  ;;  %v1124_v57 = vpop.f32.mrf.mxu1  ;;  %2769 = vmatprep.mubr.msk.bf16.mxu0 %vm3413_vm2, %v3412_v9 }
 0x325   :  { %v1286_v59 = vmul.f32 1.442695, %v1250_v49  ;;  %1213 = vst [vmem:[#allocation17 + $0xc0] sm:$0xff] %v3785_v50  ;;  %v1125_v60 = vadd.f32 %v1124_v57, %v3705_v56  ;;  %v1346_v61 = vmul.f32 %v3050_v31, %v1321_v48 }
 0x326   :  { %v1126_v62 = vpop.f32.mrf.mxu1 }
 0x327   :  { %3057 = vpow2.f32 %v1286_v59  ;;  %1214 = vst [vmem:[#allocation17 + $0xc8] sm:$0xff] %v1125_v60  ;;  %v1251_v1 = vmul.f32 0.5, %v1125_v60  ;;  %v3793_v58 = vadd.f32 %v1126_v62, %v3701_v55  ;;  %v1371_v3 = vadd.f32 %v1346_v61, %v3751_v53  ;;  %v1327_v62 = vld [vmem:[#allocation5 + $0x68] sm:$0xff] }
 0x328   :  { %v3052_v5 = vpop.eup %3051  ;;  %v1128_v2 = vpop.f32.mrf.mxu1 }
 0x329   :  { %v1288_v7 = vmul.f32 1.442695, %v1251_v1  ;;  %1215 = vst [vmem:[#allocation17 + $0xd0] sm:$0xff] %v3793_v58  ;;  %v1129_v8 = vadd.f32 %v1128_v2, %v3705_v56  ;;  %v1392_v11 = vpack.c.bf16 %v1371_v3, %v1370_v63  ;;  %v1347_v42 = vmul.f32 %v3052_v5, %v1322_v4 }
 0x32a   :  { %v1132_v12 = vpop.f32.mrf.mxu1 }
 0x32b   :  { %3059 = vpow2.f32 %v1288_v7  ;;  %1216 = vst [vmem:[#allocation17 + $0xd8] sm:$0xff] %v1129_v8  ;;  %v1252_v14 = vmul.f32 0.5, %v1129_v8  ;;  %v3799_v15 = vadd.f32 %v1132_v12, %v3701_v55  ;;  %2770 = vmatmul.mubr.bf16.gmra.mxu0 %v1392_v11  ;;  %v1372_v23 = vadd.f32 %v1347_v42, %v3757_v6  ;;  %v1328_v42 = vld [vmem:[#allocation5 + $0x70] sm:$0xff] }
 0x32c   :  { %v3054_v53 = vpop.eup %3053  ;;  %v1134_v18 = vpop.f32.mrf.mxu1  ;;  %2773 = vmatprep.mubr.msk.bf16.mxu0 %vm3413_vm2, %v3412_v9 }
 0x32d   :  { %v1290_v19 = vmul.f32 1.442695, %v1252_v14  ;;  %1217 = vst [vmem:[#allocation17 + $0xe0] sm:$0xff] %v3799_v15  ;;  %v1135_v20 = vadd.f32 %v1134_v18, %v3705_v56  ;;  %v1348_v21 = vmul.f32 %v3054_v53, %v1323_v13 }
 0x32e   :  { %v1136_v22 = vpop.f32.mrf.mxu1 }
 0x32f   :  { %3061 = vpow2.f32 %v1290_v19  ;;  %1218 = vst [vmem:[#allocation17 + $0xe8] sm:$0xff] %v1135_v20  ;;  %v1253_v25 = vmul.f32 0.5, %v1135_v20  ;;  %v3807_v52 = vadd.f32 %v1136_v22, %v3701_v55  ;;  %v1373_v26 = vadd.f32 %v1348_v21, %v3765_v16  ;;  %v1329_v22 = vld [vmem:[#allocation5 + $0x78] sm:$0xff] }
 0x330   :  { %v3056_v27 = vpop.eup %3055  ;;  %v1138_v17 = vpop.f32.mrf.mxu1 }
 0x331   :  { %v1292_v30 = vmul.f32 1.442695, %v1253_v25  ;;  %1219 = vst [vmem:[#allocation17 + $0xf0] sm:$0xff] %v3807_v52  ;;  %v1139_v32 = vadd.f32 %v1138_v17, %v3705_v56  ;;  %v1393_v33 = vpack.c.bf16 %v1373_v26, %v1372_v23  ;;  %v1349_v6 = vmul.f32 %v3056_v27, %v1324_v10 }
 0x332   :  { %v1142_v34 = vpop.f32.mrf.mxu1 }
 0x333   :  { %3063 = vpow2.f32 %v1292_v30  ;;  %1220 = vst [vmem:[#allocation17 + $0xf8] sm:$0xff] %v1139_v32  ;;  %v1254_v36 = vmul.f32 0.5, %v1139_v32  ;;  %v3813_v37 = vadd.f32 %v1142_v34, %v3701_v55  ;;  %2774 = vmatmul.mubr.bf16.gmra.mxu0 %v1393_v33  ;;  %v1374_v45 = vadd.f32 %v1349_v6, %v3771_v29  ;;  %v1330_v6 = vld [vmem:[#allocation5 + $0x80] sm:$0xff] }
 0x334   :  { %v3058_v16 = vpop.eup %3057  ;;  %v1144_v39 = vpop.f32.mrf.mxu1  ;;  %2777 = vmatprep.mubr.msk.bf16.mxu0 %vm3413_vm2, %v3412_v9 }
 0x335   :  { %v1294_v40 = vmul.f32 1.442695, %v1254_v36  ;;  %1221 = vst [vmem:[#allocation17 + $0x100] sm:$0xff] %v3813_v37  ;;  %v1145_v41 = vadd.f32 %v1144_v39, %v3705_v56  ;;  %v1350_v43 = vmul.f32 %v3058_v16, %v1325_v35 }
 0x336   :  { %v1146_v44 = vpop.f32.mrf.mxu1 }
 0x337   :  { %3065 = vpow2.f32 %v1294_v40  ;;  %1222 = vst [vmem:[#allocation17 + $0x108] sm:$0xff] %v1145_v41  ;;  %v1255_v46 = vmul.f32 0.5, %v1145_v41  ;;  %v3821_v47 = vadd.f32 %v1146_v44, %v3701_v55  ;;  %v1375_v48 = vadd.f32 %v1350_v43, %v3779_v38  ;;  %v1331_v44 = vld [vmem:[#allocation5 + $0x88] sm:$0xff] }
 0x338   :  { %v3060_v49 = vpop.eup %3059  ;;  %v1148_v31 = vpop.f32.mrf.mxu1 }
 0x339   :  { %v1296_v57 = vmul.f32 1.442695, %v1255_v46  ;;  %1223 = vst [vmem:[#allocation17 + $0x110] sm:$0xff] %v3821_v47  ;;  %v1149_v59 = vadd.f32 %v1148_v31, %v3705_v56  ;;  %v1394_v60 = vpack.c.bf16 %v1375_v48, %v1374_v45  ;;  %v1351_v29 = vmul.f32 %v3060_v49, %v1326_v24 }
 0x33a   :  { %v1152_v61 = vpop.f32.mrf.mxu1 }
 0x33b   :  { %3067 = vpow2.f32 %v1296_v57  ;;  %1224 = vst [vmem:[#allocation17 + $0x118] sm:$0xff] %v1149_v59  ;;  %v1256_v63 = vmul.f32 0.5, %v1149_v59  ;;  %v3827_v1 = vadd.f32 %v1152_v61, %v3701_v55  ;;  %2778 = vmatmul.mubr.bf16.gmra.mxu0 %v1394_v60  ;;  %v1376_v8 = vadd.f32 %v1351_v29, %v3785_v50 }
 0x33c   :  { %v3062_v38 = vpop.eup %3061  ;;  %v1154_v3 = vpop.f32.mrf.mxu1  ;;  %2781 = vmatprep.mubr.msk.bf16.mxu0 %vm3413_vm2, %v3412_v9 }
 0x33d   :  { %v1298_v4 = vmul.f32 1.442695, %v1256_v63  ;;  %1225 = vst [vmem:[#allocation17 + $0x120] sm:$0xff] %v3827_v1  ;;  %v1155_v5 = vadd.f32 %v1154_v3, %v3705_v56  ;;  %v1352_v2 = vmul.f32 %v3062_v38, %v1327_v62  ;;  %v1332_v38 = vld [vmem:[#allocation5 + $0x90] sm:$0xff] }
 0x33e   :  { %v1156_v7 = vpop.f32.mrf.mxu1 }
 0x33f   :  { %3069 = vpow2.f32 %v1298_v4  ;;  %1226 = vst [vmem:[#allocation17 + $0x128] sm:$0xff] %v1155_v5  ;;  %v1257_v11 = vmul.f32 0.5, %v1155_v5  ;;  %v3835_v12 = vadd.f32 %v1156_v7, %v3701_v55  ;;  %v1377_v13 = vadd.f32 %v1352_v2, %v3793_v58  ;;  %v1333_v7 = vld [vmem:[#allocation5 + $0x98] sm:$0xff] }
 0x340   :  { %v3064_v14 = vpop.eup %3063  ;;  %v1158_v53 = vpop.f32.mrf.mxu1 }
 0x341   :  { %v1300_v18 = vmul.f32 1.442695, %v1257_v11  ;;  %1227 = vst [vmem:[#allocation17 + $0x130] sm:$0xff] %v3835_v12  ;;  %v1159_v19 = vadd.f32 %v1158_v53, %v3705_v56  ;;  %v1395_v20 = vpack.c.bf16 %v1377_v13, %v1376_v8  ;;  %v1353_v50 = vmul.f32 %v3064_v14, %v1328_v42 }
 0x342   :  { %v1162_v21 = vpop.f32.mrf.mxu1 }
 0x343   :  { %3071 = vpow2.f32 %v1300_v18  ;;  %1228 = vst [vmem:[#allocation17 + $0x138] sm:$0xff] %v1159_v19  ;;  %v1258_v23 = vmul.f32 0.5, %v1159_v19  ;;  %v3841_v25 = vadd.f32 %v1162_v21, %v3701_v55  ;;  %2782 = vmatmul.mubr.bf16.gmra.mxu0 %v1395_v20  ;;  %v1378_v32 = vadd.f32 %v1353_v50, %v3799_v15  ;;  %v1334_v50 = vld [vmem:[#allocation5 + $0xa0] sm:$0xff] }
 0x344   :  { %v3066_v58 = vpop.eup %3065  ;;  %v1164_v26 = vpop.f32.mrf.mxu1  ;;  %2785 = vmatprep.mubr.msk.bf16.mxu0 %vm3413_vm2, %v3412_v9 }
 0x345   :  { %v1302_v10 = vmul.f32 1.442695, %v1258_v23  ;;  %1229 = vst [vmem:[#allocation17 + $0x140] sm:$0xff] %v3841_v25  ;;  %v1165_v27 = vadd.f32 %v1164_v26, %v3705_v56  ;;  %v1354_v17 = vmul.f32 %v3066_v58, %v1329_v22  ;;  %v3010_v23 = vld [vmem:[#allocation13] sm:$0xff]  }
 0x346   :  { %v1166_v30 = vpop.f32.mrf.mxu1  ;;  %2824 = vmatpush3.bf16.msra.mxu1 %v3010_v23 }
 0x347   :  { %3073 = vpow2.f32 %v1302_v10  ;;  %1230 = vst [vmem:[#allocation17 + $0x148] sm:$0xff] %v1165_v27  ;;  %v1259_v33 = vmul.f32 0.5, %v1165_v27  ;;  %v3849_v34 = vadd.f32 %v1166_v30, %v3701_v55  ;;  %v1379_v35 = vadd.f32 %v1354_v17, %v3807_v52  ;;  %v1335_v10 = vld [vmem:[#allocation5 + $0xa8] sm:$0xff] }
 0x348   :  { %v3068_v36 = vpop.eup %3067  ;;  %v1168_v16 = vpop.f32.mrf.mxu1 }
 0x349   :  { %v1304_v39 = vmul.f32 1.442695, %v1259_v33  ;;  %1231 = vst [vmem:[#allocation17 + $0x150] sm:$0xff] %v3849_v34  ;;  %v1169_v40 = vadd.f32 %v1168_v16, %v3705_v56  ;;  %v1396_v41 = vpack.c.bf16 %v1379_v35, %v1378_v32  ;;  %v1355_v15 = vmul.f32 %v3068_v36, %v1330_v6  ;;  %v1336_v32 = vld [vmem:[#allocation5 + $0xb0] sm:$0xff]  ;;  %v1337_v35 = vld [vmem:[#allocation5 + $0xb8] sm:$0xff] }
 0x34a   :  { %v1172_v43 = vpop.f32.mrf.mxu1 }
 0x34b   :  { %3075 = vpow2.f32 %v1304_v39  ;;  %1232 = vst [vmem:[#allocation17 + $0x158] sm:$0xff] %v1169_v40  ;;  %v1260_v45 = vmul.f32 0.5, %v1169_v40  ;;  %v3855_v46 = vadd.f32 %v1172_v43, %v3701_v55  ;;  %2786 = vmatmul.mubr.bf16.gmra.mxu0 %v1396_v41  ;;  %v1380_v59 = vadd.f32 %v1355_v15, %v3813_v37  ;;  %v1338_v39 = vld [vmem:[#allocation5 + $0xc0] sm:$0xff] }
 0x34c   :  { %v3070_v52 = vpop.eup %3069  ;;  %v1174_v48 = vpop.f32.mrf.mxu1  ;;  %2789 = vmatprep.mubr.msk.bf16.mxu0 %vm3413_vm2, %v3412_v9 }
 0x34d   :  { %v1306_v24 = vmul.f32 1.442695, %v1260_v45  ;;  %1233 = vst [vmem:[#allocation17 + $0x160] sm:$0xff] %v3855_v46  ;;  %v1175_v49 = vadd.f32 %v1174_v48, %v3705_v56  ;;  %v1356_v31 = vmul.f32 %v3070_v52, %v1331_v44  ;;  %v3011_v45 = vld [vmem:[#allocation14 + $0x70] ss:$8 sps:$4 sm:$0xff]  }
 0x34e   :  { %v1176_v57 = vpop.f32.mrf.mxu1  ;;  %v3013_v52 = vld [vmem:[#allocation14 + $0x74] ss:$8 sps:$4 sm:$0xff]   ;;  %v3016_v48 = vld [vmem:[#allocation14 + $0x64] ss:$8 sps:$4 sm:$0xff]  }
 0x34f   :  { %3077 = vpow2.f32 %v1306_v24  ;;  %1234 = vst [vmem:[#allocation17 + $0x168] sm:$0xff] %v1175_v49  ;;  %v1261_v60 = vmul.f32 0.5, %v1175_v49  ;;  %v1177_v61 = vadd.f32 %v1176_v57, %v3701_v55  ;;  %v1381_v62 = vadd.f32 %v1356_v31, %v3821_v47  ;;  %2050 = vmatprep.subr.bf16.mxu0 %v3013_v52  ;;  %2877 = vmatprep.subr.bf16.mxu1 %v3013_v52  ;;  %v3019_v24 = vld [vmem:[#allocation14 + $0x54] ss:$8 sps:$4 sm:$0xff]   ;;  %v3017_v49 = vld [vmem:[#allocation14 + $0x50] ss:$8 sps:$4 sm:$0xff]  }
 0x350   :  { %v3072_v29 = vpop.eup %3071  ;;  %v1178_v63 = vpop.f32.mrf.mxu1  ;;  %2051 = vmatpush1.bf16.msra.mxu0 %v3011_v45  ;;  %v3022_v31 = vld [vmem:[#allocation14 + $0x44] ss:$8 sps:$4 sm:$0xff]   ;;  %v3881_v57 = vld [vmem:[#allocation14 + $0x40] ss:$8 sps:$4 sm:$0xff]  }
 0x351   :  { %v1308_v3 = vmul.f32 1.442695, %v1261_v60  ;;  %1235 = vst [vmem:[#allocation17 + $0x170] sm:$0xff] %v1177_v61  ;;  %v1179_v4 = vadd.f32 %v1178_v63, %v3705_v56  ;;  %v1397_v5 = vpack.c.bf16 %v1381_v62, %v1380_v59  ;;  %v1357_v11 = vmul.f32 %v3072_v29, %v1332_v38  ;;  %2052 = vmatprep.subr.bf16.mxu0 %v3016_v48  ;;  %v3883_v59 = vld [vmem:[#allocation14 + $0x34] ss:$8 sps:$4 sm:$0xff]  }
 0x352   :  { %v1182_v2 = vpop.f32.mrf.mxu1  ;;  %v3886_v60 = vld [vmem:[#allocation14 + $0x30] ss:$8 sps:$4 sm:$0xff]   ;;  %v3894_v62 = vld [vmem:[%s4095_s9] ss:$0 sm:$0xff]  ;;  %v3897_v63 = vld [vmem:[#allocation14 + $0x20] ss:$8 sps:$4 sm:$0xff]  }
 0x353   :  { %3079 = vpow2.f32 %v1308_v3  ;;  %1236 = vst [vmem:[#allocation17 + $0x178] sm:$0xff] %v1179_v4  ;;  %v1262_v37 = vmul.f32 0.5, %v1179_v4  ;;  %v1183_v8 = vadd.f32 %v1182_v2, %v3701_v55  ;;  %2790 = vmatmul.mubr.bf16.gmra.mxu0 %v1397_v5  ;;  %v1382_v20 = vadd.f32 %v1357_v11, %v3827_v1  ;;  %v3901_v3 = vld [vmem:[#allocation14 + $0x14] ss:$8 sps:$4 sm:$0xff]   ;;  %v3904_v2 = vld [vmem:[#allocation14 + $0x10] ss:$8 sps:$4 sm:$0xff]  }
 0x354   :  { %v3074_v13 = vpop.eup %3073  ;;  %v1184_v42 = vpop.f32.mrf.mxu1  ;;  %2793 = vmatprep.mubr.msk.bf16.mxu0 %vm3413_vm2, %v3412_v9 }
 0x355   :  { %v1310_v47 = vmul.f32 1.442695, %v1262_v37  ;;  %1237 = vst [vmem:[#allocation17 + $0x180] sm:$0xff] %v1183_v8  ;;  %v1185_v14 = vadd.f32 %v1184_v42, %v3705_v56  ;;  %v1358_v53 = vmul.f32 %v3074_v13, %v1333_v7 }
 0x356   :  { %v1186_v18 = vpop.f32.mrf.mxu1 }
 0x357   :  { %3081 = vpow2.f32 %v1310_v47  ;;  %1238 = vst [vmem:[#allocation17 + $0x188] sm:$0xff] %v1185_v14  ;;  %v1263_v19 = vmul.f32 0.5, %v1185_v14  ;;  %v1383_v55 = vadd.f32 %v1358_v53, %v3835_v12  ;;  %v3911_v47 = vld [vmem:[#allocation14] ss:$8 sps:$4 sm:$0xff]  }
 0x358   :  { %v3076_v21 = vpop.eup %3075  ;;  %v1187_v22 = vpop.f32.mrf.mxu1 }
 0x359   :  { %v1312_v58 = vmul.f32 1.442695, %v1263_v19  ;;  %v1398_v26 = vpack.c.bf16 %v1383_v55, %v1382_v20  ;;  %v1359_v56 = vmul.f32 %v3076_v21, %v1334_v50 }
 0x35b   :  { %3083 = vpow2.f32 %v1312_v58  ;;  %2794 = vmatmul.mubr.bf16.gmra.mxu0 %v1398_v26  ;;  %v1384_v1 = vadd.f32 %v1359_v56, %v3841_v25 }
 0x35c   :  { %v3078_v27 = vpop.eup %3077  ;;  %2797 = vmatprep.mubr.msk.bf16.mxu0 %vm3413_vm2, %v3412_v9 }
 0x35d   :  { %v1360_v17 = vmul.f32 %v3078_v27, %v1335_v10 }
 0x35f   :  { %v1385_v12 = vadd.f32 %v1360_v17, %v3849_v34 }
 0x360   :  { %v3080_v30 = vpop.eup %3079 }
 0x361   :  { %v1399_v33 = vpack.c.bf16 %v1385_v12, %v1384_v1  ;;  %v1361_v6 = vmul.f32 %v3080_v30, %v1336_v32 }
 0x363   :  { %2798 = vmatmul.mubr.bf16.gmra.mxu0 %v1399_v33  ;;  %v1386_v40 = vadd.f32 %v1361_v6, %v3855_v46  ;;  %v3014_v46 = vld [vmem:[#allocation14 + $0x60] ss:$8 sps:$4 sm:$0xff]  }
 0x364   :  { %v3082_v36 = vpop.eup %3081  ;;  %2801 = vmatprep.mubr.msk.bf16.mxu0 %vm3413_vm2, %v3412_v9  ;;  %2053 = vmatpush1.bf16.msra.mxu0 %v3014_v46 }
 0x365   :  { %v1362_v16 = vmul.f32 %v3082_v36, %v1337_v35  ;;  %2054 = vmatprep.subr.bf16.mxu0 %v3019_v24 }
 0x367   :  { %v1387_v41 = vadd.f32 %v1362_v16, %v1177_v61  ;;  %v3889_v61 = vld [vmem:[#allocation14 + $0x24] ss:$8 sps:$4 sm:$0xff]  }
 0x368   :  { %v3084_v43 = vpop.eup %3083  ;;  %2055 = vmatpush1.bf16.msra.mxu0 %v3017_v49 }
 0x369   :  { %v1400_v44 = vpack.c.bf16 %v1387_v41, %v1386_v40  ;;  %v1363_v25 = vmul.f32 %v3084_v43, %v1338_v39  ;;  %2056 = vmatprep.subr.bf16.mxu0 %v3022_v31 }
 0x36b   :  { %2802 = vmatmul.mubr.bf16.gmra.mxu0 %v1400_v44  ;;  %v1388_v34 = vadd.f32 %v1363_v25, %v1183_v8  ;;  %v3908_v8 = vld [vmem:[#allocation14 + $0x4] ss:$8 sps:$4 sm:$0xff]  }
 0x36c   :  { %2805 = vmatprep.mubr.msk.bf16.mxu0 %vm3413_vm2, %v3412_v9  ;;  %2057 = vmatpush1.bf16.msra.mxu0 %v3881_v57 }
 0x36d   :  { %v1401_v15 = vpack.c.bf16 %v1388_v34, %v1388_v34  ;;  %2058 = vmatprep.subr.bf16.mxu0 %v3883_v59 }
 0x370   :  { %2059 = vmatpush1.bf16.msra.mxu0 %v3886_v60 }
 0x371   :  { %2060 = vmatprep.subr.bf16.mxu0 %v3889_v61 }
 0x373   :  { %2806 = vmatmul.mubr.bf16.gmra.mxu0 %v1401_v15 }
 0x374   :  { %2082 = vmatprep.mubr.bf16.mxu0 %v3411_v0  ;;  %2061 = vmatpush1.bf16.msra.mxu0 %v3897_v63 }
 0x375   :  { %2062 = vmatprep.subr.bf16.mxu0 %v3901_v3 }
 0x378   :  { %2063 = vmatpush1.bf16.msra.mxu0 %v3904_v2 }
 0x379   :  { %2064 = vmatprep.subr.bf16.mxu0 %v3908_v8 }
 0x37c   :  { %2065 = vmatpush1.bf16.msra.mxu0 %v3911_v47 }
 0x3d3   :  { %v1507_v29 = vpop.f32.mrf.mxu0 }
 0x3d4   :  { %v1508_v38 = vadd.f32 %v3894_v62, %v1507_v29 }
 0x3d5   :  { %v2759_v4 = vpop.f32.mrf.mxu0 }
 0x3d6   :  { %v1609_v7 = vmul.f32 0.2, %v1508_v38 }
 0x3d7   :  { %v1510_v5 = vpop.f32.mrf.mxu0 }
 0x3d8   :  { %v1511_v37 = vadd.f32 %v3894_v62, %v1510_v5  ;;  %v1634_v14 = vmax.f32 %v1508_v38, %v1609_v7 }
 0x3d9   :  { %v2760_v11 = vpop.f32.mrf.mxu0 }
 0x3da   :  { %v1610_v13 = vmul.f32 0.2, %v1511_v37 }
 0x3db   :  { %v1515_v42 = vpop.f32.mrf.mxu0 }
 0x3dc   :  { %v1635_v53 = vmax.f32 %v1511_v37, %v1610_v13  ;;  %v1516_v18 = vadd.f32 %v3894_v62, %v1515_v42 }
 0x3dd   :  { %v2763_v19 = vpop.f32.mrf.mxu0 }
 0x3de   :  { %v1659_v20 = vpack.c.bf16 %v1635_v53, %v1634_v14  ;;  %v1611_v21 = vmul.f32 0.2, %v1516_v18 }
 0x3df   :  { %v1518_v55 = vpop.f32.mrf.mxu0 }
 0x3e0   :  { %v1519_v22 = vadd.f32 %v3894_v62, %v1518_v55  ;;  %2826 = vmatmul.mubr.bf16.vlgmr.msra.gmra.mxu1 %v1659_v20  ;;  %v1636_v26 = vmax.f32 %v1516_v18, %v1611_v21 }
 0x3e1   :  { %v2764_v50 = vpop.f32.mrf.mxu0  ;;  %2829 = vmatprep.mubr.msk.bf16.mxu1 %vm3413_vm2, %v3412_v9  ;;  %2885 = vmatpush1.bf16.msra.mxu1 %v3011_v45 }
 0x3e2   :  { %v1612_v23 = vmul.f32 0.2, %v1519_v22  ;;  %2878 = vmatprep.subr.bf16.mxu1 %v3016_v48 }
 0x3e3   :  { %v1523_v58 = vpop.f32.mrf.mxu0 }
 0x3e4   :  { %v1637_v10 = vmax.f32 %v1519_v22, %v1612_v23  ;;  %v1524_v56 = vadd.f32 %v3894_v62, %v1523_v58 }
 0x3e5   :  { %v2767_v27 = vpop.f32.mrf.mxu0  ;;  %2886 = vmatpush1.bf16.msra.mxu1 %v3014_v46 }
 0x3e6   :  { %v1660_v17 = vpack.c.bf16 %v1637_v10, %v1636_v26  ;;  %2879 = vmatprep.subr.bf16.mxu1 %v3019_v24  ;;  %v1613_v12 = vmul.f32 0.2, %v1524_v56 }
 0x3e7   :  { %v1526_v1 = vpop.f32.mrf.mxu0 }
 0x3e8   :  { %v1527_v30 = vadd.f32 %v3894_v62, %v1526_v1  ;;  %2830 = vmatmul.mubr.bf16.gmra.mxu1 %v1660_v17  ;;  %v1638_v6 = vmax.f32 %v1524_v56, %v1613_v12 }
 0x3e9   :  { %v2768_v32 = vpop.f32.mrf.mxu0  ;;  %2833 = vmatprep.mubr.msk.bf16.mxu1 %vm3413_vm2, %v3412_v9  ;;  %2887 = vmatpush1.bf16.msra.mxu1 %v3017_v49 }
 0x3ea   :  { %v1614_v33 = vmul.f32 0.2, %v1527_v30  ;;  %2880 = vmatprep.subr.bf16.mxu1 %v3022_v31 }
 0x3eb   :  { %v1531_v35 = vpop.f32.mrf.mxu0 }
 0x3ec   :  { %v1639_v36 = vmax.f32 %v1527_v30, %v1614_v33  ;;  %v1532_v16 = vadd.f32 %v3894_v62, %v1531_v35 }
 0x3ed   :  { %v2771_v39 = vpop.f32.mrf.mxu0  ;;  %2888 = vmatpush1.bf16.msra.mxu1 %v3881_v57 }
 0x3ee   :  { %v1661_v40 = vpack.c.bf16 %v1639_v36, %v1638_v6  ;;  %2881 = vmatprep.subr.bf16.mxu1 %v3883_v59  ;;  %v1615_v43 = vmul.f32 0.2, %v1532_v16 }
 0x3ef   :  { %v1534_v41 = vpop.f32.mrf.mxu0 }
 0x3f0   :  { %v1535_v44 = vadd.f32 %v3894_v62, %v1534_v41  ;;  %2834 = vmatmul.mubr.bf16.gmra.mxu1 %v1661_v40  ;;  %v1640_v45 = vmax.f32 %v1532_v16, %v1615_v43 }
 0x3f1   :  { %v2772_v25 = vpop.f32.mrf.mxu0  ;;  %2837 = vmatprep.mubr.msk.bf16.mxu1 %vm3413_vm2, %v3412_v9  ;;  %2889 = vmatpush1.bf16.msra.mxu1 %v3886_v60 }
 0x3f2   :  { %v1616_v34 = vmul.f32 0.2, %v1535_v44  ;;  %2882 = vmatprep.subr.bf16.mxu1 %v3889_v61 }
 0x3f3   :  { %v1539_v15 = vpop.f32.mrf.mxu0 }
 0x3f4   :  { %v1641_v52 = vmax.f32 %v1535_v44, %v1616_v34  ;;  %v1540_v48 = vadd.f32 %v3894_v62, %v1539_v15 }
 0x3f5   :  { %v2775_v46 = vpop.f32.mrf.mxu0  ;;  %2890 = vmatpush1.bf16.msra.mxu1 %v3897_v63 }
 0x3f6   :  { %v1662_v24 = vpack.c.bf16 %v1641_v52, %v1640_v45  ;;  %2883 = vmatprep.subr.bf16.mxu1 %v3901_v3  ;;  %v1617_v31 = vmul.f32 0.2, %v1540_v48 }
 0x3f7   :  { %v1542_v49 = vpop.f32.mrf.mxu0 }
 0x3f8   :  { %v1543_v57 = vadd.f32 %v3894_v62, %v1542_v49  ;;  %2838 = vmatmul.mubr.bf16.gmra.mxu1 %v1662_v24  ;;  %v1642_v29 = vmax.f32 %v1540_v48, %v1617_v31 }
 0x3f9   :  { %v2776_v59 = vpop.f32.mrf.mxu0  ;;  %2841 = vmatprep.mubr.msk.bf16.mxu1 %vm3413_vm2, %v3412_v9  ;;  %2891 = vmatpush1.bf16.msra.mxu1 %v3904_v2 }
 0x3fa   :  { %v1618_v60 = vmul.f32 0.2, %v1543_v57  ;;  %2884 = vmatprep.subr.bf16.mxu1 %v3908_v8 }
 0x3fb   :  { %v1547_v61 = vpop.f32.mrf.mxu0 }
 0x3fc   :  { %v1643_v63 = vmax.f32 %v1543_v57, %v1618_v60  ;;  %v1548_v38 = vadd.f32 %v3894_v62, %v1547_v61 }
 0x3fd   :  { %v2779_v3 = vpop.f32.mrf.mxu0  ;;  %2892 = vmatpush1.bf16.msra.mxu1 %v3911_v47 }
 0x3fe   :  { %v1663_v4 = vpack.c.bf16 %v1643_v63, %v1642_v29  ;;  %v1619_v7 = vmul.f32 0.2, %v1548_v38 }
 0x3ff   :  { %v1550_v5 = vpop.f32.mrf.mxu0 }
 0x400   :  { %v1551_v37 = vadd.f32 %v3894_v62, %v1550_v5  ;;  %2842 = vmatmul.mubr.bf16.gmra.mxu1 %v1663_v4  ;;  %v1644_v13 = vmax.f32 %v1548_v38, %v1619_v7 }
 0x401   :  { %v2780_v11 = vpop.f32.mrf.mxu0  ;;  %2845 = vmatprep.mubr.msk.bf16.mxu1 %vm3413_vm2, %v3412_v9 }
 0x402   :  { %v1620_v2 = vmul.f32 0.2, %v1551_v37 }
 0x403   :  { %v1555_v8 = vpop.f32.mrf.mxu0 }
 0x404   :  { %v1645_v42 = vmax.f32 %v1551_v37, %v1620_v2  ;;  %v1556_v14 = vadd.f32 %v3894_v62, %v1555_v8 }
 0x405   :  { %v2783_v53 = vpop.f32.mrf.mxu0 }
 0x406   :  { %v1664_v18 = vpack.c.bf16 %v1645_v42, %v1644_v13  ;;  %v1621_v47 = vmul.f32 0.2, %v1556_v14 }
 0x407   :  { %v1558_v19 = vpop.f32.mrf.mxu0 }
 0x408   :  { %v1559_v20 = vadd.f32 %v3894_v62, %v1558_v19  ;;  %2846 = vmatmul.mubr.bf16.gmra.mxu1 %v1664_v18  ;;  %v1646_v50 = vmax.f32 %v1556_v14, %v1621_v47 }
 0x409   :  { %v2784_v55 = vpop.f32.mrf.mxu0  ;;  %2849 = vmatprep.mubr.msk.bf16.mxu1 %vm3413_vm2, %v3412_v9 }
 0x40a   :  { %v1622_v21 = vmul.f32 0.2, %v1559_v20 }
 0x40b   :  { %v1563_v22 = vpop.f32.mrf.mxu0 }
 0x40c   :  { %v1647_v23 = vmax.f32 %v1559_v20, %v1622_v21  ;;  %v1564_v58 = vadd.f32 %v3894_v62, %v1563_v22 }
 0x40d   :  { %v2787_v26 = vpop.f32.mrf.mxu0 }
 0x40e   :  { %v1665_v10 = vpack.c.bf16 %v1647_v23, %v1646_v50  ;;  %v1623_v27 = vmul.f32 0.2, %v1564_v58 }
 0x40f   :  { %v1566_v56 = vpop.f32.mrf.mxu0 }
 0x410   :  { %v1567_v17 = vadd.f32 %v3894_v62, %v1566_v56  ;;  %2850 = vmatmul.mubr.bf16.gmra.mxu1 %v1665_v10  ;;  %v1648_v32 = vmax.f32 %v1564_v58, %v1623_v27 }
 0x411   :  { %v2788_v1 = vpop.f32.mrf.mxu0  ;;  %2853 = vmatprep.mubr.msk.bf16.mxu1 %vm3413_vm2, %v3412_v9 }
 0x412   :  { %v1624_v12 = vmul.f32 0.2, %v1567_v17 }
 0x413   :  { %v1571_v30 = vpop.f32.mrf.mxu0 }
 0x414   :  { %v1649_v33 = vmax.f32 %v1567_v17, %v1624_v12  ;;  %v1572_v35 = vadd.f32 %v3894_v62, %v1571_v30  ;;  %v3975_v17 = vld [vmem:[%s4097_s11] ss:$0 sm:$0xff]  ;;  %s3414_s11 = smov [#allocation17]  }
 0x415   :  { %v2791_v6 = vpop.f32.mrf.mxu0  ;;  %s2478_s28 = sshll.u32 %s3414_s11, 4  ;;  %s2479_s28 = int_to_ptr.vmem [resolvable:$true] %s2478_s28 }
 0x416   :  { %v1666_v36 = vpack.c.bf16 %v1649_v33, %v1648_v32  ;;  %v1625_v39 = vmul.f32 0.2, %v1572_v35  ;;  %s3345_s17 = scalar_lea.vmem %s2479_s28, 6400  ;;  %p3350_p13 = scmp.lt.s32.totalorder %s2479_s28, %s2479_s28 }
 0x417   :  { %v1574_v16 = vpop.f32.mrf.mxu0  ;;  %p3346_p12 = scmp.ne.s32.totalorder %s2479_s28, %s3345_s17  ;;  %p3351_p0 = scmp.lt.s32.totalorder %s3345_s17, %s3345_s17 }
 0x418   :  { %v1575_v40 = vadd.f32 %v3894_v62, %v1574_v16  ;;  %2854 = vmatmul.mubr.bf16.gmra.mxu1 %v1666_v36  ;;  %v1650_v25 = vmax.f32 %v1572_v35, %v1625_v39 }
 0x419   :  { %v2792_v41 = vpop.f32.mrf.mxu0  ;;  %2857 = vmatprep.mubr.msk.bf16.mxu1 %vm3413_vm2, %v3412_v9  ;;  %p3352_p1 = por %p3351_p0, %p3350_p13 }
 0x41a   :  { %v1626_v43 = vmul.f32 0.2, %v1575_v40 }
 0x41b   :  { %v1579_v44 = vpop.f32.mrf.mxu0  ;;  %p3353_p2 = pnand %p3352_p1, %p3346_p12 }
 0x41c   :  { %v1651_v34 = vmax.f32 %v1575_v40, %v1626_v43  ;;  %v1580_v15 = vadd.f32 %v3894_v62, %v1579_v44 }
 0x41d   :  { %v2795_v45 = vpop.f32.mrf.mxu0 }
 0x41e   :  { %v1667_v52 = vpack.c.bf16 %v1651_v34, %v1650_v25  ;;  %v1627_v46 = vmul.f32 0.2, %v1580_v15 }
 0x41f   :  { %v1582_v48 = vpop.f32.mrf.mxu0 }
 0x420   :  { %v1583_v24 = vadd.f32 %v3894_v62, %v1582_v48  ;;  %2858 = vmatmul.mubr.bf16.gmra.mxu1 %v1667_v52  ;;  %v1652_v59 = vmax.f32 %v1580_v15, %v1627_v46 }
 0x421   :  { %v2796_v49 = vpop.f32.mrf.mxu0  ;;  %2861 = vmatprep.mubr.msk.bf16.mxu1 %vm3413_vm2, %v3412_v9 }
 0x422   :  { %v1628_v31 = vmul.f32 0.2, %v1583_v24 }
 0x423   :  { %v1587_v57 = vpop.f32.mrf.mxu0 }
 0x424   :  { %v1653_v60 = vmax.f32 %v1583_v24, %v1628_v31  ;;  %v1588_v61 = vadd.f32 %v3894_v62, %v1587_v57 }
 0x425   :  { %v2799_v29 = vpop.f32.mrf.mxu0 }
 0x426   :  { %v1668_v63 = vpack.c.bf16 %v1653_v60, %v1652_v59  ;;  %v1629_v3 = vmul.f32 0.2, %v1588_v61 }
 0x427   :  { %v1590_v38 = vpop.f32.mrf.mxu0 }
 0x428   :  { %v1591_v4 = vadd.f32 %v3894_v62, %v1590_v38  ;;  %2862 = vmatmul.mubr.bf16.gmra.mxu1 %v1668_v63  ;;  %v1654_v11 = vmax.f32 %v1588_v61, %v1629_v3 }
 0x429   :  { %v2800_v5 = vpop.f32.mrf.mxu0  ;;  %2865 = vmatprep.mubr.msk.bf16.mxu1 %vm3413_vm2, %v3412_v9 }
 0x42a   :  { %v1630_v7 = vmul.f32 0.2, %v1591_v4 }
 0x42b   :  { %v1595_v37 = vpop.f32.mrf.mxu0 }
 0x42c   :  { %v1655_v2 = vmax.f32 %v1591_v4, %v1630_v7  ;;  %v1596_v8 = vadd.f32 %v3894_v62, %v1595_v37 }
 0x42d   :  { %v2803_v13 = vpop.f32.mrf.mxu0 }
 0x42e   :  { %v1669_v42 = vpack.c.bf16 %v1655_v2, %v1654_v11  ;;  %v1631_v53 = vmul.f32 0.2, %v1596_v8 }
 0x42f   :  { %v1598_v14 = vpop.f32.mrf.mxu0 }
 0x430   :  { %v1599_v18 = vadd.f32 %v3894_v62, %v1598_v14  ;;  %2866 = vmatmul.mubr.bf16.gmra.mxu1 %v1669_v42  ;;  %v1656_v55 = vmax.f32 %v1596_v8, %v1631_v53 }
 0x431   :  { %v2804_v19 = vpop.f32.mrf.mxu0  ;;  %2869 = vmatprep.mubr.msk.bf16.mxu1 %vm3413_vm2, %v3412_v9 }
 0x432   :  { %v1632_v47 = vmul.f32 0.2, %v1599_v18 }
 0x433   :  { %v1603_v20 = vpop.f32.mrf.mxu0 }
 0x434   :  { %v1657_v21 = vmax.f32 %v1599_v18, %v1632_v47  ;;  %v1604_v22 = vadd.f32 %v3894_v62, %v1603_v20 }
 0x435   :  { %v2807_v50 = vpop.f32.mrf.mxu0 }
 0x436   :  { %v1670_v23 = vpack.c.bf16 %v1657_v21, %v1656_v55  ;;  %v1633_v58 = vmul.f32 0.2, %v1604_v22 }
 0x437   :  { %v1606_v26 = vpop.f32.mrf.mxu0 }
 0x438   :  { %2870 = vmatmul.mubr.bf16.gmra.mxu1 %v1670_v23  ;;  %v1658_v56 = vmax.f32 %v1604_v22, %v1633_v58 }
 0x439   :  { %v2808_v10 = vpop.f32.mrf.mxu0  ;;  %2873 = vmatprep.mubr.msk.bf16.mxu1 %vm3413_vm2, %v3412_v9 }
 0x43a   :  { %v1671_v27 = vpack.c.bf16 %v1658_v56, %v1658_v56 }
 0x440   :  { %2874 = vmatmul.mubr.bf16.gmra.mxu1 %v1671_v27 }
 0x441   :  { %2202 = vmatprep.mubr.bf16.mxu1 %v3411_v0 }
 0x4a0   :  { %v1777_v62 = vpop.f32.mrf.mxu1 }
 0x4a1   :  { %v1778_v1 = vadd.f32 %v3975_v17, %v1777_v62 }
 0x4a2   :  { %v2827_v12 = vpop.f32.mrf.mxu1 }
 0x4a3   :  { %v1879_v32 = vmul.f32 0.2, %v1778_v1 }
 0x4a4   :  { %v1780_v30 = vpop.f32.mrf.mxu1 }
 0x4a5   :  { %v1781_v33 = vadd.f32 %v3975_v17, %v1780_v30  ;;  %v1904_v36 = vmax.f32 %v1778_v1, %v1879_v32 }
 0x4a6   :  { %v2828_v35 = vpop.f32.mrf.mxu1 }
 0x4a7   :  { %v1880_v9 = vmul.f32 0.2, %v1781_v33 }
 0x4a8   :  { %v1785_v6 = vpop.f32.mrf.mxu1 }
 0x4a9   :  { %v1905_v16 = vmax.f32 %v1781_v33, %v1880_v9  ;;  %v1786_v39 = vadd.f32 %v3975_v17, %v1785_v6 }
 0x4aa   :  { %v2831_v40 = vpop.f32.mrf.mxu1 }
 0x4ab   :  { %v1929_v41 = vpack.c.bf16 %v1905_v16, %v1904_v36  ;;  %v1881_v44 = vmul.f32 0.2, %v1786_v39 }
 0x4ac   :  { %v1788_v43 = vpop.f32.mrf.mxu1 }
 0x4ad   :  { %v1789_v25 = vadd.f32 %v3975_v17, %v1788_v43  ;;  %2083 = vmatmul.mubr.bf16.vlgmr.msra.gmra.mxu0 %v1929_v41  ;;  %v1906_v52 = vmax.f32 %v1786_v39, %v1881_v44 }
 0x4ae   :  { %v2832_v34 = vpop.f32.mrf.mxu1  ;;  %2092 = vmatprep.mubr.bf16.mxu0 %v3411_v0 }
 0x4af   :  { %v1882_v15 = vmul.f32 0.2, %v1789_v25 }
 0x4b0   :  { %v1793_v45 = vpop.f32.mrf.mxu1 }
 0x4b1   :  { %v1907_v48 = vmax.f32 %v1789_v25, %v1882_v15  ;;  %v1794_v46 = vadd.f32 %v3975_v17, %v1793_v45 }
 0x4b2   :  { %v2835_v24 = vpop.f32.mrf.mxu1 }
 0x4b3   :  { %v1930_v49 = vpack.c.bf16 %v1907_v48, %v1906_v52  ;;  %v1883_v57 = vmul.f32 0.2, %v1794_v46 }
 0x4b4   :  { %v1796_v31 = vpop.f32.mrf.mxu1 }
 0x4b5   :  { %v1797_v59 = vadd.f32 %v3975_v17, %v1796_v31  ;;  %2093 = vmatmul.mubr.bf16.gmra.mxu0 %v1930_v49  ;;  %v1908_v63 = vmax.f32 %v1794_v46, %v1883_v57 }
 0x4b6   :  { %v2836_v60 = vpop.f32.mrf.mxu1  ;;  %2102 = vmatprep.mubr.bf16.mxu0 %v3411_v0 }
 0x4b7   :  { %v1884_v61 = vmul.f32 0.2, %v1797_v59 }
 0x4b8   :  { %v1801_v29 = vpop.f32.mrf.mxu1 }
 0x4b9   :  { %v1909_v38 = vmax.f32 %v1797_v59, %v1884_v61  ;;  %v1802_v3 = vadd.f32 %v3975_v17, %v1801_v29 }
 0x4ba   :  { %v2839_v4 = vpop.f32.mrf.mxu1 }
 0x4bb   :  { %v1931_v5 = vpack.c.bf16 %v1909_v38, %v1908_v63  ;;  %v1885_v37 = vmul.f32 0.2, %v1802_v3 }
 0x4bc   :  { %v1804_v7 = vpop.f32.mrf.mxu1 }
 0x4bd   :  { %v1805_v11 = vadd.f32 %v3975_v17, %v1804_v7  ;;  %2103 = vmatmul.mubr.bf16.gmra.mxu0 %v1931_v5  ;;  %v1910_v42 = vmax.f32 %v1802_v3, %v1885_v37 }
 0x4be   :  { %v2840_v2 = vpop.f32.mrf.mxu1  ;;  %2112 = vmatprep.mubr.bf16.mxu0 %v3411_v0 }
 0x4bf   :  { %v1886_v8 = vmul.f32 0.2, %v1805_v11 }
 0x4c0   :  { %v1809_v13 = vpop.f32.mrf.mxu1 }
 0x4c1   :  { %v1911_v14 = vmax.f32 %v1805_v11, %v1886_v8  ;;  %v1810_v53 = vadd.f32 %v3975_v17, %v1809_v13 }
 0x4c2   :  { %v2843_v18 = vpop.f32.mrf.mxu1 }
 0x4c3   :  { %v1932_v19 = vpack.c.bf16 %v1911_v14, %v1910_v42  ;;  %v1887_v20 = vmul.f32 0.2, %v1810_v53 }
 0x4c4   :  { %v1812_v47 = vpop.f32.mrf.mxu1 }
 0x4c5   :  { %v1813_v55 = vadd.f32 %v3975_v17, %v1812_v47  ;;  %2113 = vmatmul.mubr.bf16.gmra.mxu0 %v1932_v19  ;;  %v1912_v23 = vmax.f32 %v1810_v53, %v1887_v20 }
 0x4c6   :  { %v2844_v21 = vpop.f32.mrf.mxu1  ;;  %2122 = vmatprep.mubr.bf16.mxu0 %v3411_v0 }
 0x4c7   :  { %v1888_v22 = vmul.f32 0.2, %v1813_v55 }
 0x4c8   :  { %v1817_v50 = vpop.f32.mrf.mxu1 }
 0x4c9   :  { %v1913_v58 = vmax.f32 %v1813_v55, %v1888_v22  ;;  %v1818_v26 = vadd.f32 %v3975_v17, %v1817_v50 }
 0x4ca   :  { %v2847_v10 = vpop.f32.mrf.mxu1 }
 0x4cb   :  { %v1933_v56 = vpack.c.bf16 %v1913_v58, %v1912_v23  ;;  %v1889_v62 = vmul.f32 0.2, %v1818_v26 }
 0x4cc   :  { %v1820_v27 = vpop.f32.mrf.mxu1 }
 0x4cd   :  { %v1821_v1 = vadd.f32 %v3975_v17, %v1820_v27  ;;  %2123 = vmatmul.mubr.bf16.gmra.mxu0 %v1933_v56  ;;  %v1914_v33 = vmax.f32 %v1818_v26, %v1889_v62 }
 0x4ce   :  { %v2848_v12 = vpop.f32.mrf.mxu1  ;;  %2132 = vmatprep.mubr.bf16.mxu0 %v3411_v0 }
 0x4cf   :  { %v1890_v30 = vmul.f32 0.2, %v1821_v1 }
 0x4d0   :  { %v1825_v32 = vpop.f32.mrf.mxu1 }
 0x4d1   :  { %v1915_v35 = vmax.f32 %v1821_v1, %v1890_v30  ;;  %v1826_v9 = vadd.f32 %v3975_v17, %v1825_v32 }
 0x4d2   :  { %v2851_v6 = vpop.f32.mrf.mxu1 }
 0x4d3   :  { %v1934_v36 = vpack.c.bf16 %v1915_v35, %v1914_v33  ;;  %v1891_v39 = vmul.f32 0.2, %v1826_v9 }
 0x4d4   :  { %v1828_v16 = vpop.f32.mrf.mxu1 }
 0x4d5   :  { %v1829_v40 = vadd.f32 %v3975_v17, %v1828_v16  ;;  %2133 = vmatmul.mubr.bf16.gmra.mxu0 %v1934_v36  ;;  %v1916_v25 = vmax.f32 %v1826_v9, %v1891_v39 }
 0x4d6   :  { %v2852_v41 = vpop.f32.mrf.mxu1  ;;  %2142 = vmatprep.mubr.bf16.mxu0 %v3411_v0 }
 0x4d7   :  { %v1892_v43 = vmul.f32 0.2, %v1829_v40 }
 0x4d8   :  { %v1833_v44 = vpop.f32.mrf.mxu1 }
 0x4d9   :  { %v1917_v34 = vmax.f32 %v1829_v40, %v1892_v43  ;;  %v1834_v15 = vadd.f32 %v3975_v17, %v1833_v44 }
 0x4da   :  { %v2855_v45 = vpop.f32.mrf.mxu1 }
 0x4db   :  { %v1935_v52 = vpack.c.bf16 %v1917_v34, %v1916_v25  ;;  %v1893_v46 = vmul.f32 0.2, %v1834_v15 }
 0x4dc   :  { %v1836_v48 = vpop.f32.mrf.mxu1 }
 0x4dd   :  { %v1837_v24 = vadd.f32 %v3975_v17, %v1836_v48  ;;  %2143 = vmatmul.mubr.bf16.gmra.mxu0 %v1935_v52  ;;  %v1918_v59 = vmax.f32 %v1834_v15, %v1893_v46 }
 0x4de   :  { %v2856_v49 = vpop.f32.mrf.mxu1  ;;  %2152 = vmatprep.mubr.bf16.mxu0 %v3411_v0 }
 0x4df   :  { %v1894_v31 = vmul.f32 0.2, %v1837_v24 }
 0x4e0   :  { %v1841_v57 = vpop.f32.mrf.mxu1 }
 0x4e1   :  { %v1919_v60 = vmax.f32 %v1837_v24, %v1894_v31  ;;  %v1842_v61 = vadd.f32 %v3975_v17, %v1841_v57 }
 0x4e2   :  { %v2859_v29 = vpop.f32.mrf.mxu1 }
 0x4e3   :  { %v1936_v63 = vpack.c.bf16 %v1919_v60, %v1918_v59  ;;  %v1895_v3 = vmul.f32 0.2, %v1842_v61 }
 0x4e4   :  { %v1844_v38 = vpop.f32.mrf.mxu1 }
 0x4e5   :  { %v1845_v4 = vadd.f32 %v3975_v17, %v1844_v38  ;;  %2153 = vmatmul.mubr.bf16.gmra.mxu0 %v1936_v63  ;;  %v1920_v11 = vmax.f32 %v1842_v61, %v1895_v3 }
 0x4e6   :  { %v2860_v5 = vpop.f32.mrf.mxu1  ;;  %2162 = vmatprep.mubr.bf16.mxu0 %v3411_v0 }
 0x4e7   :  { %v1896_v7 = vmul.f32 0.2, %v1845_v4 }
 0x4e8   :  { %v1849_v37 = vpop.f32.mrf.mxu1 }
 0x4e9   :  { %v1921_v2 = vmax.f32 %v1845_v4, %v1896_v7  ;;  %v1850_v8 = vadd.f32 %v3975_v17, %v1849_v37 }
 0x4ea   :  { %v2863_v13 = vpop.f32.mrf.mxu1 }
 0x4eb   :  { %v1937_v42 = vpack.c.bf16 %v1921_v2, %v1920_v11  ;;  %v1897_v53 = vmul.f32 0.2, %v1850_v8 }
 0x4ec   :  { %v1852_v14 = vpop.f32.mrf.mxu1 }
 0x4ed   :  { %v1853_v18 = vadd.f32 %v3975_v17, %v1852_v14  ;;  %2163 = vmatmul.mubr.bf16.gmra.mxu0 %v1937_v42  ;;  %v1922_v55 = vmax.f32 %v1850_v8, %v1897_v53 }
 0x4ee   :  { %v2864_v19 = vpop.f32.mrf.mxu1  ;;  %2172 = vmatprep.mubr.bf16.mxu0 %v3411_v0 }
 0x4ef   :  { %v1898_v47 = vmul.f32 0.2, %v1853_v18 }
 0x4f0   :  { %v1857_v20 = vpop.f32.mrf.mxu1 }
 0x4f1   :  { %v1923_v21 = vmax.f32 %v1853_v18, %v1898_v47  ;;  %v1858_v22 = vadd.f32 %v3975_v17, %v1857_v20 }
 0x4f2   :  { %v2867_v50 = vpop.f32.mrf.mxu1 }
 0x4f3   :  { %v1938_v23 = vpack.c.bf16 %v1923_v21, %v1922_v55  ;;  %v1899_v26 = vmul.f32 0.2, %v1858_v22 }
 0x4f4   :  { %v1860_v58 = vpop.f32.mrf.mxu1 }
 0x4f5   :  { %v1861_v10 = vadd.f32 %v3975_v17, %v1860_v58  ;;  %2173 = vmatmul.mubr.bf16.gmra.mxu0 %v1938_v23  ;;  %v1924_v1 = vmax.f32 %v1858_v22, %v1899_v26 }
 0x4f6   :  { %v2868_v56 = vpop.f32.mrf.mxu1  ;;  %2182 = vmatprep.mubr.bf16.mxu0 %v3411_v0 }
 0x4f7   :  { %v1900_v27 = vmul.f32 0.2, %v1861_v10 }
 0x4f8   :  { %v1865_v62 = vpop.f32.mrf.mxu1 }
 0x4f9   :  { %v1925_v12 = vmax.f32 %v1861_v10, %v1900_v27  ;;  %v1866_v30 = vadd.f32 %v3975_v17, %v1865_v62 }
 0x4fa   :  { %v2871_v32 = vpop.f32.mrf.mxu1 }
 0x4fb   :  { %v1939_v33 = vpack.c.bf16 %v1925_v12, %v1924_v1  ;;  %v1901_v9 = vmul.f32 0.2, %v1866_v30 }
 0x4fc   :  { %v1868_v35 = vpop.f32.mrf.mxu1 }
 0x4fd   :  { %v1869_v6 = vadd.f32 %v3975_v17, %v1868_v35  ;;  %2183 = vmatmul.mubr.bf16.gmra.mxu0 %v1939_v33  ;;  %v1926_v40 = vmax.f32 %v1866_v30, %v1901_v9 }
 0x4fe   :  { %v2872_v36 = vpop.f32.mrf.mxu1  ;;  %2192 = vmatprep.mubr.bf16.mxu0 %v3411_v0 }
 0x4ff   :  { %v1902_v16 = vmul.f32 0.2, %v1869_v6 }
 0x500   :  { %v1873_v39 = vpop.f32.mrf.mxu1 }
 0x501   :  { %v1927_v41 = vmax.f32 %v1869_v6, %v1902_v16  ;;  %v1874_v43 = vadd.f32 %v3975_v17, %v1873_v39 }
 0x502   :  { %v2875_v44 = vpop.f32.mrf.mxu1 }
 0x503   :  { %v1940_v25 = vpack.c.bf16 %v1927_v41, %v1926_v40  ;;  %v1903_v34 = vmul.f32 0.2, %v1874_v43 }
 0x504   :  { %v1876_v15 = vpop.f32.mrf.mxu1 }
 0x505   :  { %v1928_v45 = vmax.f32 %v1874_v43, %v1903_v34  ;;  %2193 = vmatmul.mubr.bf16.gmra.mxu0 %v1940_v25 }
 0x506   :  { %v2876_v52 = vpop.f32.mrf.mxu1 }
 0x507   :  { %v1941_v48 = vpack.c.bf16 %v1928_v45, %v1928_v45 }
 0x509   :  { %2203 = vmatmul.mubr.bf16.vlgmr.msra.gmra.mxu1 %v1941_v48 }
 0x50a   :  { %3356 = shalt.err (!%p3353_p2)
}
 0x50b   :  { %s3415_s18 = smov 256   ;;  %s3416_s1 = smov 16   ;;  %v1958_v0 = vld [vmem:[%s4099_s13] sm:$0x3] }
 0x50c   :  { %2484 = dma.vmem_to_hbm [thread:$0]  %s2479_s28, 6400, %s4101_s15, [#allocation18], %s3415_s18, %s3415_s18, %s3416_s1   ;;  %v4024_v17 = vrot.slane %v1958_v0, %v940_v28  ;;  %v4028_v46 = vrot.slane %v1958_v0, %v944_v54 }
 0x50d   :  { %s3417_s13 = smov [#allocation16]  }
 0x50e   :  { %s2466_s15 = sshll.u32 %s3417_s13, 4  ;;  %s2467_s15 = int_to_ptr.vmem [resolvable:$true] %s2466_s15 }
 0x50f   :  { %s3365_s24 = scalar_lea.vmem %s2467_s15, 6400  ;;  %p3370_p4 = scmp.lt.s32.totalorder %s2467_s15, %s2467_s15 }
 0x510   :  { %p3366_p3 = scmp.ne.s32.totalorder %s2467_s15, %s3365_s24  ;;  %p3371_p5 = scmp.lt.s32.totalorder %s3365_s24, %s3365_s24 }
 0x512   :  { %p3372_p6 = por %p3371_p5, %p3370_p4 }
 0x514   :  { %p3373_p7 = pnand %p3372_p6, %p3366_p3 }
 0x56d   :  { %v2084_v24 = vpop.f32.mrf.mxu0 }
 0x56e   :  { %v2085_v49 = vadd.f32 %v2084_v24, %v4024_v17 }
 0x56f   :  { %v2086_v31 = vpop.f32.mrf.mxu0 }
 0x570   :  { %v2211_v57 = vmul.f32 0.5, %v2085_v49  ;;  %v2087_v59 = vadd.f32 %v2086_v31, %v4028_v46 }
 0x571   :  { %v2088_v60 = vpop.f32.mrf.mxu0 }
 0x572   :  { %3085 = vtanh.f32 %v2211_v57  ;;  %v2212_v61 = vmul.f32 0.5, %v2087_v59  ;;  %v2089_v29 = vadd.f32 %v2088_v60, %v4024_v17 }
 0x573   :  { %v2090_v63 = vpop.f32.mrf.mxu0 }
 0x574   :  { %3087 = vtanh.f32 %v2212_v61  ;;  %v2213_v28 = vmul.f32 0.5, %v2089_v29  ;;  %v2091_v38 = vadd.f32 %v2090_v63, %v4028_v46 }
 0x575   :  { %v2094_v51 = vpop.f32.mrf.mxu0 }
 0x576   :  { %3089 = vtanh.f32 %v2213_v28  ;;  %v2214_v54 = vmul.f32 0.5, %v2091_v38  ;;  %v2095_v3 = vadd.f32 %v2094_v51, %v4024_v17 }
 0x577   :  { %v2096_v4 = vpop.f32.mrf.mxu0 }
 0x578   :  { %3091 = vtanh.f32 %v2214_v54  ;;  %v2215_v5 = vmul.f32 0.5, %v2095_v3  ;;  %v2097_v7 = vadd.f32 %v2096_v4, %v4028_v46 }
 0x579   :  { %v2098_v37 = vpop.f32.mrf.mxu0 }
 0x57a   :  { %3093 = vtanh.f32 %v2215_v5  ;;  %v2216_v11 = vmul.f32 0.5, %v2097_v7  ;;  %v2099_v2 = vadd.f32 %v2098_v37, %v4024_v17 }
 0x57b   :  { %v2100_v8 = vpop.f32.mrf.mxu0 }
 0x57c   :  { %3095 = vtanh.f32 %v2216_v11  ;;  %v2217_v13 = vmul.f32 0.5, %v2099_v2  ;;  %v2101_v42 = vadd.f32 %v2100_v8, %v4028_v46 }
 0x57d   :  { %v2104_v14 = vpop.f32.mrf.mxu0 }
 0x57e   :  { %3097 = vtanh.f32 %v2217_v13  ;;  %v2218_v53 = vmul.f32 0.5, %v2101_v42  ;;  %v2105_v18 = vadd.f32 %v2104_v14, %v4024_v17 }
 0x57f   :  { %v3086_v19 = vpop.eup %3085  ;;  %v2106_v47 = vpop.f32.mrf.mxu0 }
 0x580   :  { %v2311_v20 = vmul.f32 0.5, %v3086_v19  ;;  %3099 = vtanh.f32 %v2218_v53  ;;  %v2219_v55 = vmul.f32 0.5, %v2105_v18  ;;  %v2107_v21 = vadd.f32 %v2106_v47, %v4028_v46 }
 0x581   :  { %v3088_v22 = vpop.eup %3087  ;;  %v2108_v50 = vpop.f32.mrf.mxu0 }
 0x582   :  { %v2361_v23 = vadd.f32 0.5, %v2311_v20  ;;  %v2312_v58 = vmul.f32 0.5, %v3088_v22  ;;  %3101 = vtanh.f32 %v2219_v55  ;;  %v2220_v26 = vmul.f32 0.5, %v2107_v21 }
 0x583   :  { %v3090_v10 = vpop.eup %3089  ;;  %v2109_v56 = vadd.f32 %v2108_v50, %v4024_v17  ;;  %v2110_v27 = vpop.f32.mrf.mxu0 }
 0x584   :  { %2411 = vst [vmem:[#allocation16] sm:$0xff] %v2361_v23  ;;  %v2362_v62 = vadd.f32 0.5, %v2312_v58  ;;  %v2313_v1 = vmul.f32 0.5, %v3090_v10  ;;  %3103 = vtanh.f32 %v2220_v26  ;;  %v2111_v12 = vadd.f32 %v2110_v27, %v4028_v46 }
 0x585   :  { %v3092_v30 = vpop.eup %3091  ;;  %v2221_v32 = vmul.f32 0.5, %v2109_v56  ;;  %v2114_v33 = vpop.f32.mrf.mxu0 }
 0x586   :  { %2412 = vst [vmem:[#allocation16 + $0x8] sm:$0xff] %v2362_v62  ;;  %v2363_v35 = vadd.f32 0.5, %v2313_v1  ;;  %v2314_v9 = vmul.f32 0.5, %v3092_v30  ;;  %v2222_v6 = vmul.f32 0.5, %v2111_v12  ;;  %v2115_v36 = vadd.f32 %v2114_v33, %v4024_v17 }
 0x587   :  { %v3094_v16 = vpop.eup %3093  ;;  %3105 = vtanh.f32 %v2221_v32  ;;  %v2116_v39 = vpop.f32.mrf.mxu0 }
 0x588   :  { %2413 = vst [vmem:[#allocation16 + $0x10] sm:$0xff] %v2363_v35  ;;  %v2364_v40 = vadd.f32 0.5, %v2314_v9  ;;  %v2315_v41 = vmul.f32 0.5, %v3094_v16  ;;  %3107 = vtanh.f32 %v2222_v6  ;;  %v2223_v43 = vmul.f32 0.5, %v2115_v36 }
 0x589   :  { %v3096_v44 = vpop.eup %3095  ;;  %v2117_v25 = vadd.f32 %v2116_v39, %v4028_v46  ;;  %v2118_v34 = vpop.f32.mrf.mxu0 }
 0x58a   :  { %2414 = vst [vmem:[#allocation16 + $0x18] sm:$0xff] %v2364_v40  ;;  %v2365_v15 = vadd.f32 0.5, %v2315_v41  ;;  %v2316_v45 = vmul.f32 0.5, %v3096_v44  ;;  %3109 = vtanh.f32 %v2223_v43  ;;  %v2119_v52 = vadd.f32 %v2118_v34, %v4024_v17 }
 0x58b   :  { %v3098_v48 = vpop.eup %3097  ;;  %v2224_v0 = vmul.f32 0.5, %v2117_v25  ;;  %v2120_v24 = vpop.f32.mrf.mxu0 }
 0x58c   :  { %2415 = vst [vmem:[#allocation16 + $0x20] sm:$0xff] %v2365_v15  ;;  %v2366_v49 = vadd.f32 0.5, %v2316_v45  ;;  %v2317_v31 = vmul.f32 0.5, %v3098_v48  ;;  %v2225_v57 = vmul.f32 0.5, %v2119_v52  ;;  %v2121_v59 = vadd.f32 %v2120_v24, %v4028_v46 }
 0x58d   :  { %v3100_v60 = vpop.eup %3099  ;;  %3111 = vtanh.f32 %v2224_v0  ;;  %v2124_v61 = vpop.f32.mrf.mxu0 }
 0x58e   :  { %2416 = vst [vmem:[#allocation16 + $0x28] sm:$0xff] %v2366_v49  ;;  %v2367_v29 = vadd.f32 0.5, %v2317_v31  ;;  %v2318_v63 = vmul.f32 0.5, %v3100_v60  ;;  %3113 = vtanh.f32 %v2225_v57  ;;  %v2226_v28 = vmul.f32 0.5, %v2121_v59 }
 0x58f   :  { %v3102_v38 = vpop.eup %3101  ;;  %v2125_v51 = vadd.f32 %v2124_v61, %v4024_v17  ;;  %v2126_v54 = vpop.f32.mrf.mxu0 }
 0x590   :  { %2417 = vst [vmem:[#allocation16 + $0x30] sm:$0xff] %v2367_v29  ;;  %v2368_v3 = vadd.f32 0.5, %v2318_v63  ;;  %v2319_v4 = vmul.f32 0.5, %v3102_v38  ;;  %3115 = vtanh.f32 %v2226_v28  ;;  %v2127_v5 = vadd.f32 %v2126_v54, %v4028_v46 }
 0x591   :  { %v3104_v7 = vpop.eup %3103  ;;  %v2227_v37 = vmul.f32 0.5, %v2125_v51  ;;  %v2128_v11 = vpop.f32.mrf.mxu0 }
 0x592   :  { %2418 = vst [vmem:[#allocation16 + $0x38] sm:$0xff] %v2368_v3  ;;  %v2369_v2 = vadd.f32 0.5, %v2319_v4  ;;  %v2320_v8 = vmul.f32 0.5, %v3104_v7  ;;  %v2228_v13 = vmul.f32 0.5, %v2127_v5  ;;  %v2129_v42 = vadd.f32 %v2128_v11, %v4024_v17 }
 0x593   :  { %3117 = vtanh.f32 %v2227_v37  ;;  %v2130_v14 = vpop.f32.mrf.mxu0 }
 0x594   :  { %v3106_v53 = vpop.eup %3105  ;;  %2419 = vst [vmem:[#allocation16 + $0x40] sm:$0xff] %v2369_v2  ;;  %v2370_v18 = vadd.f32 0.5, %v2320_v8  ;;  %3119 = vtanh.f32 %v2228_v13  ;;  %v2229_v19 = vmul.f32 0.5, %v2129_v42  ;;  %v2131_v47 = vadd.f32 %v2130_v14, %v4028_v46 }
 0x595   :  { %v3108_v20 = vpop.eup %3107  ;;  %v2321_v55 = vmul.f32 0.5, %v3106_v53  ;;  %v2134_v21 = vpop.f32.mrf.mxu0 }
 0x596   :  { %2420 = vst [vmem:[#allocation16 + $0x48] sm:$0xff] %v2370_v18  ;;  %v2322_v22 = vmul.f32 0.5, %v3108_v20  ;;  %3121 = vtanh.f32 %v2229_v19  ;;  %v2230_v50 = vmul.f32 0.5, %v2131_v47  ;;  %v2135_v23 = vadd.f32 %v2134_v21, %v4024_v17 }
 0x597   :  { %v3110_v58 = vpop.eup %3109  ;;  %v2371_v26 = vadd.f32 0.5, %v2321_v55  ;;  %v2136_v10 = vpop.f32.mrf.mxu0 }
 0x598   :  { %v2372_v56 = vadd.f32 0.5, %v2322_v22  ;;  %v2323_v27 = vmul.f32 0.5, %v3110_v58  ;;  %3123 = vtanh.f32 %v2230_v50  ;;  %v2231_v62 = vmul.f32 0.5, %v2135_v23 }
 0x599   :  { %2421 = vst [vmem:[#allocation16 + $0x50] sm:$0xff] %v2371_v26  ;;  %v2137_v1 = vadd.f32 %v2136_v10, %v4028_v46  ;;  %v2138_v12 = vpop.f32.mrf.mxu0 }
 0x59a   :  { %v3112_v30 = vpop.eup %3111  ;;  %2422 = vst [vmem:[#allocation16 + $0x58] sm:$0xff] %v2372_v56  ;;  %v2373_v32 = vadd.f32 0.5, %v2323_v27  ;;  %3125 = vtanh.f32 %v2231_v62  ;;  %v2139_v33 = vadd.f32 %v2138_v12, %v4024_v17 }
 0x59b   :  { %v3114_v35 = vpop.eup %3113  ;;  %v2324_v9 = vmul.f32 0.5, %v3112_v30  ;;  %v2232_v6 = vmul.f32 0.5, %v2137_v1  ;;  %v2140_v36 = vpop.f32.mrf.mxu0 }
 0x59c   :  { %2423 = vst [vmem:[#allocation16 + $0x60] sm:$0xff] %v2373_v32  ;;  %v2325_v16 = vmul.f32 0.5, %v3114_v35  ;;  %v2233_v39 = vmul.f32 0.5, %v2139_v33  ;;  %v2141_v40 = vadd.f32 %v2140_v36, %v4028_v46 }
 0x59d   :  { %v3116_v41 = vpop.eup %3115  ;;  %v2374_v43 = vadd.f32 0.5, %v2324_v9  ;;  %3127 = vtanh.f32 %v2232_v6  ;;  %v2144_v44 = vpop.f32.mrf.mxu0 }
 0x59e   :  { %v2375_v25 = vadd.f32 0.5, %v2325_v16  ;;  %v2326_v34 = vmul.f32 0.5, %v3116_v41  ;;  %3129 = vtanh.f32 %v2233_v39  ;;  %v2234_v15 = vmul.f32 0.5, %v2141_v40 }
 0x59f   :  { %2424 = vst [vmem:[#allocation16 + $0x68] sm:$0xff] %v2374_v43  ;;  %v2145_v45 = vadd.f32 %v2144_v44, %v4024_v17  ;;  %v2146_v52 = vpop.f32.mrf.mxu0 }
 0x5a0   :  { %v3118_v48 = vpop.eup %3117  ;;  %2425 = vst [vmem:[#allocation16 + $0x70] sm:$0xff] %v2375_v25  ;;  %v2376_v0 = vadd.f32 0.5, %v2326_v34  ;;  %3131 = vtanh.f32 %v2234_v15  ;;  %v2147_v24 = vadd.f32 %v2146_v52, %v4028_v46 }
 0x5a1   :  { %v3120_v49 = vpop.eup %3119  ;;  %v2327_v31 = vmul.f32 0.5, %v3118_v48  ;;  %v2235_v57 = vmul.f32 0.5, %v2145_v45  ;;  %v2148_v59 = vpop.f32.mrf.mxu0 }
 0x5a2   :  { %2426 = vst [vmem:[#allocation16 + $0x78] sm:$0xff] %v2376_v0  ;;  %v2328_v60 = vmul.f32 0.5, %v3120_v49  ;;  %v2236_v61 = vmul.f32 0.5, %v2147_v24  ;;  %v2149_v29 = vadd.f32 %v2148_v59, %v4024_v17 }
 0x5a3   :  { %v3122_v63 = vpop.eup %3121  ;;  %v2377_v28 = vadd.f32 0.5, %v2327_v31  ;;  %3133 = vtanh.f32 %v2235_v57  ;;  %v2150_v38 = vpop.f32.mrf.mxu0 }
 0x5a4   :  { %v2378_v51 = vadd.f32 0.5, %v2328_v60  ;;  %v2329_v54 = vmul.f32 0.5, %v3122_v63  ;;  %3135 = vtanh.f32 %v2236_v61  ;;  %v2237_v3 = vmul.f32 0.5, %v2149_v29 }
 0x5a5   :  { %v3124_v4 = vpop.eup %3123  ;;  %2427 = vst [vmem:[#allocation16 + $0x80] sm:$0xff] %v2377_v28  ;;  %v2151_v5 = vadd.f32 %v2150_v38, %v4028_v46  ;;  %v2154_v7 = vpop.f32.mrf.mxu0 }
 0x5a6   :  { %2428 = vst [vmem:[#allocation16 + $0x88] sm:$0xff] %v2378_v51  ;;  %v2379_v37 = vadd.f32 0.5, %v2329_v54  ;;  %v2330_v11 = vmul.f32 0.5, %v3124_v4  ;;  %3137 = vtanh.f32 %v2237_v3  ;;  %v2155_v2 = vadd.f32 %v2154_v7, %v4024_v17 }
 0x5a7   :  { %v3126_v8 = vpop.eup %3125  ;;  %v2238_v13 = vmul.f32 0.5, %v2151_v5  ;;  %v2156_v42 = vpop.f32.mrf.mxu0 }
 0x5a8   :  { %2429 = vst [vmem:[#allocation16 + $0x90] sm:$0xff] %v2379_v37  ;;  %v2380_v14 = vadd.f32 0.5, %v2330_v11  ;;  %v2331_v53 = vmul.f32 0.5, %v3126_v8  ;;  %v2239_v18 = vmul.f32 0.5, %v2155_v2  ;;  %v2157_v19 = vadd.f32 %v2156_v42, %v4028_v46 }
 0x5a9   :  { %3139 = vtanh.f32 %v2238_v13  ;;  %v2158_v47 = vpop.f32.mrf.mxu0 }
 0x5aa   :  { %v3128_v20 = vpop.eup %3127  ;;  %2430 = vst [vmem:[#allocation16 + $0x98] sm:$0xff] %v2380_v14  ;;  %v2381_v55 = vadd.f32 0.5, %v2331_v53  ;;  %3141 = vtanh.f32 %v2239_v18  ;;  %v2240_v21 = vmul.f32 0.5, %v2157_v19  ;;  %v2159_v22 = vadd.f32 %v2158_v47, %v4024_v17 }
 0x5ab   :  { %v3130_v50 = vpop.eup %3129  ;;  %v2332_v23 = vmul.f32 0.5, %v3128_v20  ;;  %v2160_v58 = vpop.f32.mrf.mxu0 }
 0x5ac   :  { %2431 = vst [vmem:[#allocation16 + $0xa0] sm:$0xff] %v2381_v55  ;;  %v2333_v26 = vmul.f32 0.5, %v3130_v50  ;;  %3143 = vtanh.f32 %v2240_v21  ;;  %v2241_v10 = vmul.f32 0.5, %v2159_v22  ;;  %v2161_v56 = vadd.f32 %v2160_v58, %v4028_v46 }
 0x5ad   :  { %v3132_v27 = vpop.eup %3131  ;;  %v2382_v62 = vadd.f32 0.5, %v2332_v23  ;;  %v2164_v1 = vpop.f32.mrf.mxu0 }
 0x5ae   :  { %v2383_v12 = vadd.f32 0.5, %v2333_v26  ;;  %v2334_v30 = vmul.f32 0.5, %v3132_v27  ;;  %3145 = vtanh.f32 %v2241_v10  ;;  %v2242_v32 = vmul.f32 0.5, %v2161_v56 }
 0x5af   :  { %2432 = vst [vmem:[#allocation16 + $0xa8] sm:$0xff] %v2382_v62  ;;  %v2165_v33 = vadd.f32 %v2164_v1, %v4024_v17  ;;  %v2166_v35 = vpop.f32.mrf.mxu0 }
 0x5b0   :  { %v3134_v9 = vpop.eup %3133  ;;  %2433 = vst [vmem:[#allocation16 + $0xb0] sm:$0xff] %v2383_v12  ;;  %v2384_v6 = vadd.f32 0.5, %v2334_v30  ;;  %3147 = vtanh.f32 %v2242_v32  ;;  %v2167_v36 = vadd.f32 %v2166_v35, %v4028_v46 }
 0x5b1   :  { %v3136_v16 = vpop.eup %3135  ;;  %v2335_v39 = vmul.f32 0.5, %v3134_v9  ;;  %v2243_v40 = vmul.f32 0.5, %v2165_v33  ;;  %v2168_v41 = vpop.f32.mrf.mxu0 }
 0x5b2   :  { %2434 = vst [vmem:[#allocation16 + $0xb8] sm:$0xff] %v2384_v6  ;;  %v2336_v43 = vmul.f32 0.5, %v3136_v16  ;;  %v2244_v44 = vmul.f32 0.5, %v2167_v36  ;;  %v2169_v25 = vadd.f32 %v2168_v41, %v4024_v17 }
 0x5b3   :  { %v3138_v34 = vpop.eup %3137  ;;  %v2385_v15 = vadd.f32 0.5, %v2335_v39  ;;  %3149 = vtanh.f32 %v2243_v40  ;;  %v2170_v45 = vpop.f32.mrf.mxu0 }
 0x5b4   :  { %v2386_v52 = vadd.f32 0.5, %v2336_v43  ;;  %v2337_v48 = vmul.f32 0.5, %v3138_v34  ;;  %3151 = vtanh.f32 %v2244_v44  ;;  %v2245_v0 = vmul.f32 0.5, %v2169_v25 }
 0x5b5   :  { %2435 = vst [vmem:[#allocation16 + $0xc0] sm:$0xff] %v2385_v15  ;;  %v2171_v24 = vadd.f32 %v2170_v45, %v4028_v46  ;;  %v2174_v49 = vpop.f32.mrf.mxu0 }
 0x5b6   :  { %v3140_v31 = vpop.eup %3139  ;;  %2436 = vst [vmem:[#allocation16 + $0xc8] sm:$0xff] %v2386_v52  ;;  %v2387_v57 = vadd.f32 0.5, %v2337_v48  ;;  %3153 = vtanh.f32 %v2245_v0  ;;  %v2175_v59 = vadd.f32 %v2174_v49, %v4024_v17 }
 0x5b7   :  { %v3142_v60 = vpop.eup %3141  ;;  %v2338_v61 = vmul.f32 0.5, %v3140_v31  ;;  %v2246_v29 = vmul.f32 0.5, %v2171_v24  ;;  %v2176_v63 = vpop.f32.mrf.mxu0 }
 0x5b8   :  { %2437 = vst [vmem:[#allocation16 + $0xd0] sm:$0xff] %v2387_v57  ;;  %v2339_v28 = vmul.f32 0.5, %v3142_v60  ;;  %v2247_v38 = vmul.f32 0.5, %v2175_v59  ;;  %v2177_v51 = vadd.f32 %v2176_v63, %v4028_v46 }
 0x5b9   :  { %v3144_v54 = vpop.eup %3143  ;;  %v2388_v3 = vadd.f32 0.5, %v2338_v61  ;;  %3155 = vtanh.f32 %v2246_v29  ;;  %v2178_v4 = vpop.f32.mrf.mxu0 }
 0x5ba   :  { %v2389_v5 = vadd.f32 0.5, %v2339_v28  ;;  %v2340_v7 = vmul.f32 0.5, %v3144_v54  ;;  %3157 = vtanh.f32 %v2247_v38  ;;  %v2248_v37 = vmul.f32 0.5, %v2177_v51 }
 0x5bb   :  { %v3146_v11 = vpop.eup %3145  ;;  %2438 = vst [vmem:[#allocation16 + $0xd8] sm:$0xff] %v2388_v3  ;;  %v2179_v2 = vadd.f32 %v2178_v4, %v4024_v17  ;;  %v2180_v8 = vpop.f32.mrf.mxu0 }
 0x5bc   :  { %2439 = vst [vmem:[#allocation16 + $0xe0] sm:$0xff] %v2389_v5  ;;  %v2390_v13 = vadd.f32 0.5, %v2340_v7  ;;  %v2341_v42 = vmul.f32 0.5, %v3146_v11  ;;  %3159 = vtanh.f32 %v2248_v37  ;;  %v2181_v14 = vadd.f32 %v2180_v8, %v4028_v46 }
 0x5bd   :  { %v3148_v53 = vpop.eup %3147  ;;  %v2249_v18 = vmul.f32 0.5, %v2179_v2  ;;  %v2184_v19 = vpop.f32.mrf.mxu0 }
 0x5be   :  { %2440 = vst [vmem:[#allocation16 + $0xe8] sm:$0xff] %v2390_v13  ;;  %v2391_v47 = vadd.f32 0.5, %v2341_v42  ;;  %v2342_v20 = vmul.f32 0.5, %v3148_v53  ;;  %v2250_v55 = vmul.f32 0.5, %v2181_v14  ;;  %v2185_v21 = vadd.f32 %v2184_v19, %v4024_v17 }
 0x5bf   :  { %3161 = vtanh.f32 %v2249_v18  ;;  %v2186_v22 = vpop.f32.mrf.mxu0 }
 0x5c0   :  { %v3150_v50 = vpop.eup %3149  ;;  %2441 = vst [vmem:[#allocation16 + $0xf0] sm:$0xff] %v2391_v47  ;;  %v2392_v23 = vadd.f32 0.5, %v2342_v20  ;;  %3163 = vtanh.f32 %v2250_v55  ;;  %v2251_v58 = vmul.f32 0.5, %v2185_v21  ;;  %v2187_v26 = vadd.f32 %v2186_v22, %v4028_v46 }
 0x5c1   :  { %v3152_v10 = vpop.eup %3151  ;;  %v2343_v56 = vmul.f32 0.5, %v3150_v50  ;;  %v2188_v27 = vpop.f32.mrf.mxu0 }
 0x5c2   :  { %2442 = vst [vmem:[#allocation16 + $0xf8] sm:$0xff] %v2392_v23  ;;  %v2344_v62 = vmul.f32 0.5, %v3152_v10  ;;  %3165 = vtanh.f32 %v2251_v58  ;;  %v2252_v1 = vmul.f32 0.5, %v2187_v26  ;;  %v2189_v12 = vadd.f32 %v2188_v27, %v4024_v17 }
 0x5c3   :  { %v3154_v30 = vpop.eup %3153  ;;  %v2393_v32 = vadd.f32 0.5, %v2343_v56  ;;  %v2190_v33 = vpop.f32.mrf.mxu0 }
 0x5c4   :  { %v2394_v35 = vadd.f32 0.5, %v2344_v62  ;;  %v2345_v9 = vmul.f32 0.5, %v3154_v30  ;;  %3167 = vtanh.f32 %v2252_v1  ;;  %v2253_v6 = vmul.f32 0.5, %v2189_v12 }
 0x5c5   :  { %2443 = vst [vmem:[#allocation16 + $0x100] sm:$0xff] %v2393_v32  ;;  %v2191_v36 = vadd.f32 %v2190_v33, %v4028_v46  ;;  %v2194_v16 = vpop.f32.mrf.mxu0 }
 0x5c6   :  { %v3156_v39 = vpop.eup %3155  ;;  %2444 = vst [vmem:[#allocation16 + $0x108] sm:$0xff] %v2394_v35  ;;  %v2395_v40 = vadd.f32 0.5, %v2345_v9  ;;  %3169 = vtanh.f32 %v2253_v6  ;;  %v2195_v41 = vadd.f32 %v2194_v16, %v4024_v17 }
 0x5c7   :  { %v3158_v43 = vpop.eup %3157  ;;  %v2346_v44 = vmul.f32 0.5, %v3156_v39  ;;  %v2254_v25 = vmul.f32 0.5, %v2191_v36  ;;  %v2196_v34 = vpop.f32.mrf.mxu0 }
 0x5c8   :  { %2445 = vst [vmem:[#allocation16 + $0x110] sm:$0xff] %v2395_v40  ;;  %v2347_v15 = vmul.f32 0.5, %v3158_v43  ;;  %v2255_v45 = vmul.f32 0.5, %v2195_v41  ;;  %v2197_v52 = vadd.f32 %v2196_v34, %v4028_v46 }
 0x5c9   :  { %v3160_v48 = vpop.eup %3159  ;;  %v2396_v0 = vadd.f32 0.5, %v2346_v44  ;;  %3171 = vtanh.f32 %v2254_v25  ;;  %v2198_v24 = vpop.f32.mrf.mxu0 }
 0x5ca   :  { %v2204_v49 = vpop.f32.mrf.mxu1  ;;  %v2397_v31 = vadd.f32 0.5, %v2347_v15  ;;  %v2348_v57 = vmul.f32 0.5, %v3160_v48  ;;  %3173 = vtanh.f32 %v2255_v45  ;;  %v2256_v59 = vmul.f32 0.5, %v2197_v52 }
 0x5cb   :  { %2446 = vst [vmem:[#allocation16 + $0x118] sm:$0xff] %v2396_v0  ;;  %v2199_v60 = vadd.f32 %v2198_v24, %v4024_v17  ;;  %v2205_v61 = vadd.f32 %v2204_v49, %v4024_v17  ;;  %v2200_v29 = vpop.f32.mrf.mxu0 }
 0x5cc   :  { %v2206_v63 = vpop.f32.mrf.mxu1  ;;  %v3162_v28 = vpop.eup %3161  ;;  %2447 = vst [vmem:[#allocation16 + $0x120] sm:$0xff] %v2397_v31  ;;  %v2398_v38 = vadd.f32 0.5, %v2348_v57  ;;  %3175 = vtanh.f32 %v2256_v59  ;;  %v2201_v51 = vadd.f32 %v2200_v29, %v4028_v46 }
 0x5cd   :  { %v2207_v54 = vadd.f32 %v2206_v63, %v4028_v46  ;;  %v3164_v3 = vpop.eup %3163  ;;  %v2349_v4 = vmul.f32 0.5, %v3162_v28  ;;  %v2257_v5 = vmul.f32 0.5, %v2199_v60  ;;  %v2259_v7 = vmul.f32 0.5, %v2205_v61 }
 0x5ce   :  { %v2208_v37 = vpop.f32.mrf.mxu1  ;;  %2448 = vst [vmem:[#allocation16 + $0x128] sm:$0xff] %v2398_v38  ;;  %v2350_v11 = vmul.f32 0.5, %v3164_v3  ;;  %v2258_v2 = vmul.f32 0.5, %v2201_v51 }
 0x5cf   :  { %v2260_v8 = vmul.f32 0.5, %v2207_v54  ;;  %v3166_v17 = vpop.eup %3165  ;;  %v2399_v13 = vadd.f32 0.5, %v2349_v4  ;;  %3177 = vtanh.f32 %v2257_v5 }
 0x5d0   :  { %v2209_v42 = vpop.f32.mrf.mxu1  ;;  %v2400_v14 = vadd.f32 0.5, %v2350_v11  ;;  %v2351_v53 = vmul.f32 0.5, %v3166_v17  ;;  %3179 = vtanh.f32 %v2259_v7 }
 0x5d1   :  { %v3168_v18 = vpop.eup %3167  ;;  %2449 = vst [vmem:[#allocation16 + $0x130] sm:$0xff] %v2399_v13  ;;  %3181 = vtanh.f32 %v2258_v2 }
 0x5d2   :  { %2450 = vst [vmem:[#allocation16 + $0x138] sm:$0xff] %v2400_v14  ;;  %v2401_v46 = vadd.f32 0.5, %v2351_v53  ;;  %v2352_v19 = vmul.f32 0.5, %v3168_v18  ;;  %3183 = vtanh.f32 %v2260_v8 }
 0x5d3   :  { %v3170_v47 = vpop.eup %3169 }
 0x5d4   :  { %2451 = vst [vmem:[#allocation16 + $0x140] sm:$0xff] %v2401_v46  ;;  %v2402_v20 = vadd.f32 0.5, %v2352_v19  ;;  %v2353_v55 = vmul.f32 0.5, %v3170_v47 }
 0x5d6   :  { %v3172_v21 = vpop.eup %3171  ;;  %2452 = vst [vmem:[#allocation16 + $0x148] sm:$0xff] %v2402_v20  ;;  %v2403_v22 = vadd.f32 0.5, %v2353_v55 }
 0x5d7   :  { %v3174_v50 = vpop.eup %3173  ;;  %v2354_v23 = vmul.f32 0.5, %v3172_v21 }
 0x5d8   :  { %2453 = vst [vmem:[#allocation16 + $0x150] sm:$0xff] %v2403_v22  ;;  %v2355_v58 = vmul.f32 0.5, %v3174_v50 }
 0x5d9   :  { %v3176_v26 = vpop.eup %3175  ;;  %v2404_v10 = vadd.f32 0.5, %v2354_v23 }
 0x5da   :  { %v2405_v56 = vadd.f32 0.5, %v2355_v58  ;;  %v2356_v27 = vmul.f32 0.5, %v3176_v26 }
 0x5db   :  { %2454 = vst [vmem:[#allocation16 + $0x158] sm:$0xff] %v2404_v10 }
 0x5dc   :  { %v3178_v62 = vpop.eup %3177  ;;  %2455 = vst [vmem:[#allocation16 + $0x160] sm:$0xff] %v2405_v56  ;;  %v2406_v1 = vadd.f32 0.5, %v2356_v27 }
 0x5dd   :  { %v3180_v12 = vpop.eup %3179  ;;  %v2357_v30 = vmul.f32 0.5, %v3178_v62 }
 0x5de   :  { %v3182_v32 = vpop.eup %3181  ;;  %2456 = vst [vmem:[#allocation16 + $0x168] sm:$0xff] %v2406_v1  ;;  %v2359_v33 = vmul.f32 0.5, %v3180_v12 }
 0x5df   :  { %v3184_v35 = vpop.eup %3183  ;;  %v2407_v9 = vadd.f32 0.5, %v2357_v30  ;;  %v2358_v6 = vmul.f32 0.5, %v3182_v32 }
 0x5e0   :  { %v2409_v36 = vadd.f32 0.5, %v2359_v33  ;;  %v2360_v16 = vmul.f32 0.5, %v3184_v35 }
 0x5e1   :  { %2457 = vst [vmem:[#allocation16 + $0x170] sm:$0xff] %v2407_v9  ;;  %v2408_v39 = vadd.f32 0.5, %v2358_v6 }
 0x5e2   :  { %2459 = vst [vmem:[#allocation16 + $0x180] sm:$0xff] %v2409_v36  ;;  %v2410_v40 = vadd.f32 0.5, %v2360_v16 }
 0x5e3   :  { %2458 = vst [vmem:[#allocation16 + $0x178] sm:$0xff] %v2408_v39 }
 0x5e4   :  { %2460 = vst [vmem:[#allocation16 + $0x188] sm:$0xff] %v2410_v40 }
 0x5e5   :  { %3376 = shalt.err (!%p3373_p7)
}
 0x5e6   :  { %2472 = dma.vmem_to_hbm [thread:$0]  %s2467_s15, 6400, %s4100_s14, [#allocation4], %s3415_s18, %s3415_s18, %s3416_s1  }
 0x5e7   :  { %3395 = dma.done.wait [#allocation4], 6400  }
 0x5e8   :  { %3396 = vsyncadd [#allocation4], 4294960896 }
 0x5e9   :  { %3397 = dma.done.wait [#allocation18], 6400  }
 0x5ea   :  { %3398 = vsyncadd [#allocation18], 4294960896 }
 0x5eb   :  { %2491 = vsyncpa [#allocation3], 1 }
 0x5ec   :  { %2492 = vsyncpa [#allocation6], 1 }
 0x5ed   :  { %2493 = vsyncpa [#allocation9], 1 }
 0x5ee   :  { %2494 = vsyncpa [#allocation12], 1 }
 0x5ef   :  { %2495 = vsyncpa [#allocation15], 1 }
 0x5f0   :  { %2496 = vsyncpa [#allocation4], 1 }
 0x5f1   :  { %2497 = vsyncpa [#allocation18], 1 }

</bundles_post_ra>
